<compile_context>
chip_gen: v7x
topology: tpu7x:2x2x1
jax: 0.10.0
libtpu: 0.0.40
codegen_flags: <defaults>
</compile_context>

<pallas_src>
import functools

import jax
import jax.numpy as jnp
from jax.experimental import pallas as pl
from jax.experimental.pallas import tpu as pltpu


_BN_EPS = 1e-5
_POOL_NEG = -3.0e38  # finite stand-in for -inf MaxPool padding (bf16-representable)


# ---------------------------------------------------------------------------
# Pallas kernels
# ---------------------------------------------------------------------------

def _conv_bn_act_kernel(*refs, n_src, taps, lout, has_res, pre_relu, post_relu):
    """Fused Conv1d (tap-loop matmuls) + BN scale/shift + ReLU (+ residual + ReLU).

    refs = (x_src_0, ..., x_src_{n_src-1}, w, scale, shift, [residual], out)
      x_src_i : (1, Lx_i, Cin)  bf16   batch-sliced activation view
      w       : (k, Cin, Cout)  bf16   one (Cin, Cout) matrix per tap
      scale   : (1, Cout)       f32    gamma / sqrt(var + eps)
      shift   : (1, Cout)       f32    beta - mean * scale
      residual: (1, Lout, Cout) bf16   optional shortcut branch
      out     : (1, Lout, Cout) bf16
    taps[t] = (src_index, row_offset): tap t uses x_src[src_index][off : off + lout].
    """
    xs = refs[:n_src]
    w_ref = refs[n_src]
    scale_ref = refs[n_src + 1]
    shift_ref = refs[n_src + 2]
    res_ref = refs[n_src + 3] if has_res else None
    o_ref = refs[-1]

    acc = None
    for t, (si, off) in enumerate(taps):
        xt = xs[si][0, pl.ds(off, lout), :]
        part = jnp.dot(xt, w_ref[t], preferred_element_type=jnp.float32)
        acc = part if acc is None else acc + part

    acc = acc * scale_ref[...] + shift_ref[...]
    if pre_relu:
        acc = jnp.maximum(acc, 0.0)
    if has_res:
        acc = acc + res_ref[0].astype(jnp.float32)
    if post_relu:
        acc = jnp.maximum(acc, 0.0)
    o_ref[0] = acc.astype(o_ref.dtype)


def _maxpool3_kernel(x_ref, o_ref, *, lout):
    # MaxPool1d(kernel_size=3, stride=1, padding=1): max over 3 shifted views of one
    # padded input -> single HBM read of the tensor.
    a = x_ref[0, pl.ds(0, lout), :]
    b = x_ref[0, pl.ds(1, lout), :]
    c = x_ref[0, pl.ds(2, lout), :]
    o_ref[0] = jnp.maximum(jnp.maximum(a, b), c)


def _linear_kernel(x_ref, w_ref, b_ref, o_ref):
    acc = jnp.dot(x_ref[...], w_ref[...], preferred_element_type=jnp.float32)
    o_ref[...] = acc + b_ref[...]


# ---------------------------------------------------------------------------
# Pallas wrappers (full-array blocks, grid over batch)
# ---------------------------------------------------------------------------

def _conv_pallas_call(srcs, taps, w, scale, shift, residual, lout,
                      pre_relu, post_relu):
    B = srcs[0].shape[0]
    k, cin, cout = w.shape

    in_specs = [pl.BlockSpec((1,) + s.shape[1:], lambda b: (b, 0, 0)) for s in srcs]
    in_specs += [
        pl.BlockSpec((k, cin, cout), lambda b: (0, 0, 0)),
        pl.BlockSpec((1, cout), lambda b: (0, 0)),
        pl.BlockSpec((1, cout), lambda b: (0, 0)),
    ]
    args = list(srcs) + [w, scale, shift]
    if residual is not None:
        in_specs.append(pl.BlockSpec((1, lout, cout), lambda b: (b, 0, 0)))
        args.append(residual)

    out_dtype = jnp.bfloat16
    flops = 2 * B * lout * k * cin * cout
    bytes_accessed = sum(int(a.size) * a.dtype.itemsize for a in args)
    bytes_accessed += B * lout * cout * jnp.dtype(out_dtype).itemsize

    kernel = functools.partial(
        _conv_bn_act_kernel, n_src=len(srcs), taps=taps, lout=lout,
        has_res=residual is not None, pre_relu=pre_relu, post_relu=post_relu)

    return pl.pallas_call(
        kernel,
        out_shape=jax.ShapeDtypeStruct((B, lout, cout), out_dtype),
        grid=(B,),
        in_specs=in_specs,
        out_specs=pl.BlockSpec((1, lout, cout), lambda b: (b, 0, 0)),
        compiler_params=pltpu.CompilerParams(dimension_semantics=("parallel",)),
        cost_estimate=pl.CostEstimate(flops=flops, transcendentals=0,
                                      bytes_accessed=int(bytes_accessed)),
    )(*args)


def conv1d_bn_act(x, layer, *, stride, padding, residual=None,
                  pre_relu=True, post_relu=False):
    """x: (B, L, Cin) bf16; layer: {'w': (k,Cin,Cout) bf16, 'scale'/'shift': (1,Cout) f32}."""
    w = layer["w"]
    k = w.shape[0]
    B, L, _ = x.shape
    lout = (L + 2 * padding - k) // stride + 1
    xp = jnp.pad(x, ((0, 0), (padding, padding), (0, 0))) if padding > 0 else x
    if stride == 1:
        # single padded source, shifted in-kernel views -> activations read once
        srcs = [xp]
        taps = tuple((0, t) for t in range(k))
    else:
        # one decimated view per tap (XLA strided slices, no gather); ~k/stride x bytes
        srcs = [xp[:, t::stride, :][:, :lout, :] for t in range(k)]
        taps = tuple((t, 0) for t in range(k))
    return _conv_pallas_call(srcs, taps, w, layer["scale"], layer["shift"],
                             residual, lout, pre_relu, post_relu)


def maxpool1d_k3s1p1(x):
    """MaxPool1d(kernel_size=3, stride=1, padding=1) on (B, L, C)."""
    B, L, C = x.shape
    xp = jnp.pad(x, ((0, 0), (1, 1), (0, 0)), constant_values=_POOL_NEG)
    return pl.pallas_call(
        functools.partial(_maxpool3_kernel, lout=L),
        out_shape=jax.ShapeDtypeStruct((B, L, C), x.dtype),
        grid=(B,),
        in_specs=[pl.BlockSpec((1, L + 2, C), lambda b: (b, 0, 0))],
        out_specs=pl.BlockSpec((1, L, C), lambda b: (b, 0, 0)),
        compiler_params=pltpu.CompilerParams(dimension_semantics=("parallel",)),
    )(xp)


def linear(x, w, b):
    """x: (B, F) bf16; w: (F, N) bf16; b: (1, N) f32 -> (B, N) f32."""
    B, F = x.shape
    N = w.shape[1]
    return pl.pallas_call(
        _linear_kernel,
        out_shape=jax.ShapeDtypeStruct((B, N), jnp.float32),
        grid=(1,),
        in_specs=[pl.BlockSpec((B, F), lambda i: (0, 0)),
                  pl.BlockSpec((F, N), lambda i: (0, 0)),
                  pl.BlockSpec((1, N), lambda i: (0, 0))],
        out_specs=pl.BlockSpec((B, N), lambda i: (0, 0)),
        cost_estimate=pl.CostEstimate(
            flops=2 * B * F * N, transcendentals=0,
            bytes_accessed=int(x.size * 2 + w.size * 2 + b.size * 4 + B * N * 4)),
    )(x, w, b)


# ---------------------------------------------------------------------------
# ResBlock / ResNet forward
# ---------------------------------------------------------------------------

def res_block_forward(x, p):
    s = p["stride"]
    h = conv1d_bn_act(x, p["conv1"], stride=s, padding=1, pre_relu=True)
    # TODO(synk): nn.Dropout(0.5) is the identity in eval mode; not modeled as a kernel.
    if "shortcut" in p:
        sc = conv1d_bn_act(x, p["shortcut"], stride=s, padding=0,
                           pre_relu=False, post_relu=False)
    else:
        sc = x
    # conv2 + BN + ReLU, then shortcut add + final ReLU fused into one kernel epilogue.
    return conv1d_bn_act(h, p["conv2"], stride=1, padding=1,
                         residual=sc, pre_relu=True, post_relu=True)


def resnet_forward(x_ncl, params):
    # PyTorch input is NCL (B, 294, L); compute in channels-last (B, L, C) bf16.
    x = jnp.transpose(x_ncl, (0, 2, 1)).astype(jnp.bfloat16)
    B = x.shape[0]

    # conv1: Conv1d(294,256,k3,s1,p1) + BN + ReLU + MaxPool1d(k3,s1,p1)
    h = conv1d_bn_act(x, params["conv1"], stride=1, padding=1, pre_relu=True)
    h = maxpool1d_k3s1p1(h)

    for p in params["blocks"]:
        h = res_block_forward(h, p)

    # Flatten in PyTorch NCL order: (B, C, L) -> (B, C*L)
    flat = jnp.transpose(h, (0, 2, 1)).reshape(B, -1)

    # TODO(synk): original nn.Linear(32, num_classes) is shape-inconsistent with the
    # flattened size (64 * L_final >= 64); the Linear is sized to the actual flat dim.
    # TODO(synk): self.avgpool (AdaptiveAvgPool2d((64,1))) is defined but never used
    # in the PyTorch forward, so it is intentionally not implemented.
    return linear(flat, params["fc_w"], params["fc_b"])


# ---------------------------------------------------------------------------
# Deterministic parameter init (PyTorch layout) + one-time kernel-ready prep
# ---------------------------------------------------------------------------

def _init_conv(key, cout, cin, k):
    return (0.05 * jax.random.normal(key, (cout, cin, k))).astype(jnp.float32)


def _init_bn(key, c):
    k1, k2, k3, k4 = jax.random.split(key, 4)
    gamma = (1.0 + 0.1 * jax.random.normal(k1, (c,))).astype(jnp.float32)
    beta = (0.1 * jax.random.normal(k2, (c,))).astype(jnp.float32)
    mean = (0.1 * jax.random.normal(k3, (c,))).astype(jnp.float32)
    var = (1.0 + 0.1 * jax.random.uniform(k4, (c,))).astype(jnp.float32)
    return (gamma, beta, mean, var)


def _init_resblock(key, cin, cout, stride):
    keys = jax.random.split(key, 6)
    p = {"conv1_w": _init_conv(keys[0], cout, cin, 3), "bn1": _init_bn(keys[1], cout),
         "conv2_w": _init_conv(keys[2], cout, cout, 3), "bn2": _init_bn(keys[3], cout),
         "stride": stride}
    if stride != 1 or cin != cout:
        p["sc_w"] = _init_conv(keys[4], cout, cin, 1)
        p["sc_bn"] = _init_bn(keys[5], cout)
    return p


def init_resnet(key, num_classes=32, fc_in=64):
    keys = jax.random.split(key, 4)
    params = {
        "conv1_w": _init_conv(keys[0], 256, 294, 3),
        "conv1_bn": _init_bn(keys[1], 256),
        "fc_w": (0.05 * jax.random.normal(keys[2], (num_classes, fc_in))).astype(jnp.float32),
        "fc_b": (0.05 * jax.random.normal(keys[3], (num_classes,))).astype(jnp.float32),
    }
    inchannel = 256
    blocks = []
    bidx = 0
    for channels, num_blocks, stride in [(128, 2, 2), (64, 2, 2), (32, 2, 2), (64, 2, 2)]:
        for s in [stride] + [1] * (num_blocks - 1):
            blocks.append(_init_resblock(jax.random.fold_in(key, 100 + bidx),
                                         inchannel, channels, s))
            inchannel = channels
            bidx += 1
    params["blocks"] = blocks
    return params


def _prep_conv(w_oik, bn):
    """PyTorch Conv1d weight (Cout, Cin, k) + eval-mode BN -> kernel-ready params."""
    gamma, beta, mean, var = bn
    scale = gamma * jax.lax.rsqrt(var + _BN_EPS)
    shift = beta - mean * scale
    w_kic = jnp.transpose(w_oik, (2, 1, 0)).astype(jnp.bfloat16)  # (k, Cin, Cout)
    return {"w": w_kic,
            "scale": scale.reshape(1, -1).astype(jnp.float32),
            "shift": shift.reshape(1, -1).astype(jnp.float32)}


def prepare_params(raw):
    """One-time pre-transform: transpose/cast conv weights to bf16, fold BN, pack fc."""
    params = {
        "conv1": _prep_conv(raw["conv1_w"], raw["conv1_bn"]),
        "fc_w": jnp.transpose(raw["fc_w"]).astype(jnp.bfloat16),  # (fc_in, num_classes)
        "fc_b": raw["fc_b"].reshape(1, -1).astype(jnp.float32),
        "blocks": [],
    }
    for b in raw["blocks"]:
        nb = {"stride": b["stride"],
              "conv1": _prep_conv(b["conv1_w"], b["bn1"]),
              "conv2": _prep_conv(b["conv2_w"], b["bn2"])}
        if "sc_w" in b:
            nb["shortcut"] = _prep_conv(b["sc_w"], b["sc_bn"])
        params["blocks"].append(nb)
    return params


# ---------------------------------------------------------------------------

if __name__ == "__main__":
    key = jax.random.PRNGKey(0)
    k_in, k_par = jax.random.split(key)

    B, C_in, L = 2, 294, 16   # PyTorch NCL input; L=16 -> final length 1, flatten = 64
    x = jax.random.normal(k_in, (B, C_in, L), dtype=jnp.float32)

    num_classes = 32
    raw = init_resnet(k_par, num_classes=num_classes, fc_in=64)
    params = prepare_params(raw)

    forward = jax.jit(lambda inp: resnet_forward(inp, params))
    out = jax.block_until_ready(forward(x))

    assert out.shape == (B, num_classes), out.shape
    assert bool(jnp.all(jnp.isfinite(out)))
    print("KERNEL_OK")
</pallas_src>

<mosaic_0001>
module attributes {stable_mosaic.version = 11 : i64} {
  func.func @_conv_bn_act_kernel(%arg0: i32, %arg1: memref<1x18x294xbf16, #tpu.memory_space<vmem>>, %arg2: memref<3x294x256xbf16, #tpu.memory_space<vmem>>, %arg3: memref<1x256xf32, #tpu.memory_space<vmem>>, %arg4: memref<1x256xf32, #tpu.memory_space<vmem>>, %arg5: memref<1x16x256xbf16, #tpu.memory_space<vmem>>) attributes {dimension_semantics = [#tpu.dimension_semantics<parallel>], iteration_bounds = array<i64: 2>, scalar_prefetch = 0 : i64, scratch_operands = 0 : i64, tpu.core_type = #tpu.core_type<tc>, window_params = [{transform_indices = @transform_0, window_bounds = array<i64: 1, 18, 294>}, {pipeline_mode = #tpu.pipeline_mode<synchronous>, transform_indices = @transform_1, window_bounds = array<i64: 3, 294, 256>}, {pipeline_mode = #tpu.pipeline_mode<synchronous>, transform_indices = @transform_2, window_bounds = array<i64: 1, 256>}, {pipeline_mode = #tpu.pipeline_mode<synchronous>, transform_indices = @transform_3, window_bounds = array<i64: 1, 256>}, {transform_indices = @transform_4, window_bounds = array<i64: 1, 16, 256>}]} {
    %c0 = arith.constant 0 : index
    %c0_0 = arith.constant 0 : index
    %c0_1 = arith.constant 0 : index
    %0 = vector.load %arg1[%c0, %c0_0, %c0_1] : memref<1x18x294xbf16, #tpu.memory_space<vmem>>, vector<1x16x294xbf16>
    %1 = vector.shape_cast %0 : vector<1x16x294xbf16> to vector<16x294xbf16>
    %c0_2 = arith.constant 0 : index
    %c0_3 = arith.constant 0 : index
    %c0_4 = arith.constant 0 : index
    %2 = vector.load %arg2[%c0_2, %c0_3, %c0_4] : memref<3x294x256xbf16, #tpu.memory_space<vmem>>, vector<1x294x256xbf16>
    %3 = vector.shape_cast %2 : vector<1x294x256xbf16> to vector<294x256xbf16>
    %cst = arith.constant dense<0.000000e+00> : vector<16x256xf32>
    %4 = tpu.matmul %1, %3, %cst {dimension_numbers = #tpu.dot_dimension_numbers<[1], [0], [0], [1], [0, 0, 1, 1], [], []>} : vector<16x294xbf16>, vector<294x256xbf16>, vector<16x256xf32> -> vector<16x256xf32>
    %c0_5 = arith.constant 0 : index
    %c1 = arith.constant 1 : index
    %c0_6 = arith.constant 0 : index
    %5 = vector.load %arg1[%c0_5, %c1, %c0_6] : memref<1x18x294xbf16, #tpu.memory_space<vmem>>, vector<1x16x294xbf16>
    %6 = vector.shape_cast %5 : vector<1x16x294xbf16> to vector<16x294xbf16>
    %c1_7 = arith.constant 1 : index
    %c0_8 = arith.constant 0 : index
    %c0_9 = arith.constant 0 : index
    %7 = vector.load %arg2[%c1_7, %c0_8, %c0_9] : memref<3x294x256xbf16, #tpu.memory_space<vmem>>, vector<1x294x256xbf16>
    %8 = vector.shape_cast %7 : vector<1x294x256xbf16> to vector<294x256xbf16>
    %cst_10 = arith.constant dense<0.000000e+00> : vector<16x256xf32>
    %9 = tpu.matmul %6, %8, %cst_10 {dimension_numbers = #tpu.dot_dimension_numbers<[1], [0], [0], [1], [0, 0, 1, 1], [], []>} : vector<16x294xbf16>, vector<294x256xbf16>, vector<16x256xf32> -> vector<16x256xf32>
    %10 = arith.addf %4, %9 : vector<16x256xf32>
    %c0_11 = arith.constant 0 : index
    %c2 = arith.constant 2 : index
    %c0_12 = arith.constant 0 : index
    %11 = vector.load %arg1[%c0_11, %c2, %c0_12] : memref<1x18x294xbf16, #tpu.memory_space<vmem>>, vector<1x16x294xbf16>
    %12 = vector.shape_cast %11 : vector<1x16x294xbf16> to vector<16x294xbf16>
    %c2_13 = arith.constant 2 : index
    %c0_14 = arith.constant 0 : index
    %c0_15 = arith.constant 0 : index
    %13 = vector.load %arg2[%c2_13, %c0_14, %c0_15] : memref<3x294x256xbf16, #tpu.memory_space<vmem>>, vector<1x294x256xbf16>
    %14 = vector.shape_cast %13 : vector<1x294x256xbf16> to vector<294x256xbf16>
    %cst_16 = arith.constant dense<0.000000e+00> : vector<16x256xf32>
    %15 = tpu.matmul %12, %14, %cst_16 {dimension_numbers = #tpu.dot_dimension_numbers<[1], [0], [0], [1], [0, 0, 1, 1], [], []>} : vector<16x294xbf16>, vector<294x256xbf16>, vector<16x256xf32> -> vector<16x256xf32>
    %16 = arith.addf %10, %15 : vector<16x256xf32>
    %c0_17 = arith.constant 0 : index
    %c0_18 = arith.constant 0 : index
    %17 = vector.load %arg3[%c0_17, %c0_18] : memref<1x256xf32, #tpu.memory_space<vmem>>, vector<1x256xf32>
    %18 = vector.broadcast %17 : vector<1x256xf32> to vector<16x256xf32>
    %19 = arith.mulf %16, %18 : vector<16x256xf32>
    %c0_19 = arith.constant 0 : index
    %c0_20 = arith.constant 0 : index
    %20 = vector.load %arg4[%c0_19, %c0_20] : memref<1x256xf32, #tpu.memory_space<vmem>>, vector<1x256xf32>
    %21 = vector.broadcast %20 : vector<1x256xf32> to vector<16x256xf32>
    %22 = arith.addf %19, %21 : vector<16x256xf32>
    %cst_21 = arith.constant 0.000000e+00 : f32
    %23 = vector.broadcast %cst_21 : f32 to vector<16x256xf32>
    %24 = arith.maximumf %22, %23 : vector<16x256xf32>
    %25 = arith.truncf %24 : vector<16x256xf32> to vector<16x256xbf16>
    %c0_22 = arith.constant 0 : index
    %c0_23 = arith.constant 0 : index
    %c0_24 = arith.constant 0 : index
    %26 = vector.load %arg5[%c0_22, %c0_23, %c0_24] : memref<1x16x256xbf16, #tpu.memory_space<vmem>>, vector<1x16x256xbf16>
    %27 = vector.shape_cast %26 : vector<1x16x256xbf16> to vector<16x256xbf16>
    %28 = vector.shape_cast %25 : vector<16x256xbf16> to vector<1x16x256xbf16>
    tpu.vector_store %arg5[%c0_22, %c0_23, %c0_24], %28 {strides = array<i32>} : memref<1x16x256xbf16, #tpu.memory_space<vmem>>, vector<1x16x256xbf16>,
    return
  }
  func.func @transform_0(%arg0: i32) -> (i32, i32, i32) {
    %c0_i32 = arith.constant 0 : i32
    %c0_i32_0 = arith.constant 0 : i32
    %c0_i32_1 = arith.constant 0 : i32
    return %arg0, %c0_i32, %c0_i32_0 : i32, i32, i32
  }
  func.func @transform_1(%arg0: i32) -> (i32, i32, i32) {
    %c0_i32 = arith.constant 0 : i32
    %c0_i32_0 = arith.constant 0 : i32
    %c0_i32_1 = arith.constant 0 : i32
    %c0_i32_2 = arith.constant 0 : i32
    return %c0_i32, %c0_i32_0, %c0_i32_1 : i32, i32, i32
  }
  func.func @transform_2(%arg0: i32) -> (i32, i32) {
    %c0_i32 = arith.constant 0 : i32
    %c0_i32_0 = arith.constant 0 : i32
    %c0_i32_1 = arith.constant 0 : i32
    return %c0_i32, %c0_i32_0 : i32, i32
  }
  func.func @transform_3(%arg0: i32) -> (i32, i32) {
    %c0_i32 = arith.constant 0 : i32
    %c0_i32_0 = arith.constant 0 : i32
    %c0_i32_1 = arith.constant 0 : i32
    return %c0_i32, %c0_i32_0 : i32, i32
  }
  func.func @transform_4(%arg0: i32) -> (i32, i32, i32) {
    %c0_i32 = arith.constant 0 : i32
    %c0_i32_0 = arith.constant 0 : i32
    %c0_i32_1 = arith.constant 0 : i32
    return %arg0, %c0_i32, %c0_i32_0 : i32, i32, i32
  }
}

module attributes {stable_mosaic.version = 11 : i64} {
  func.func @_maxpool3_kernel(%arg0: i32, %arg1: memref<1x18x256xbf16, #tpu.memory_space<vmem>>, %arg2: memref<1x16x256xbf16, #tpu.memory_space<vmem>>) attributes {dimension_semantics = [#tpu.dimension_semantics<parallel>], iteration_bounds = array<i64: 2>, scalar_prefetch = 0 : i64, scratch_operands = 0 : i64, tpu.core_type = #tpu.core_type<tc>, window_params = [{transform_indices = @transform_0, window_bounds = array<i64: 1, 18, 256>}, {transform_indices = @transform_1, window_bounds = array<i64: 1, 16, 256>}]} {
    %c0 = arith.constant 0 : index
    %c0_0 = arith.constant 0 : index
    %c0_1 = arith.constant 0 : index
    %0 = vector.load %arg1[%c0, %c0_0, %c0_1] : memref<1x18x256xbf16, #tpu.memory_space<vmem>>, vector<1x16x256xbf16>
    %1 = vector.shape_cast %0 : vector<1x16x256xbf16> to vector<16x256xbf16>
    %c0_2 = arith.constant 0 : index
    %c1 = arith.constant 1 : index
    %c0_3 = arith.constant 0 : index
    %2 = vector.load %arg1[%c0_2, %c1, %c0_3] : memref<1x18x256xbf16, #tpu.memory_space<vmem>>, vector<1x16x256xbf16>
    %3 = vector.shape_cast %2 : vector<1x16x256xbf16> to vector<16x256xbf16>
    %c0_4 = arith.constant 0 : index
    %c2 = arith.constant 2 : index
    %c0_5 = arith.constant 0 : index
    %4 = vector.load %arg1[%c0_4, %c2, %c0_5] : memref<1x18x256xbf16, #tpu.memory_space<vmem>>, vector<1x16x256xbf16>
    %5 = vector.shape_cast %4 : vector<1x16x256xbf16> to vector<16x256xbf16>
    %6 = arith.maximumf %1, %3 : vector<16x256xbf16>
    %7 = arith.maximumf %6, %5 : vector<16x256xbf16>
    %c0_6 = arith.constant 0 : index
    %c0_7 = arith.constant 0 : index
    %c0_8 = arith.constant 0 : index
    %8 = vector.load %arg2[%c0_6, %c0_7, %c0_8] : memref<1x16x256xbf16, #tpu.memory_space<vmem>>, vector<1x16x256xbf16>
    %9 = vector.shape_cast %8 : vector<1x16x256xbf16> to vector<16x256xbf16>
    %10 = vector.shape_cast %7 : vector<16x256xbf16> to vector<1x16x256xbf16>
    tpu.vector_store %arg2[%c0_6, %c0_7, %c0_8], %10 {strides = array<i32>} : memref<1x16x256xbf16, #tpu.memory_space<vmem>>, vector<1x16x256xbf16>,
    return
  }
  func.func @transform_0(%arg0: i32) -> (i32, i32, i32) {
    %c0_i32 = arith.constant 0 : i32
    %c0_i32_0 = arith.constant 0 : i32
    %c0_i32_1 = arith.constant 0 : i32
    return %arg0, %c0_i32, %c0_i32_0 : i32, i32, i32
  }
  func.func @transform_1(%arg0: i32) -> (i32, i32, i32) {
    %c0_i32 = arith.constant 0 : i32
    %c0_i32_0 = arith.constant 0 : i32
    %c0_i32_1 = arith.constant 0 : i32
    return %arg0, %c0_i32, %c0_i32_0 : i32, i32, i32
  }
}

module attributes {stable_mosaic.version = 11 : i64} {
  func.func @_conv_bn_act_kernel(%arg0: i32, %arg1: memref<1x8x256xbf16, #tpu.memory_space<vmem>>, %arg2: memref<1x256x128xbf16, #tpu.memory_space<vmem>>, %arg3: memref<1x128xf32, #tpu.memory_space<vmem>>, %arg4: memref<1x128xf32, #tpu.memory_space<vmem>>, %arg5: memref<1x8x128xbf16, #tpu.memory_space<vmem>>) attributes {dimension_semantics = [#tpu.dimension_semantics<parallel>], iteration_bounds = array<i64: 2>, scalar_prefetch = 0 : i64, scratch_operands = 0 : i64, tpu.core_type = #tpu.core_type<tc>, window_params = [{transform_indices = @transform_0, window_bounds = array<i64: 1, 8, 256>}, {pipeline_mode = #tpu.pipeline_mode<synchronous>, transform_indices = @transform_1, window_bounds = array<i64: 1, 256, 128>}, {pipeline_mode = #tpu.pipeline_mode<synchronous>, transform_indices = @transform_2, window_bounds = array<i64: 1, 128>}, {pipeline_mode = #tpu.pipeline_mode<synchronous>, transform_indices = @transform_3, window_bounds = array<i64: 1, 128>}, {transform_indices = @transform_4, window_bounds = array<i64: 1, 8, 128>}]} {
    %c0 = arith.constant 0 : index
    %c0_0 = arith.constant 0 : index
    %c0_1 = arith.constant 0 : index
    %0 = vector.load %arg1[%c0, %c0_0, %c0_1] : memref<1x8x256xbf16, #tpu.memory_space<vmem>>, vector<1x8x256xbf16>
    %1 = vector.shape_cast %0 : vector<1x8x256xbf16> to vector<8x256xbf16>
    %c0_2 = arith.constant 0 : index
    %c0_3 = arith.constant 0 : index
    %c0_4 = arith.constant 0 : index
    %2 = vector.load %arg2[%c0_2, %c0_3, %c0_4] : memref<1x256x128xbf16, #tpu.memory_space<vmem>>, vector<1x256x128xbf16>
    %3 = vector.shape_cast %2 : vector<1x256x128xbf16> to vector<256x128xbf16>
    %cst = arith.constant dense<0.000000e+00> : vector<8x128xf32>
    %4 = tpu.matmul %1, %3, %cst {dimension_numbers = #tpu.dot_dimension_numbers<[1], [0], [0], [1], [0, 0, 1, 1], [], []>} : vector<8x256xbf16>, vector<256x128xbf16>, vector<8x128xf32> -> vector<8x128xf32>
    %c0_5 = arith.constant 0 : index
    %c0_6 = arith.constant 0 : index
    %5 = vector.load %arg3[%c0_5, %c0_6] : memref<1x128xf32, #tpu.memory_space<vmem>>, vector<1x128xf32>
    %6 = vector.broadcast %5 : vector<1x128xf32> to vector<8x128xf32>
    %7 = arith.mulf %4, %6 : vector<8x128xf32>
    %c0_7 = arith.constant 0 : index
    %c0_8 = arith.constant 0 : index
    %8 = vector.load %arg4[%c0_7, %c0_8] : memref<1x128xf32, #tpu.memory_space<vmem>>, vector<1x128xf32>
    %9 = vector.broadcast %8 : vector<1x128xf32> to vector<8x128xf32>
    %10 = arith.addf %7, %9 : vector<8x128xf32>
    %11 = arith.truncf %10 : vector<8x128xf32> to vector<8x128xbf16>
    %c0_9 = arith.constant 0 : index
    %c0_10 = arith.constant 0 : index
    %c0_11 = arith.constant 0 : index
    %12 = vector.load %arg5[%c0_9, %c0_10, %c0_11] : memref<1x8x128xbf16, #tpu.memory_space<vmem>>, vector<1x8x128xbf16>
    %13 = vector.shape_cast %12 : vector<1x8x128xbf16> to vector<8x128xbf16>
    %14 = vector.shape_cast %11 : vector<8x128xbf16> to vector<1x8x128xbf16>
    tpu.vector_store %arg5[%c0_9, %c0_10, %c0_11], %14 {strides = array<i32>} : memref<1x8x128xbf16, #tpu.memory_space<vmem>>, vector<1x8x128xbf16>,
    return
  }
  func.func @transform_0(%arg0: i32) -> (i32, i32, i32) {
    %c0_i32 = arith.constant 0 : i32
    %c0_i32_0 = arith.constant 0 : i32
    %c0_i32_1 = arith.constant 0 : i32
    return %arg0, %c0_i32, %c0_i32_0 : i32, i32, i32
  }
  func.func @transform_1(%arg0: i32) -> (i32, i32, i32) {
    %c0_i32 = arith.constant 0 : i32
    %c0_i32_0 = arith.constant 0 : i32
    %c0_i32_1 = arith.constant 0 : i32
    %c0_i32_2 = arith.constant 0 : i32
    return %c0_i32, %c0_i32_0, %c0_i32_1 : i32, i32, i32
  }
  func.func @transform_2(%arg0: i32) -> (i32, i32) {
    %c0_i32 = arith.constant 0 : i32
    %c0_i32_0 = arith.constant 0 : i32
    %c0_i32_1 = arith.constant 0 : i32
    return %c0_i32, %c0_i32_0 : i32, i32
  }
  func.func @transform_3(%arg0: i32) -> (i32, i32) {
    %c0_i32 = arith.constant 0 : i32
    %c0_i32_0 = arith.constant 0 : i32
    %c0_i32_1 = arith.constant 0 : i32
    return %c0_i32, %c0_i32_0 : i32, i32
  }
  func.func @transform_4(%arg0: i32) -> (i32, i32, i32) {
    %c0_i32 = arith.constant 0 : i32
    %c0_i32_0 = arith.constant 0 : i32
    %c0_i32_1 = arith.constant 0 : i32
    return %arg0, %c0_i32, %c0_i32_0 : i32, i32, i32
  }
}

module attributes {stable_mosaic.version = 11 : i64} {
  func.func @_conv_bn_act_kernel(%arg0: i32, %arg1: memref<1x8x256xbf16, #tpu.memory_space<vmem>>, %arg2: memref<1x8x256xbf16, #tpu.memory_space<vmem>>, %arg3: memref<1x8x256xbf16, #tpu.memory_space<vmem>>, %arg4: memref<3x256x128xbf16, #tpu.memory_space<vmem>>, %arg5: memref<1x128xf32, #tpu.memory_space<vmem>>, %arg6: memref<1x128xf32, #tpu.memory_space<vmem>>, %arg7: memref<1x8x128xbf16, #tpu.memory_space<vmem>>) attributes {dimension_semantics = [#tpu.dimension_semantics<parallel>], iteration_bounds = array<i64: 2>, scalar_prefetch = 0 : i64, scratch_operands = 0 : i64, tpu.core_type = #tpu.core_type<tc>, window_params = [{transform_indices = @transform_0, window_bounds = array<i64: 1, 8, 256>}, {transform_indices = @transform_1, window_bounds = array<i64: 1, 8, 256>}, {transform_indices = @transform_2, window_bounds = array<i64: 1, 8, 256>}, {pipeline_mode = #tpu.pipeline_mode<synchronous>, transform_indices = @transform_3, window_bounds = array<i64: 3, 256, 128>}, {pipeline_mode = #tpu.pipeline_mode<synchronous>, transform_indices = @transform_4, window_bounds = array<i64: 1, 128>}, {pipeline_mode = #tpu.pipeline_mode<synchronous>, transform_indices = @transform_5, window_bounds = array<i64: 1, 128>}, {transform_indices = @transform_6, window_bounds = array<i64: 1, 8, 128>}]} {
    %c0 = arith.constant 0 : index
    %c0_0 = arith.constant 0 : index
    %c0_1 = arith.constant 0 : index
    %0 = vector.load %arg1[%c0, %c0_0, %c0_1] : memref<1x8x256xbf16, #tpu.memory_space<vmem>>, vector<1x8x256xbf16>
    %1 = vector.shape_cast %0 : vector<1x8x256xbf16> to vector<8x256xbf16>
    %c0_2 = arith.constant 0 : index
    %c0_3 = arith.constant 0 : index
    %c0_4 = arith.constant 0 : index
    %2 = vector.load %arg4[%c0_2, %c0_3, %c0_4] : memref<3x256x128xbf16, #tpu.memory_space<vmem>>, vector<1x256x128xbf16>
    %3 = vector.shape_cast %2 : vector<1x256x128xbf16> to vector<256x128xbf16>
    %cst = arith.constant dense<0.000000e+00> : vector<8x128xf32>
    %4 = tpu.matmul %1, %3, %cst {dimension_numbers = #tpu.dot_dimension_numbers<[1], [0], [0], [1], [0, 0, 1, 1], [], []>} : vector<8x256xbf16>, vector<256x128xbf16>, vector<8x128xf32> -> vector<8x128xf32>
    %c0_5 = arith.constant 0 : index
    %c0_6 = arith.constant 0 : index
    %c0_7 = arith.constant 0 : index
    %5 = vector.load %arg2[%c0_5, %c0_6, %c0_7] : memref<1x8x256xbf16, #tpu.memory_space<vmem>>, vector<1x8x256xbf16>
    %6 = vector.shape_cast %5 : vector<1x8x256xbf16> to vector<8x256xbf16>
    %c1 = arith.constant 1 : index
    %c0_8 = arith.constant 0 : index
    %c0_9 = arith.constant 0 : index
    %7 = vector.load %arg4[%c1, %c0_8, %c0_9] : memref<3x256x128xbf16, #tpu.memory_space<vmem>>, vector<1x256x128xbf16>
    %8 = vector.shape_cast %7 : vector<1x256x128xbf16> to vector<256x128xbf16>
    %cst_10 = arith.constant dense<0.000000e+00> : vector<8x128xf32>
    %9 = tpu.matmul %6, %8, %cst_10 {dimension_numbers = #tpu.dot_dimension_numbers<[1], [0], [0], [1], [0, 0, 1, 1], [], []>} : vector<8x256xbf16>, vector<256x128xbf16>, vector<8x128xf32> -> vector<8x128xf32>
    %10 = arith.addf %4, %9 : vector<8x128xf32>
    %c0_11 = arith.constant 0 : index
    %c0_12 = arith.constant 0 : index
    %c0_13 = arith.constant 0 : index
    %11 = vector.load %arg3[%c0_11, %c0_12, %c0_13] : memref<1x8x256xbf16, #tpu.memory_space<vmem>>, vector<1x8x256xbf16>
    %12 = vector.shape_cast %11 : vector<1x8x256xbf16> to vector<8x256xbf16>
    %c2 = arith.constant 2 : index
    %c0_14 = arith.constant 0 : index
    %c0_15 = arith.constant 0 : index
    %13 = vector.load %arg4[%c2, %c0_14, %c0_15] : memref<3x256x128xbf16, #tpu.memory_space<vmem>>, vector<1x256x128xbf16>
    %14 = vector.shape_cast %13 : vector<1x256x128xbf16> to vector<256x128xbf16>
    %cst_16 = arith.constant dense<0.000000e+00> : vector<8x128xf32>
    %15 = tpu.matmul %12, %14, %cst_16 {dimension_numbers = #tpu.dot_dimension_numbers<[1], [0], [0], [1], [0, 0, 1, 1], [], []>} : vector<8x256xbf16>, vector<256x128xbf16>, vector<8x128xf32> -> vector<8x128xf32>
    %16 = arith.addf %10, %15 : vector<8x128xf32>
    %c0_17 = arith.constant 0 : index
    %c0_18 = arith.constant 0 : index
    %17 = vector.load %arg5[%c0_17, %c0_18] : memref<1x128xf32, #tpu.memory_space<vmem>>, vector<1x128xf32>
    %18 = vector.broadcast %17 : vector<1x128xf32> to vector<8x128xf32>
    %19 = arith.mulf %16, %18 : vector<8x128xf32>
    %c0_19 = arith.constant 0 : index
    %c0_20 = arith.constant 0 : index
    %20 = vector.load %arg6[%c0_19, %c0_20] : memref<1x128xf32, #tpu.memory_space<vmem>>, vector<1x128xf32>
    %21 = vector.broadcast %20 : vector<1x128xf32> to vector<8x128xf32>
    %22 = arith.addf %19, %21 : vector<8x128xf32>
    %cst_21 = arith.constant 0.000000e+00 : f32
    %23 = vector.broadcast %cst_21 : f32 to vector<8x128xf32>
    %24 = arith.maximumf %22, %23 : vector<8x128xf32>
    %25 = arith.truncf %24 : vector<8x128xf32> to vector<8x128xbf16>
    %c0_22 = arith.constant 0 : index
    %c0_23 = arith.constant 0 : index
    %c0_24 = arith.constant 0 : index
    %26 = vector.load %arg7[%c0_22, %c0_23, %c0_24] : memref<1x8x128xbf16, #tpu.memory_space<vmem>>, vector<1x8x128xbf16>
    %27 = vector.shape_cast %26 : vector<1x8x128xbf16> to vector<8x128xbf16>
    %28 = vector.shape_cast %25 : vector<8x128xbf16> to vector<1x8x128xbf16>
    tpu.vector_store %arg7[%c0_22, %c0_23, %c0_24], %28 {strides = array<i32>} : memref<1x8x128xbf16, #tpu.memory_space<vmem>>, vector<1x8x128xbf16>,
    return
  }
  func.func @transform_0(%arg0: i32) -> (i32, i32, i32) {
    %c0_i32 = arith.constant 0 : i32
    %c0_i32_0 = arith.constant 0 : i32
    %c0_i32_1 = arith.constant 0 : i32
    return %arg0, %c0_i32, %c0_i32_0 : i32, i32, i32
  }
  func.func @transform_1(%arg0: i32) -> (i32, i32, i32) {
    %c0_i32 = arith.constant 0 : i32
    %c0_i32_0 = arith.constant 0 : i32
    %c0_i32_1 = arith.constant 0 : i32
    return %arg0, %c0_i32, %c0_i32_0 : i32, i32, i32
  }
  func.func @transform_2(%arg0: i32) -> (i32, i32, i32) {
    %c0_i32 = arith.constant 0 : i32
    %c0_i32_0 = arith.constant 0 : i32
    %c0_i32_1 = arith.constant 0 : i32
    return %arg0, %c0_i32, %c0_i32_0 : i32, i32, i32
  }
  func.func @transform_3(%arg0: i32) -> (i32, i32, i32) {
    %c0_i32 = arith.constant 0 : i32
    %c0_i32_0 = arith.constant 0 : i32
    %c0_i32_1 = arith.constant 0 : i32
    %c0_i32_2 = arith.constant 0 : i32
    return %c0_i32, %c0_i32_0, %c0_i32_1 : i32, i32, i32
  }
  func.func @transform_4(%arg0: i32) -> (i32, i32) {
    %c0_i32 = arith.constant 0 : i32
    %c0_i32_0 = arith.constant 0 : i32
    %c0_i32_1 = arith.constant 0 : i32
    return %c0_i32, %c0_i32_0 : i32, i32
  }
  func.func @transform_5(%arg0: i32) -> (i32, i32) {
    %c0_i32 = arith.constant 0 : i32
    %c0_i32_0 = arith.constant 0 : i32
    %c0_i32_1 = arith.constant 0 : i32
    return %c0_i32, %c0_i32_0 : i32, i32
  }
  func.func @transform_6(%arg0: i32) -> (i32, i32, i32) {
    %c0_i32 = arith.constant 0 : i32
    %c0_i32_0 = arith.constant 0 : i32
    %c0_i32_1 = arith.constant 0 : i32
    return %arg0, %c0_i32, %c0_i32_0 : i32, i32, i32
  }
}

module attributes {stable_mosaic.version = 11 : i64} {
  func.func @_conv_bn_act_kernel(%arg0: i32, %arg1: memref<1x10x128xbf16, #tpu.memory_space<vmem>>, %arg2: memref<3x128x128xbf16, #tpu.memory_space<vmem>>, %arg3: memref<1x128xf32, #tpu.memory_space<vmem>>, %arg4: memref<1x128xf32, #tpu.memory_space<vmem>>, %arg5: memref<1x8x128xbf16, #tpu.memory_space<vmem>>, %arg6: memref<1x8x128xbf16, #tpu.memory_space<vmem>>) attributes {dimension_semantics = [#tpu.dimension_semantics<parallel>], iteration_bounds = array<i64: 2>, scalar_prefetch = 0 : i64, scratch_operands = 0 : i64, tpu.core_type = #tpu.core_type<tc>, window_params = [{transform_indices = @transform_0, window_bounds = array<i64: 1, 10, 128>}, {pipeline_mode = #tpu.pipeline_mode<synchronous>, transform_indices = @transform_1, window_bounds = array<i64: 3, 128, 128>}, {pipeline_mode = #tpu.pipeline_mode<synchronous>, transform_indices = @transform_2, window_bounds = array<i64: 1, 128>}, {pipeline_mode = #tpu.pipeline_mode<synchronous>, transform_indices = @transform_3, window_bounds = array<i64: 1, 128>}, {transform_indices = @transform_4, window_bounds = array<i64: 1, 8, 128>}, {transform_indices = @transform_5, window_bounds = array<i64: 1, 8, 128>}]} {
    %c0 = arith.constant 0 : index
    %c0_0 = arith.constant 0 : index
    %c0_1 = arith.constant 0 : index
    %0 = vector.load %arg1[%c0, %c0_0, %c0_1] : memref<1x10x128xbf16, #tpu.memory_space<vmem>>, vector<1x8x128xbf16>
    %1 = vector.shape_cast %0 : vector<1x8x128xbf16> to vector<8x128xbf16>
    %c0_2 = arith.constant 0 : index
    %c0_3 = arith.constant 0 : index
    %c0_4 = arith.constant 0 : index
    %2 = vector.load %arg2[%c0_2, %c0_3, %c0_4] : memref<3x128x128xbf16, #tpu.memory_space<vmem>>, vector<1x128x128xbf16>
    %3 = vector.shape_cast %2 : vector<1x128x128xbf16> to vector<128x128xbf16>
    %cst = arith.constant dense<0.000000e+00> : vector<8x128xf32>
    %4 = tpu.matmul %1, %3, %cst {dimension_numbers = #tpu.dot_dimension_numbers<[1], [0], [0], [1], [0, 0, 1, 1], [], []>} : vector<8x128xbf16>, vector<128x128xbf16>, vector<8x128xf32> -> vector<8x128xf32>
    %c0_5 = arith.constant 0 : index
    %c1 = arith.constant 1 : index
    %c0_6 = arith.constant 0 : index
    %5 = vector.load %arg1[%c0_5, %c1, %c0_6] : memref<1x10x128xbf16, #tpu.memory_space<vmem>>, vector<1x8x128xbf16>
    %6 = vector.shape_cast %5 : vector<1x8x128xbf16> to vector<8x128xbf16>
    %c1_7 = arith.constant 1 : index
    %c0_8 = arith.constant 0 : index
    %c0_9 = arith.constant 0 : index
    %7 = vector.load %arg2[%c1_7, %c0_8, %c0_9] : memref<3x128x128xbf16, #tpu.memory_space<vmem>>, vector<1x128x128xbf16>
    %8 = vector.shape_cast %7 : vector<1x128x128xbf16> to vector<128x128xbf16>
    %cst_10 = arith.constant dense<0.000000e+00> : vector<8x128xf32>
    %9 = tpu.matmul %6, %8, %cst_10 {dimension_numbers = #tpu.dot_dimension_numbers<[1], [0], [0], [1], [0, 0, 1, 1], [], []>} : vector<8x128xbf16>, vector<128x128xbf16>, vector<8x128xf32> -> vector<8x128xf32>
    %10 = arith.addf %4, %9 : vector<8x128xf32>
    %c0_11 = arith.constant 0 : index
    %c2 = arith.constant 2 : index
    %c0_12 = arith.constant 0 : index
    %11 = vector.load %arg1[%c0_11, %c2, %c0_12] : memref<1x10x128xbf16, #tpu.memory_space<vmem>>, vector<1x8x128xbf16>
    %12 = vector.shape_cast %11 : vector<1x8x128xbf16> to vector<8x128xbf16>
    %c2_13 = arith.constant 2 : index
    %c0_14 = arith.constant 0 : index
    %c0_15 = arith.constant 0 : index
    %13 = vector.load %arg2[%c2_13, %c0_14, %c0_15] : memref<3x128x128xbf16, #tpu.memory_space<vmem>>, vector<1x128x128xbf16>
    %14 = vector.shape_cast %13 : vector<1x128x128xbf16> to vector<128x128xbf16>
    %cst_16 = arith.constant dense<0.000000e+00> : vector<8x128xf32>
    %15 = tpu.matmul %12, %14, %cst_16 {dimension_numbers = #tpu.dot_dimension_numbers<[1], [0], [0], [1], [0, 0, 1, 1], [], []>} : vector<8x128xbf16>, vector<128x128xbf16>, vector<8x128xf32> -> vector<8x128xf32>
    %16 = arith.addf %10, %15 : vector<8x128xf32>
    %c0_17 = arith.constant 0 : index
    %c0_18 = arith.constant 0 : index
    %17 = vector.load %arg3[%c0_17, %c0_18] : memref<1x128xf32, #tpu.memory_space<vmem>>, vector<1x128xf32>
    %18 = vector.broadcast %17 : vector<1x128xf32> to vector<8x128xf32>
    %19 = arith.mulf %16, %18 : vector<8x128xf32>
    %c0_19 = arith.constant 0 : index
    %c0_20 = arith.constant 0 : index
    %20 = vector.load %arg4[%c0_19, %c0_20] : memref<1x128xf32, #tpu.memory_space<vmem>>, vector<1x128xf32>
    %21 = vector.broadcast %20 : vector<1x128xf32> to vector<8x128xf32>
    %22 = arith.addf %19, %21 : vector<8x128xf32>
    %cst_21 = arith.constant 0.000000e+00 : f32
    %23 = vector.broadcast %cst_21 : f32 to vector<8x128xf32>
    %24 = arith.maximumf %22, %23 : vector<8x128xf32>
    %c0_22 = arith.constant 0 : index
    %c0_23 = arith.constant 0 : index
    %c0_24 = arith.constant 0 : index
    %25 = vector.load %arg5[%c0_22, %c0_23, %c0_24] : memref<1x8x128xbf16, #tpu.memory_space<vmem>>, vector<1x8x128xbf16>
    %26 = vector.shape_cast %25 : vector<1x8x128xbf16> to vector<8x128xbf16>
    %27 = arith.extf %26 : vector<8x128xbf16> to vector<8x128xf32>
    %28 = arith.addf %24, %27 : vector<8x128xf32>
    %cst_25 = arith.constant 0.000000e+00 : f32
    %29 = vector.broadcast %cst_25 : f32 to vector<8x128xf32>
    %30 = arith.maximumf %28, %29 : vector<8x128xf32>
    %31 = arith.truncf %30 : vector<8x128xf32> to vector<8x128xbf16>
    %c0_26 = arith.constant 0 : index
    %c0_27 = arith.constant 0 : index
    %c0_28 = arith.constant 0 : index
    %32 = vector.load %arg6[%c0_26, %c0_27, %c0_28] : memref<1x8x128xbf16, #tpu.memory_space<vmem>>, vector<1x8x128xbf16>
    %33 = vector.shape_cast %32 : vector<1x8x128xbf16> to vector<8x128xbf16>
    %34 = vector.shape_cast %31 : vector<8x128xbf16> to vector<1x8x128xbf16>
    tpu.vector_store %arg6[%c0_26, %c0_27, %c0_28], %34 {strides = array<i32>} : memref<1x8x128xbf16, #tpu.memory_space<vmem>>, vector<1x8x128xbf16>,
    return
  }
  func.func @transform_0(%arg0: i32) -> (i32, i32, i32) {
    %c0_i32 = arith.constant 0 : i32
    %c0_i32_0 = arith.constant 0 : i32
    %c0_i32_1 = arith.constant 0 : i32
    return %arg0, %c0_i32, %c0_i32_0 : i32, i32, i32
  }
  func.func @transform_1(%arg0: i32) -> (i32, i32, i32) {
    %c0_i32 = arith.constant 0 : i32
    %c0_i32_0 = arith.constant 0 : i32
    %c0_i32_1 = arith.constant 0 : i32
    %c0_i32_2 = arith.constant 0 : i32
    return %c0_i32, %c0_i32_0, %c0_i32_1 : i32, i32, i32
  }
  func.func @transform_2(%arg0: i32) -> (i32, i32) {
    %c0_i32 = arith.constant 0 : i32
    %c0_i32_0 = arith.constant 0 : i32
    %c0_i32_1 = arith.constant 0 : i32
    return %c0_i32, %c0_i32_0 : i32, i32
  }
  func.func @transform_3(%arg0: i32) -> (i32, i32) {
    %c0_i32 = arith.constant 0 : i32
    %c0_i32_0 = arith.constant 0 : i32
    %c0_i32_1 = arith.constant 0 : i32
    return %c0_i32, %c0_i32_0 : i32, i32
  }
  func.func @transform_4(%arg0: i32) -> (i32, i32, i32) {
    %c0_i32 = arith.constant 0 : i32
    %c0_i32_0 = arith.constant 0 : i32
    %c0_i32_1 = arith.constant 0 : i32
    return %arg0, %c0_i32, %c0_i32_0 : i32, i32, i32
  }
  func.func @transform_5(%arg0: i32) -> (i32, i32, i32) {
    %c0_i32 = arith.constant 0 : i32
    %c0_i32_0 = arith.constant 0 : i32
    %c0_i32_1 = arith.constant 0 : i32
    return %arg0, %c0_i32, %c0_i32_0 : i32, i32, i32
  }
}

module attributes {stable_mosaic.version = 11 : i64} {
  func.func @_conv_bn_act_kernel(%arg0: i32, %arg1: memref<1x10x128xbf16, #tpu.memory_space<vmem>>, %arg2: memref<3x128x128xbf16, #tpu.memory_space<vmem>>, %arg3: memref<1x128xf32, #tpu.memory_space<vmem>>, %arg4: memref<1x128xf32, #tpu.memory_space<vmem>>, %arg5: memref<1x8x128xbf16, #tpu.memory_space<vmem>>) attributes {dimension_semantics = [#tpu.dimension_semantics<parallel>], iteration_bounds = array<i64: 2>, scalar_prefetch = 0 : i64, scratch_operands = 0 : i64, tpu.core_type = #tpu.core_type<tc>, window_params = [{transform_indices = @transform_0, window_bounds = array<i64: 1, 10, 128>}, {pipeline_mode = #tpu.pipeline_mode<synchronous>, transform_indices = @transform_1, window_bounds = array<i64: 3, 128, 128>}, {pipeline_mode = #tpu.pipeline_mode<synchronous>, transform_indices = @transform_2, window_bounds = array<i64: 1, 128>}, {pipeline_mode = #tpu.pipeline_mode<synchronous>, transform_indices = @transform_3, window_bounds = array<i64: 1, 128>}, {transform_indices = @transform_4, window_bounds = array<i64: 1, 8, 128>}]} {
    %c0 = arith.constant 0 : index
    %c0_0 = arith.constant 0 : index
    %c0_1 = arith.constant 0 : index
    %0 = vector.load %arg1[%c0, %c0_0, %c0_1] : memref<1x10x128xbf16, #tpu.memory_space<vmem>>, vector<1x8x128xbf16>
    %1 = vector.shape_cast %0 : vector<1x8x128xbf16> to vector<8x128xbf16>
    %c0_2 = arith.constant 0 : index
    %c0_3 = arith.constant 0 : index
    %c0_4 = arith.constant 0 : index
    %2 = vector.load %arg2[%c0_2, %c0_3, %c0_4] : memref<3x128x128xbf16, #tpu.memory_space<vmem>>, vector<1x128x128xbf16>
    %3 = vector.shape_cast %2 : vector<1x128x128xbf16> to vector<128x128xbf16>
    %cst = arith.constant dense<0.000000e+00> : vector<8x128xf32>
    %4 = tpu.matmul %1, %3, %cst {dimension_numbers = #tpu.dot_dimension_numbers<[1], [0], [0], [1], [0, 0, 1, 1], [], []>} : vector<8x128xbf16>, vector<128x128xbf16>, vector<8x128xf32> -> vector<8x128xf32>
    %c0_5 = arith.constant 0 : index
    %c1 = arith.constant 1 : index
    %c0_6 = arith.constant 0 : index
    %5 = vector.load %arg1[%c0_5, %c1, %c0_6] : memref<1x10x128xbf16, #tpu.memory_space<vmem>>, vector<1x8x128xbf16>
    %6 = vector.shape_cast %5 : vector<1x8x128xbf16> to vector<8x128xbf16>
    %c1_7 = arith.constant 1 : index
    %c0_8 = arith.constant 0 : index
    %c0_9 = arith.constant 0 : index
    %7 = vector.load %arg2[%c1_7, %c0_8, %c0_9] : memref<3x128x128xbf16, #tpu.memory_space<vmem>>, vector<1x128x128xbf16>
    %8 = vector.shape_cast %7 : vector<1x128x128xbf16> to vector<128x128xbf16>
    %cst_10 = arith.constant dense<0.000000e+00> : vector<8x128xf32>
    %9 = tpu.matmul %6, %8, %cst_10 {dimension_numbers = #tpu.dot_dimension_numbers<[1], [0], [0], [1], [0, 0, 1, 1], [], []>} : vector<8x128xbf16>, vector<128x128xbf16>, vector<8x128xf32> -> vector<8x128xf32>
    %10 = arith.addf %4, %9 : vector<8x128xf32>
    %c0_11 = arith.constant 0 : index
    %c2 = arith.constant 2 : index
    %c0_12 = arith.constant 0 : index
    %11 = vector.load %arg1[%c0_11, %c2, %c0_12] : memref<1x10x128xbf16, #tpu.memory_space<vmem>>, vector<1x8x128xbf16>
    %12 = vector.shape_cast %11 : vector<1x8x128xbf16> to vector<8x128xbf16>
    %c2_13 = arith.constant 2 : index
    %c0_14 = arith.constant 0 : index
    %c0_15 = arith.constant 0 : index
    %13 = vector.load %arg2[%c2_13, %c0_14, %c0_15] : memref<3x128x128xbf16, #tpu.memory_space<vmem>>, vector<1x128x128xbf16>
    %14 = vector.shape_cast %13 : vector<1x128x128xbf16> to vector<128x128xbf16>
    %cst_16 = arith.constant dense<0.000000e+00> : vector<8x128xf32>
    %15 = tpu.matmul %12, %14, %cst_16 {dimension_numbers = #tpu.dot_dimension_numbers<[1], [0], [0], [1], [0, 0, 1, 1], [], []>} : vector<8x128xbf16>, vector<128x128xbf16>, vector<8x128xf32> -> vector<8x128xf32>
    %16 = arith.addf %10, %15 : vector<8x128xf32>
    %c0_17 = arith.constant 0 : index
    %c0_18 = arith.constant 0 : index
    %17 = vector.load %arg3[%c0_17, %c0_18] : memref<1x128xf32, #tpu.memory_space<vmem>>, vector<1x128xf32>
    %18 = vector.broadcast %17 : vector<1x128xf32> to vector<8x128xf32>
    %19 = arith.mulf %16, %18 : vector<8x128xf32>
    %c0_19 = arith.constant 0 : index
    %c0_20 = arith.constant 0 : index
    %20 = vector.load %arg4[%c0_19, %c0_20] : memref<1x128xf32, #tpu.memory_space<vmem>>, vector<1x128xf32>
    %21 = vector.broadcast %20 : vector<1x128xf32> to vector<8x128xf32>
    %22 = arith.addf %19, %21 : vector<8x128xf32>
    %cst_21 = arith.constant 0.000000e+00 : f32
    %23 = vector.broadcast %cst_21 : f32 to vector<8x128xf32>
    %24 = arith.maximumf %22, %23 : vector<8x128xf32>
    %25 = arith.truncf %24 : vector<8x128xf32> to vector<8x128xbf16>
    %c0_22 = arith.constant 0 : index
    %c0_23 = arith.constant 0 : index
    %c0_24 = arith.constant 0 : index
    %26 = vector.load %arg5[%c0_22, %c0_23, %c0_24] : memref<1x8x128xbf16, #tpu.memory_space<vmem>>, vector<1x8x128xbf16>
    %27 = vector.shape_cast %26 : vector<1x8x128xbf16> to vector<8x128xbf16>
    %28 = vector.shape_cast %25 : vector<8x128xbf16> to vector<1x8x128xbf16>
    tpu.vector_store %arg5[%c0_22, %c0_23, %c0_24], %28 {strides = array<i32>} : memref<1x8x128xbf16, #tpu.memory_space<vmem>>, vector<1x8x128xbf16>,
    return
  }
  func.func @transform_0(%arg0: i32) -> (i32, i32, i32) {
    %c0_i32 = arith.constant 0 : i32
    %c0_i32_0 = arith.constant 0 : i32
    %c0_i32_1 = arith.constant 0 : i32
    return %arg0, %c0_i32, %c0_i32_0 : i32, i32, i32
  }
  func.func @transform_1(%arg0: i32) -> (i32, i32, i32) {
    %c0_i32 = arith.constant 0 : i32
    %c0_i32_0 = arith.constant 0 : i32
    %c0_i32_1 = arith.constant 0 : i32
    %c0_i32_2 = arith.constant 0 : i32
    return %c0_i32, %c0_i32_0, %c0_i32_1 : i32, i32, i32
  }
  func.func @transform_2(%arg0: i32) -> (i32, i32) {
    %c0_i32 = arith.constant 0 : i32
    %c0_i32_0 = arith.constant 0 : i32
    %c0_i32_1 = arith.constant 0 : i32
    return %c0_i32, %c0_i32_0 : i32, i32
  }
  func.func @transform_3(%arg0: i32) -> (i32, i32) {
    %c0_i32 = arith.constant 0 : i32
    %c0_i32_0 = arith.constant 0 : i32
    %c0_i32_1 = arith.constant 0 : i32
    return %c0_i32, %c0_i32_0 : i32, i32
  }
  func.func @transform_4(%arg0: i32) -> (i32, i32, i32) {
    %c0_i32 = arith.constant 0 : i32
    %c0_i32_0 = arith.constant 0 : i32
    %c0_i32_1 = arith.constant 0 : i32
    return %arg0, %c0_i32, %c0_i32_0 : i32, i32, i32
  }
}

module attributes {stable_mosaic.version = 11 : i64} {
  func.func @_conv_bn_act_kernel(%arg0: i32, %arg1: memref<1x4x128xbf16, #tpu.memory_space<vmem>>, %arg2: memref<1x128x64xbf16, #tpu.memory_space<vmem>>, %arg3: memref<1x64xf32, #tpu.memory_space<vmem>>, %arg4: memref<1x64xf32, #tpu.memory_space<vmem>>, %arg5: memref<1x4x64xbf16, #tpu.memory_space<vmem>>) attributes {dimension_semantics = [#tpu.dimension_semantics<parallel>], iteration_bounds = array<i64: 2>, scalar_prefetch = 0 : i64, scratch_operands = 0 : i64, tpu.core_type = #tpu.core_type<tc>, window_params = [{transform_indices = @transform_0, window_bounds = array<i64: 1, 4, 128>}, {pipeline_mode = #tpu.pipeline_mode<synchronous>, transform_indices = @transform_1, window_bounds = array<i64: 1, 128, 64>}, {pipeline_mode = #tpu.pipeline_mode<synchronous>, transform_indices = @transform_2, window_bounds = array<i64: 1, 64>}, {pipeline_mode = #tpu.pipeline_mode<synchronous>, transform_indices = @transform_3, window_bounds = array<i64: 1, 64>}, {transform_indices = @transform_4, window_bounds = array<i64: 1, 4, 64>}]} {
    %c0 = arith.constant 0 : index
    %c0_0 = arith.constant 0 : index
    %c0_1 = arith.constant 0 : index
    %0 = vector.load %arg1[%c0, %c0_0, %c0_1] : memref<1x4x128xbf16, #tpu.memory_space<vmem>>, vector<1x4x128xbf16>
    %1 = vector.shape_cast %0 : vector<1x4x128xbf16> to vector<4x128xbf16>
    %c0_2 = arith.constant 0 : index
    %c0_3 = arith.constant 0 : index
    %c0_4 = arith.constant 0 : index
    %2 = vector.load %arg2[%c0_2, %c0_3, %c0_4] : memref<1x128x64xbf16, #tpu.memory_space<vmem>>, vector<1x128x64xbf16>
    %3 = vector.shape_cast %2 : vector<1x128x64xbf16> to vector<128x64xbf16>
    %cst = arith.constant dense<0.000000e+00> : vector<4x64xf32>
    %4 = tpu.matmul %1, %3, %cst {dimension_numbers = #tpu.dot_dimension_numbers<[1], [0], [0], [1], [0, 0, 1, 1], [], []>} : vector<4x128xbf16>, vector<128x64xbf16>, vector<4x64xf32> -> vector<4x64xf32>
    %c0_5 = arith.constant 0 : index
    %c0_6 = arith.constant 0 : index
    %5 = vector.load %arg3[%c0_5, %c0_6] : memref<1x64xf32, #tpu.memory_space<vmem>>, vector<1x64xf32>
    %6 = vector.broadcast %5 : vector<1x64xf32> to vector<4x64xf32>
    %7 = arith.mulf %4, %6 : vector<4x64xf32>
    %c0_7 = arith.constant 0 : index
    %c0_8 = arith.constant 0 : index
    %8 = vector.load %arg4[%c0_7, %c0_8] : memref<1x64xf32, #tpu.memory_space<vmem>>, vector<1x64xf32>
    %9 = vector.broadcast %8 : vector<1x64xf32> to vector<4x64xf32>
    %10 = arith.addf %7, %9 : vector<4x64xf32>
    %11 = arith.truncf %10 : vector<4x64xf32> to vector<4x64xbf16>
    %c0_9 = arith.constant 0 : index
    %c0_10 = arith.constant 0 : index
    %c0_11 = arith.constant 0 : index
    %12 = vector.load %arg5[%c0_9, %c0_10, %c0_11] : memref<1x4x64xbf16, #tpu.memory_space<vmem>>, vector<1x4x64xbf16>
    %13 = vector.shape_cast %12 : vector<1x4x64xbf16> to vector<4x64xbf16>
    %14 = vector.shape_cast %11 : vector<4x64xbf16> to vector<1x4x64xbf16>
    tpu.vector_store %arg5[%c0_9, %c0_10, %c0_11], %14 {strides = array<i32>} : memref<1x4x64xbf16, #tpu.memory_space<vmem>>, vector<1x4x64xbf16>,
    return
  }
  func.func @transform_0(%arg0: i32) -> (i32, i32, i32) {
    %c0_i32 = arith.constant 0 : i32
    %c0_i32_0 = arith.constant 0 : i32
    %c0_i32_1 = arith.constant 0 : i32
    return %arg0, %c0_i32, %c0_i32_0 : i32, i32, i32
  }
  func.func @transform_1(%arg0: i32) -> (i32, i32, i32) {
    %c0_i32 = arith.constant 0 : i32
    %c0_i32_0 = arith.constant 0 : i32
    %c0_i32_1 = arith.constant 0 : i32
    %c0_i32_2 = arith.constant 0 : i32
    return %c0_i32, %c0_i32_0, %c0_i32_1 : i32, i32, i32
  }
  func.func @transform_2(%arg0: i32) -> (i32, i32) {
    %c0_i32 = arith.constant 0 : i32
    %c0_i32_0 = arith.constant 0 : i32
    %c0_i32_1 = arith.constant 0 : i32
    return %c0_i32, %c0_i32_0 : i32, i32
  }
  func.func @transform_3(%arg0: i32) -> (i32, i32) {
    %c0_i32 = arith.constant 0 : i32
    %c0_i32_0 = arith.constant 0 : i32
    %c0_i32_1 = arith.constant 0 : i32
    return %c0_i32, %c0_i32_0 : i32, i32
  }
  func.func @transform_4(%arg0: i32) -> (i32, i32, i32) {
    %c0_i32 = arith.constant 0 : i32
    %c0_i32_0 = arith.constant 0 : i32
    %c0_i32_1 = arith.constant 0 : i32
    return %arg0, %c0_i32, %c0_i32_0 : i32, i32, i32
  }
}

module attributes {stable_mosaic.version = 11 : i64} {
  func.func @_conv_bn_act_kernel(%arg0: i32, %arg1: memref<1x4x128xbf16, #tpu.memory_space<vmem>>, %arg2: memref<1x4x128xbf16, #tpu.memory_space<vmem>>, %arg3: memref<1x4x128xbf16, #tpu.memory_space<vmem>>, %arg4: memref<3x128x64xbf16, #tpu.memory_space<vmem>>, %arg5: memref<1x64xf32, #tpu.memory_space<vmem>>, %arg6: memref<1x64xf32, #tpu.memory_space<vmem>>, %arg7: memref<1x4x64xbf16, #tpu.memory_space<vmem>>) attributes {dimension_semantics = [#tpu.dimension_semantics<parallel>], iteration_bounds = array<i64: 2>, scalar_prefetch = 0 : i64, scratch_operands = 0 : i64, tpu.core_type = #tpu.core_type<tc>, window_params = [{transform_indices = @transform_0, window_bounds = array<i64: 1, 4, 128>}, {transform_indices = @transform_1, window_bounds = array<i64: 1, 4, 128>}, {transform_indices = @transform_2, window_bounds = array<i64: 1, 4, 128>}, {pipeline_mode = #tpu.pipeline_mode<synchronous>, transform_indices = @transform_3, window_bounds = array<i64: 3, 128, 64>}, {pipeline_mode = #tpu.pipeline_mode<synchronous>, transform_indices = @transform_4, window_bounds = array<i64: 1, 64>}, {pipeline_mode = #tpu.pipeline_mode<synchronous>, transform_indices = @transform_5, window_bounds = array<i64: 1, 64>}, {transform_indices = @transform_6, window_bounds = array<i64: 1, 4, 64>}]} {
    %c0 = arith.constant 0 : index
    %c0_0 = arith.constant 0 : index
    %c0_1 = arith.constant 0 : index
    %0 = vector.load %arg1[%c0, %c0_0, %c0_1] : memref<1x4x128xbf16, #tpu.memory_space<vmem>>, vector<1x4x128xbf16>
    %1 = vector.shape_cast %0 : vector<1x4x128xbf16> to vector<4x128xbf16>
    %c0_2 = arith.constant 0 : index
    %c0_3 = arith.constant 0 : index
    %c0_4 = arith.constant 0 : index
    %2 = vector.load %arg4[%c0_2, %c0_3, %c0_4] : memref<3x128x64xbf16, #tpu.memory_space<vmem>>, vector<1x128x64xbf16>
    %3 = vector.shape_cast %2 : vector<1x128x64xbf16> to vector<128x64xbf16>
    %cst = arith.constant dense<0.000000e+00> : vector<4x64xf32>
    %4 = tpu.matmul %1, %3, %cst {dimension_numbers = #tpu.dot_dimension_numbers<[1], [0], [0], [1], [0, 0, 1, 1], [], []>} : vector<4x128xbf16>, vector<128x64xbf16>, vector<4x64xf32> -> vector<4x64xf32>
    %c0_5 = arith.constant 0 : index
    %c0_6 = arith.constant 0 : index
    %c0_7 = arith.constant 0 : index
    %5 = vector.load %arg2[%c0_5, %c0_6, %c0_7] : memref<1x4x128xbf16, #tpu.memory_space<vmem>>, vector<1x4x128xbf16>
    %6 = vector.shape_cast %5 : vector<1x4x128xbf16> to vector<4x128xbf16>
    %c1 = arith.constant 1 : index
    %c0_8 = arith.constant 0 : index
    %c0_9 = arith.constant 0 : index
    %7 = vector.load %arg4[%c1, %c0_8, %c0_9] : memref<3x128x64xbf16, #tpu.memory_space<vmem>>, vector<1x128x64xbf16>
    %8 = vector.shape_cast %7 : vector<1x128x64xbf16> to vector<128x64xbf16>
    %cst_10 = arith.constant dense<0.000000e+00> : vector<4x64xf32>
    %9 = tpu.matmul %6, %8, %cst_10 {dimension_numbers = #tpu.dot_dimension_numbers<[1], [0], [0], [1], [0, 0, 1, 1], [], []>} : vector<4x128xbf16>, vector<128x64xbf16>, vector<4x64xf32> -> vector<4x64xf32>
    %10 = arith.addf %4, %9 : vector<4x64xf32>
    %c0_11 = arith.constant 0 : index
    %c0_12 = arith.constant 0 : index
    %c0_13 = arith.constant 0 : index
    %11 = vector.load %arg3[%c0_11, %c0_12, %c0_13] : memref<1x4x128xbf16, #tpu.memory_space<vmem>>, vector<1x4x128xbf16>
    %12 = vector.shape_cast %11 : vector<1x4x128xbf16> to vector<4x128xbf16>
    %c2 = arith.constant 2 : index
    %c0_14 = arith.constant 0 : index
    %c0_15 = arith.constant 0 : index
    %13 = vector.load %arg4[%c2, %c0_14, %c0_15] : memref<3x128x64xbf16, #tpu.memory_space<vmem>>, vector<1x128x64xbf16>
    %14 = vector.shape_cast %13 : vector<1x128x64xbf16> to vector<128x64xbf16>
    %cst_16 = arith.constant dense<0.000000e+00> : vector<4x64xf32>
    %15 = tpu.matmul %12, %14, %cst_16 {dimension_numbers = #tpu.dot_dimension_numbers<[1], [0], [0], [1], [0, 0, 1, 1], [], []>} : vector<4x128xbf16>, vector<128x64xbf16>, vector<4x64xf32> -> vector<4x64xf32>
    %16 = arith.addf %10, %15 : vector<4x64xf32>
    %c0_17 = arith.constant 0 : index
    %c0_18 = arith.constant 0 : index
    %17 = vector.load %arg5[%c0_17, %c0_18] : memref<1x64xf32, #tpu.memory_space<vmem>>, vector<1x64xf32>
    %18 = vector.broadcast %17 : vector<1x64xf32> to vector<4x64xf32>
    %19 = arith.mulf %16, %18 : vector<4x64xf32>
    %c0_19 = arith.constant 0 : index
    %c0_20 = arith.constant 0 : index
    %20 = vector.load %arg6[%c0_19, %c0_20] : memref<1x64xf32, #tpu.memory_space<vmem>>, vector<1x64xf32>
    %21 = vector.broadcast %20 : vector<1x64xf32> to vector<4x64xf32>
    %22 = arith.addf %19, %21 : vector<4x64xf32>
    %cst_21 = arith.constant 0.000000e+00 : f32
    %23 = vector.broadcast %cst_21 : f32 to vector<4x64xf32>
    %24 = arith.maximumf %22, %23 : vector<4x64xf32>
    %25 = arith.truncf %24 : vector<4x64xf32> to vector<4x64xbf16>
    %c0_22 = arith.constant 0 : index
    %c0_23 = arith.constant 0 : index
    %c0_24 = arith.constant 0 : index
    %26 = vector.load %arg7[%c0_22, %c0_23, %c0_24] : memref<1x4x64xbf16, #tpu.memory_space<vmem>>, vector<1x4x64xbf16>
    %27 = vector.shape_cast %26 : vector<1x4x64xbf16> to vector<4x64xbf16>
    %28 = vector.shape_cast %25 : vector<4x64xbf16> to vector<1x4x64xbf16>
    tpu.vector_store %arg7[%c0_22, %c0_23, %c0_24], %28 {strides = array<i32>} : memref<1x4x64xbf16, #tpu.memory_space<vmem>>, vector<1x4x64xbf16>,
    return
  }
  func.func @transform_0(%arg0: i32) -> (i32, i32, i32) {
    %c0_i32 = arith.constant 0 : i32
    %c0_i32_0 = arith.constant 0 : i32
    %c0_i32_1 = arith.constant 0 : i32
    return %arg0, %c0_i32, %c0_i32_0 : i32, i32, i32
  }
  func.func @transform_1(%arg0: i32) -> (i32, i32, i32) {
    %c0_i32 = arith.constant 0 : i32
    %c0_i32_0 = arith.constant 0 : i32
    %c0_i32_1 = arith.constant 0 : i32
    return %arg0, %c0_i32, %c0_i32_0 : i32, i32, i32
  }
  func.func @transform_2(%arg0: i32) -> (i32, i32, i32) {
    %c0_i32 = arith.constant 0 : i32
    %c0_i32_0 = arith.constant 0 : i32
    %c0_i32_1 = arith.constant 0 : i32
    return %arg0, %c0_i32, %c0_i32_0 : i32, i32, i32
  }
  func.func @transform_3(%arg0: i32) -> (i32, i32, i32) {
    %c0_i32 = arith.constant 0 : i32
    %c0_i32_0 = arith.constant 0 : i32
    %c0_i32_1 = arith.constant 0 : i32
    %c0_i32_2 = arith.constant 0 : i32
    return %c0_i32, %c0_i32_0, %c0_i32_1 : i32, i32, i32
  }
  func.func @transform_4(%arg0: i32) -> (i32, i32) {
    %c0_i32 = arith.constant 0 : i32
    %c0_i32_0 = arith.constant 0 : i32
    %c0_i32_1 = arith.constant 0 : i32
    return %c0_i32, %c0_i32_0 : i32, i32
  }
  func.func @transform_5(%arg0: i32) -> (i32, i32) {
    %c0_i32 = arith.constant 0 : i32
    %c0_i32_0 = arith.constant 0 : i32
    %c0_i32_1 = arith.constant 0 : i32
    return %c0_i32, %c0_i32_0 : i32, i32
  }
  func.func @transform_6(%arg0: i32) -> (i32, i32, i32) {
    %c0_i32 = arith.constant 0 : i32
    %c0_i32_0 = arith.constant 0 : i32
    %c0_i32_1 = arith.constant 0 : i32
    return %arg0, %c0_i32, %c0_i32_0 : i32, i32, i32
  }
}

module attributes {stable_mosaic.version = 11 : i64} {
  func.func @_conv_bn_act_kernel(%arg0: i32, %arg1: memref<1x6x64xbf16, #tpu.memory_space<vmem>>, %arg2: memref<3x64x64xbf16, #tpu.memory_space<vmem>>, %arg3: memref<1x64xf32, #tpu.memory_space<vmem>>, %arg4: memref<1x64xf32, #tpu.memory_space<vmem>>, %arg5: memref<1x4x64xbf16, #tpu.memory_space<vmem>>) attributes {dimension_semantics = [#tpu.dimension_semantics<parallel>], iteration_bounds = array<i64: 2>, scalar_prefetch = 0 : i64, scratch_operands = 0 : i64, tpu.core_type = #tpu.core_type<tc>, window_params = [{transform_indices = @transform_0, window_bounds = array<i64: 1, 6, 64>}, {pipeline_mode = #tpu.pipeline_mode<synchronous>, transform_indices = @transform_1, window_bounds = array<i64: 3, 64, 64>}, {pipeline_mode = #tpu.pipeline_mode<synchronous>, transform_indices = @transform_2, window_bounds = array<i64: 1, 64>}, {pipeline_mode = #tpu.pipeline_mode<synchronous>, transform_indices = @transform_3, window_bounds = array<i64: 1, 64>}, {transform_indices = @transform_4, window_bounds = array<i64: 1, 4, 64>}]} {
    %c0 = arith.constant 0 : index
    %c0_0 = arith.constant 0 : index
    %c0_1 = arith.constant 0 : index
    %0 = vector.load %arg1[%c0, %c0_0, %c0_1] : memref<1x6x64xbf16, #tpu.memory_space<vmem>>, vector<1x4x64xbf16>
    %1 = vector.shape_cast %0 : vector<1x4x64xbf16> to vector<4x64xbf16>
    %c0_2 = arith.constant 0 : index
    %c0_3 = arith.constant 0 : index
    %c0_4 = arith.constant 0 : index
    %2 = vector.load %arg2[%c0_2, %c0_3, %c0_4] : memref<3x64x64xbf16, #tpu.memory_space<vmem>>, vector<1x64x64xbf16>
    %3 = vector.shape_cast %2 : vector<1x64x64xbf16> to vector<64x64xbf16>
    %cst = arith.constant dense<0.000000e+00> : vector<4x64xf32>
    %4 = tpu.matmul %1, %3, %cst {dimension_numbers = #tpu.dot_dimension_numbers<[1], [0], [0], [1], [0, 0, 1, 1], [], []>} : vector<4x64xbf16>, vector<64x64xbf16>, vector<4x64xf32> -> vector<4x64xf32>
    %c0_5 = arith.constant 0 : index
    %c1 = arith.constant 1 : index
    %c0_6 = arith.constant 0 : index
    %5 = vector.load %arg1[%c0_5, %c1, %c0_6] : memref<1x6x64xbf16, #tpu.memory_space<vmem>>, vector<1x4x64xbf16>
    %6 = vector.shape_cast %5 : vector<1x4x64xbf16> to vector<4x64xbf16>
    %c1_7 = arith.constant 1 : index
    %c0_8 = arith.constant 0 : index
    %c0_9 = arith.constant 0 : index
    %7 = vector.load %arg2[%c1_7, %c0_8, %c0_9] : memref<3x64x64xbf16, #tpu.memory_space<vmem>>, vector<1x64x64xbf16>
    %8 = vector.shape_cast %7 : vector<1x64x64xbf16> to vector<64x64xbf16>
    %cst_10 = arith.constant dense<0.000000e+00> : vector<4x64xf32>
    %9 = tpu.matmul %6, %8, %cst_10 {dimension_numbers = #tpu.dot_dimension_numbers<[1], [0], [0], [1], [0, 0, 1, 1], [], []>} : vector<4x64xbf16>, vector<64x64xbf16>, vector<4x64xf32> -> vector<4x64xf32>
    %10 = arith.addf %4, %9 : vector<4x64xf32>
    %c0_11 = arith.constant 0 : index
    %c2 = arith.constant 2 : index
    %c0_12 = arith.constant 0 : index
    %11 = vector.load %arg1[%c0_11, %c2, %c0_12] : memref<1x6x64xbf16, #tpu.memory_space<vmem>>, vector<1x4x64xbf16>
    %12 = vector.shape_cast %11 : vector<1x4x64xbf16> to vector<4x64xbf16>
    %c2_13 = arith.constant 2 : index
    %c0_14 = arith.constant 0 : index
    %c0_15 = arith.constant 0 : index
    %13 = vector.load %arg2[%c2_13, %c0_14, %c0_15] : memref<3x64x64xbf16, #tpu.memory_space<vmem>>, vector<1x64x64xbf16>
    %14 = vector.shape_cast %13 : vector<1x64x64xbf16> to vector<64x64xbf16>
    %cst_16 = arith.constant dense<0.000000e+00> : vector<4x64xf32>
    %15 = tpu.matmul %12, %14, %cst_16 {dimension_numbers = #tpu.dot_dimension_numbers<[1], [0], [0], [1], [0, 0, 1, 1], [], []>} : vector<4x64xbf16>, vector<64x64xbf16>, vector<4x64xf32> -> vector<4x64xf32>
    %16 = arith.addf %10, %15 : vector<4x64xf32>
    %c0_17 = arith.constant 0 : index
    %c0_18 = arith.constant 0 : index
    %17 = vector.load %arg3[%c0_17, %c0_18] : memref<1x64xf32, #tpu.memory_space<vmem>>, vector<1x64xf32>
    %18 = vector.broadcast %17 : vector<1x64xf32> to vector<4x64xf32>
    %19 = arith.mulf %16, %18 : vector<4x64xf32>
    %c0_19 = arith.constant 0 : index
    %c0_20 = arith.constant 0 : index
    %20 = vector.load %arg4[%c0_19, %c0_20] : memref<1x64xf32, #tpu.memory_space<vmem>>, vector<1x64xf32>
    %21 = vector.broadcast %20 : vector<1x64xf32> to vector<4x64xf32>
    %22 = arith.addf %19, %21 : vector<4x64xf32>
    %cst_21 = arith.constant 0.000000e+00 : f32
    %23 = vector.broadcast %cst_21 : f32 to vector<4x64xf32>
    %24 = arith.maximumf %22, %23 : vector<4x64xf32>
    %25 = arith.truncf %24 : vector<4x64xf32> to vector<4x64xbf16>
    %c0_22 = arith.constant 0 : index
    %c0_23 = arith.constant 0 : index
    %c0_24 = arith.constant 0 : index
    %26 = vector.load %arg5[%c0_22, %c0_23, %c0_24] : memref<1x4x64xbf16, #tpu.memory_space<vmem>>, vector<1x4x64xbf16>
    %27 = vector.shape_cast %26 : vector<1x4x64xbf16> to vector<4x64xbf16>
    %28 = vector.shape_cast %25 : vector<4x64xbf16> to vector<1x4x64xbf16>
    tpu.vector_store %arg5[%c0_22, %c0_23, %c0_24], %28 {strides = array<i32>} : memref<1x4x64xbf16, #tpu.memory_space<vmem>>, vector<1x4x64xbf16>,
    return
  }
  func.func @transform_0(%arg0: i32) -> (i32, i32, i32) {
    %c0_i32 = arith.constant 0 : i32
    %c0_i32_0 = arith.constant 0 : i32
    %c0_i32_1 = arith.constant 0 : i32
    return %arg0, %c0_i32, %c0_i32_0 : i32, i32, i32
  }
  func.func @transform_1(%arg0: i32) -> (i32, i32, i32) {
    %c0_i32 = arith.constant 0 : i32
    %c0_i32_0 = arith.constant 0 : i32
    %c0_i32_1 = arith.constant 0 : i32
    %c0_i32_2 = arith.constant 0 : i32
    return %c0_i32, %c0_i32_0, %c0_i32_1 : i32, i32, i32
  }
  func.func @transform_2(%arg0: i32) -> (i32, i32) {
    %c0_i32 = arith.constant 0 : i32
    %c0_i32_0 = arith.constant 0 : i32
    %c0_i32_1 = arith.constant 0 : i32
    return %c0_i32, %c0_i32_0 : i32, i32
  }
  func.func @transform_3(%arg0: i32) -> (i32, i32) {
    %c0_i32 = arith.constant 0 : i32
    %c0_i32_0 = arith.constant 0 : i32
    %c0_i32_1 = arith.constant 0 : i32
    return %c0_i32, %c0_i32_0 : i32, i32
  }
  func.func @transform_4(%arg0: i32) -> (i32, i32, i32) {
    %c0_i32 = arith.constant 0 : i32
    %c0_i32_0 = arith.constant 0 : i32
    %c0_i32_1 = arith.constant 0 : i32
    return %arg0, %c0_i32, %c0_i32_0 : i32, i32, i32
  }
}

module attributes {stable_mosaic.version = 11 : i64} {
  func.func @_conv_bn_act_kernel(%arg0: i32, %arg1: memref<1x6x64xbf16, #tpu.memory_space<vmem>>, %arg2: memref<3x64x64xbf16, #tpu.memory_space<vmem>>, %arg3: memref<1x64xf32, #tpu.memory_space<vmem>>, %arg4: memref<1x64xf32, #tpu.memory_space<vmem>>, %arg5: memref<1x4x64xbf16, #tpu.memory_space<vmem>>, %arg6: memref<1x4x64xbf16, #tpu.memory_space<vmem>>) attributes {dimension_semantics = [#tpu.dimension_semantics<parallel>], iteration_bounds = array<i64: 2>, scalar_prefetch = 0 : i64, scratch_operands = 0 : i64, tpu.core_type = #tpu.core_type<tc>, window_params = [{transform_indices = @transform_0, window_bounds = array<i64: 1, 6, 64>}, {pipeline_mode = #tpu.pipeline_mode<synchronous>, transform_indices = @transform_1, window_bounds = array<i64: 3, 64, 64>}, {pipeline_mode = #tpu.pipeline_mode<synchronous>, transform_indices = @transform_2, window_bounds = array<i64: 1, 64>}, {pipeline_mode = #tpu.pipeline_mode<synchronous>, transform_indices = @transform_3, window_bounds = array<i64: 1, 64>}, {transform_indices = @transform_4, window_bounds = array<i64: 1, 4, 64>}, {transform_indices = @transform_5, window_bounds = array<i64: 1, 4, 64>}]} {
    %c0 = arith.constant 0 : index
    %c0_0 = arith.constant 0 : index
    %c0_1 = arith.constant 0 : index
    %0 = vector.load %arg1[%c0, %c0_0, %c0_1] : memref<1x6x64xbf16, #tpu.memory_space<vmem>>, vector<1x4x64xbf16>
    %1 = vector.shape_cast %0 : vector<1x4x64xbf16> to vector<4x64xbf16>
    %c0_2 = arith.constant 0 : index
    %c0_3 = arith.constant 0 : index
    %c0_4 = arith.constant 0 : index
    %2 = vector.load %arg2[%c0_2, %c0_3, %c0_4] : memref<3x64x64xbf16, #tpu.memory_space<vmem>>, vector<1x64x64xbf16>
    %3 = vector.shape_cast %2 : vector<1x64x64xbf16> to vector<64x64xbf16>
    %cst = arith.constant dense<0.000000e+00> : vector<4x64xf32>
    %4 = tpu.matmul %1, %3, %cst {dimension_numbers = #tpu.dot_dimension_numbers<[1], [0], [0], [1], [0, 0, 1, 1], [], []>} : vector<4x64xbf16>, vector<64x64xbf16>, vector<4x64xf32> -> vector<4x64xf32>
    %c0_5 = arith.constant 0 : index
    %c1 = arith.constant 1 : index
    %c0_6 = arith.constant 0 : index
    %5 = vector.load %arg1[%c0_5, %c1, %c0_6] : memref<1x6x64xbf16, #tpu.memory_space<vmem>>, vector<1x4x64xbf16>
    %6 = vector.shape_cast %5 : vector<1x4x64xbf16> to vector<4x64xbf16>
    %c1_7 = arith.constant 1 : index
    %c0_8 = arith.constant 0 : index
    %c0_9 = arith.constant 0 : index
    %7 = vector.load %arg2[%c1_7, %c0_8, %c0_9] : memref<3x64x64xbf16, #tpu.memory_space<vmem>>, vector<1x64x64xbf16>
    %8 = vector.shape_cast %7 : vector<1x64x64xbf16> to vector<64x64xbf16>
    %cst_10 = arith.constant dense<0.000000e+00> : vector<4x64xf32>
    %9 = tpu.matmul %6, %8, %cst_10 {dimension_numbers = #tpu.dot_dimension_numbers<[1], [0], [0], [1], [0, 0, 1, 1], [], []>} : vector<4x64xbf16>, vector<64x64xbf16>, vector<4x64xf32> -> vector<4x64xf32>
    %10 = arith.addf %4, %9 : vector<4x64xf32>
    %c0_11 = arith.constant 0 : index
    %c2 = arith.constant 2 : index
    %c0_12 = arith.constant 0 : index
    %11 = vector.load %arg1[%c0_11, %c2, %c0_12] : memref<1x6x64xbf16, #tpu.memory_space<vmem>>, vector<1x4x64xbf16>
    %12 = vector.shape_cast %11 : vector<1x4x64xbf16> to vector<4x64xbf16>
    %c2_13 = arith.constant 2 : index
    %c0_14 = arith.constant 0 : index
    %c0_15 = arith.constant 0 : index
    %13 = vector.load %arg2[%c2_13, %c0_14, %c0_15] : memref<3x64x64xbf16, #tpu.memory_space<vmem>>, vector<1x64x64xbf16>
    %14 = vector.shape_cast %13 : vector<1x64x64xbf16> to vector<64x64xbf16>
    %cst_16 = arith.constant dense<0.000000e+00> : vector<4x64xf32>
    %15 = tpu.matmul %12, %14, %cst_16 {dimension_numbers = #tpu.dot_dimension_numbers<[1], [0], [0], [1], [0, 0, 1, 1], [], []>} : vector<4x64xbf16>, vector<64x64xbf16>, vector<4x64xf32> -> vector<4x64xf32>
    %16 = arith.addf %10, %15 : vector<4x64xf32>
    %c0_17 = arith.constant 0 : index
    %c0_18 = arith.constant 0 : index
    %17 = vector.load %arg3[%c0_17, %c0_18] : memref<1x64xf32, #tpu.memory_space<vmem>>, vector<1x64xf32>
    %18 = vector.broadcast %17 : vector<1x64xf32> to vector<4x64xf32>
    %19 = arith.mulf %16, %18 : vector<4x64xf32>
    %c0_19 = arith.constant 0 : index
    %c0_20 = arith.constant 0 : index
    %20 = vector.load %arg4[%c0_19, %c0_20] : memref<1x64xf32, #tpu.memory_space<vmem>>, vector<1x64xf32>
    %21 = vector.broadcast %20 : vector<1x64xf32> to vector<4x64xf32>
    %22 = arith.addf %19, %21 : vector<4x64xf32>
    %cst_21 = arith.constant 0.000000e+00 : f32
    %23 = vector.broadcast %cst_21 : f32 to vector<4x64xf32>
    %24 = arith.maximumf %22, %23 : vector<4x64xf32>
    %c0_22 = arith.constant 0 : index
    %c0_23 = arith.constant 0 : index
    %c0_24 = arith.constant 0 : index
    %25 = vector.load %arg5[%c0_22, %c0_23, %c0_24] : memref<1x4x64xbf16, #tpu.memory_space<vmem>>, vector<1x4x64xbf16>
    %26 = vector.shape_cast %25 : vector<1x4x64xbf16> to vector<4x64xbf16>
    %27 = arith.extf %26 : vector<4x64xbf16> to vector<4x64xf32>
    %28 = arith.addf %24, %27 : vector<4x64xf32>
    %cst_25 = arith.constant 0.000000e+00 : f32
    %29 = vector.broadcast %cst_25 : f32 to vector<4x64xf32>
    %30 = arith.maximumf %28, %29 : vector<4x64xf32>
    %31 = arith.truncf %30 : vector<4x64xf32> to vector<4x64xbf16>
    %c0_26 = arith.constant 0 : index
    %c0_27 = arith.constant 0 : index
    %c0_28 = arith.constant 0 : index
    %32 = vector.load %arg6[%c0_26, %c0_27, %c0_28] : memref<1x4x64xbf16, #tpu.memory_space<vmem>>, vector<1x4x64xbf16>
    %33 = vector.shape_cast %32 : vector<1x4x64xbf16> to vector<4x64xbf16>
    %34 = vector.shape_cast %31 : vector<4x64xbf16> to vector<1x4x64xbf16>
    tpu.vector_store %arg6[%c0_26, %c0_27, %c0_28], %34 {strides = array<i32>} : memref<1x4x64xbf16, #tpu.memory_space<vmem>>, vector<1x4x64xbf16>,
    return
  }
  func.func @transform_0(%arg0: i32) -> (i32, i32, i32) {
    %c0_i32 = arith.constant 0 : i32
    %c0_i32_0 = arith.constant 0 : i32
    %c0_i32_1 = arith.constant 0 : i32
    return %arg0, %c0_i32, %c0_i32_0 : i32, i32, i32
  }
  func.func @transform_1(%arg0: i32) -> (i32, i32, i32) {
    %c0_i32 = arith.constant 0 : i32
    %c0_i32_0 = arith.constant 0 : i32
    %c0_i32_1 = arith.constant 0 : i32
    %c0_i32_2 = arith.constant 0 : i32
    return %c0_i32, %c0_i32_0, %c0_i32_1 : i32, i32, i32
  }
  func.func @transform_2(%arg0: i32) -> (i32, i32) {
    %c0_i32 = arith.constant 0 : i32
    %c0_i32_0 = arith.constant 0 : i32
    %c0_i32_1 = arith.constant 0 : i32
    return %c0_i32, %c0_i32_0 : i32, i32
  }
  func.func @transform_3(%arg0: i32) -> (i32, i32) {
    %c0_i32 = arith.constant 0 : i32
    %c0_i32_0 = arith.constant 0 : i32
    %c0_i32_1 = arith.constant 0 : i32
    return %c0_i32, %c0_i32_0 : i32, i32
  }
  func.func @transform_4(%arg0: i32) -> (i32, i32, i32) {
    %c0_i32 = arith.constant 0 : i32
    %c0_i32_0 = arith.constant 0 : i32
    %c0_i32_1 = arith.constant 0 : i32
    return %arg0, %c0_i32, %c0_i32_0 : i32, i32, i32
  }
  func.func @transform_5(%arg0: i32) -> (i32, i32, i32) {
    %c0_i32 = arith.constant 0 : i32
    %c0_i32_0 = arith.constant 0 : i32
    %c0_i32_1 = arith.constant 0 : i32
    return %arg0, %c0_i32, %c0_i32_0 : i32, i32, i32
  }
}

module attributes {stable_mosaic.version = 11 : i64} {
  func.func @_conv_bn_act_kernel(%arg0: i32, %arg1: memref<1x2x64xbf16, #tpu.memory_space<vmem>>, %arg2: memref<1x64x32xbf16, #tpu.memory_space<vmem>>, %arg3: memref<1x32xf32, #tpu.memory_space<vmem>>, %arg4: memref<1x32xf32, #tpu.memory_space<vmem>>, %arg5: memref<1x2x32xbf16, #tpu.memory_space<vmem>>) attributes {dimension_semantics = [#tpu.dimension_semantics<parallel>], iteration_bounds = array<i64: 2>, scalar_prefetch = 0 : i64, scratch_operands = 0 : i64, tpu.core_type = #tpu.core_type<tc>, window_params = [{transform_indices = @transform_0, window_bounds = array<i64: 1, 2, 64>}, {pipeline_mode = #tpu.pipeline_mode<synchronous>, transform_indices = @transform_1, window_bounds = array<i64: 1, 64, 32>}, {pipeline_mode = #tpu.pipeline_mode<synchronous>, transform_indices = @transform_2, window_bounds = array<i64: 1, 32>}, {pipeline_mode = #tpu.pipeline_mode<synchronous>, transform_indices = @transform_3, window_bounds = array<i64: 1, 32>}, {transform_indices = @transform_4, window_bounds = array<i64: 1, 2, 32>}]} {
    %c0 = arith.constant 0 : index
    %c0_0 = arith.constant 0 : index
    %c0_1 = arith.constant 0 : index
    %0 = vector.load %arg1[%c0, %c0_0, %c0_1] : memref<1x2x64xbf16, #tpu.memory_space<vmem>>, vector<1x2x64xbf16>
    %1 = vector.shape_cast %0 : vector<1x2x64xbf16> to vector<2x64xbf16>
    %c0_2 = arith.constant 0 : index
    %c0_3 = arith.constant 0 : index
    %c0_4 = arith.constant 0 : index
    %2 = vector.load %arg2[%c0_2, %c0_3, %c0_4] : memref<1x64x32xbf16, #tpu.memory_space<vmem>>, vector<1x64x32xbf16>
    %3 = vector.shape_cast %2 : vector<1x64x32xbf16> to vector<64x32xbf16>
    %cst = arith.constant dense<0.000000e+00> : vector<2x32xf32>
    %4 = tpu.matmul %1, %3, %cst {dimension_numbers = #tpu.dot_dimension_numbers<[1], [0], [0], [1], [0, 0, 1, 1], [], []>} : vector<2x64xbf16>, vector<64x32xbf16>, vector<2x32xf32> -> vector<2x32xf32>
    %c0_5 = arith.constant 0 : index
    %c0_6 = arith.constant 0 : index
    %5 = vector.load %arg3[%c0_5, %c0_6] : memref<1x32xf32, #tpu.memory_space<vmem>>, vector<1x32xf32>
    %6 = vector.broadcast %5 : vector<1x32xf32> to vector<2x32xf32>
    %7 = arith.mulf %4, %6 : vector<2x32xf32>
    %c0_7 = arith.constant 0 : index
    %c0_8 = arith.constant 0 : index
    %8 = vector.load %arg4[%c0_7, %c0_8] : memref<1x32xf32, #tpu.memory_space<vmem>>, vector<1x32xf32>
    %9 = vector.broadcast %8 : vector<1x32xf32> to vector<2x32xf32>
    %10 = arith.addf %7, %9 : vector<2x32xf32>
    %11 = arith.truncf %10 : vector<2x32xf32> to vector<2x32xbf16>
    %c0_9 = arith.constant 0 : index
    %c0_10 = arith.constant 0 : index
    %c0_11 = arith.constant 0 : index
    %12 = vector.load %arg5[%c0_9, %c0_10, %c0_11] : memref<1x2x32xbf16, #tpu.memory_space<vmem>>, vector<1x2x32xbf16>
    %13 = vector.shape_cast %12 : vector<1x2x32xbf16> to vector<2x32xbf16>
    %14 = vector.shape_cast %11 : vector<2x32xbf16> to vector<1x2x32xbf16>
    tpu.vector_store %arg5[%c0_9, %c0_10, %c0_11], %14 {strides = array<i32>} : memref<1x2x32xbf16, #tpu.memory_space<vmem>>, vector<1x2x32xbf16>,
    return
  }
  func.func @transform_0(%arg0: i32) -> (i32, i32, i32) {
    %c0_i32 = arith.constant 0 : i32
    %c0_i32_0 = arith.constant 0 : i32
    %c0_i32_1 = arith.constant 0 : i32
    return %arg0, %c0_i32, %c0_i32_0 : i32, i32, i32
  }
  func.func @transform_1(%arg0: i32) -> (i32, i32, i32) {
    %c0_i32 = arith.constant 0 : i32
    %c0_i32_0 = arith.constant 0 : i32
    %c0_i32_1 = arith.constant 0 : i32
    %c0_i32_2 = arith.constant 0 : i32
    return %c0_i32, %c0_i32_0, %c0_i32_1 : i32, i32, i32
  }
  func.func @transform_2(%arg0: i32) -> (i32, i32) {
    %c0_i32 = arith.constant 0 : i32
    %c0_i32_0 = arith.constant 0 : i32
    %c0_i32_1 = arith.constant 0 : i32
    return %c0_i32, %c0_i32_0 : i32, i32
  }
  func.func @transform_3(%arg0: i32) -> (i32, i32) {
    %c0_i32 = arith.constant 0 : i32
    %c0_i32_0 = arith.constant 0 : i32
    %c0_i32_1 = arith.constant 0 : i32
    return %c0_i32, %c0_i32_0 : i32, i32
  }
  func.func @transform_4(%arg0: i32) -> (i32, i32, i32) {
    %c0_i32 = arith.constant 0 : i32
    %c0_i32_0 = arith.constant 0 : i32
    %c0_i32_1 = arith.constant 0 : i32
    return %arg0, %c0_i32, %c0_i32_0 : i32, i32, i32
  }
}

module attributes {stable_mosaic.version = 11 : i64} {
  func.func @_conv_bn_act_kernel(%arg0: i32, %arg1: memref<1x2x64xbf16, #tpu.memory_space<vmem>>, %arg2: memref<1x2x64xbf16, #tpu.memory_space<vmem>>, %arg3: memref<1x2x64xbf16, #tpu.memory_space<vmem>>, %arg4: memref<3x64x32xbf16, #tpu.memory_space<vmem>>, %arg5: memref<1x32xf32, #tpu.memory_space<vmem>>, %arg6: memref<1x32xf32, #tpu.memory_space<vmem>>, %arg7: memref<1x2x32xbf16, #tpu.memory_space<vmem>>) attributes {dimension_semantics = [#tpu.dimension_semantics<parallel>], iteration_bounds = array<i64: 2>, scalar_prefetch = 0 : i64, scratch_operands = 0 : i64, tpu.core_type = #tpu.core_type<tc>, window_params = [{transform_indices = @transform_0, window_bounds = array<i64: 1, 2, 64>}, {transform_indices = @transform_1, window_bounds = array<i64: 1, 2, 64>}, {transform_indices = @transform_2, window_bounds = array<i64: 1, 2, 64>}, {pipeline_mode = #tpu.pipeline_mode<synchronous>, transform_indices = @transform_3, window_bounds = array<i64: 3, 64, 32>}, {pipeline_mode = #tpu.pipeline_mode<synchronous>, transform_indices = @transform_4, window_bounds = array<i64: 1, 32>}, {pipeline_mode = #tpu.pipeline_mode<synchronous>, transform_indices = @transform_5, window_bounds = array<i64: 1, 32>}, {transform_indices = @transform_6, window_bounds = array<i64: 1, 2, 32>}]} {
    %c0 = arith.constant 0 : index
    %c0_0 = arith.constant 0 : index
    %c0_1 = arith.constant 0 : index
    %0 = vector.load %arg1[%c0, %c0_0, %c0_1] : memref<1x2x64xbf16, #tpu.memory_space<vmem>>, vector<1x2x64xbf16>
    %1 = vector.shape_cast %0 : vector<1x2x64xbf16> to vector<2x64xbf16>
    %c0_2 = arith.constant 0 : index
    %c0_3 = arith.constant 0 : index
    %c0_4 = arith.constant 0 : index
    %2 = vector.load %arg4[%c0_2, %c0_3, %c0_4] : memref<3x64x32xbf16, #tpu.memory_space<vmem>>, vector<1x64x32xbf16>
    %3 = vector.shape_cast %2 : vector<1x64x32xbf16> to vector<64x32xbf16>
    %cst = arith.constant dense<0.000000e+00> : vector<2x32xf32>
    %4 = tpu.matmul %1, %3, %cst {dimension_numbers = #tpu.dot_dimension_numbers<[1], [0], [0], [1], [0, 0, 1, 1], [], []>} : vector<2x64xbf16>, vector<64x32xbf16>, vector<2x32xf32> -> vector<2x32xf32>
    %c0_5 = arith.constant 0 : index
    %c0_6 = arith.constant 0 : index
    %c0_7 = arith.constant 0 : index
    %5 = vector.load %arg2[%c0_5, %c0_6, %c0_7] : memref<1x2x64xbf16, #tpu.memory_space<vmem>>, vector<1x2x64xbf16>
    %6 = vector.shape_cast %5 : vector<1x2x64xbf16> to vector<2x64xbf16>
    %c1 = arith.constant 1 : index
    %c0_8 = arith.constant 0 : index
    %c0_9 = arith.constant 0 : index
    %7 = vector.load %arg4[%c1, %c0_8, %c0_9] : memref<3x64x32xbf16, #tpu.memory_space<vmem>>, vector<1x64x32xbf16>
    %8 = vector.shape_cast %7 : vector<1x64x32xbf16> to vector<64x32xbf16>
    %cst_10 = arith.constant dense<0.000000e+00> : vector<2x32xf32>
    %9 = tpu.matmul %6, %8, %cst_10 {dimension_numbers = #tpu.dot_dimension_numbers<[1], [0], [0], [1], [0, 0, 1, 1], [], []>} : vector<2x64xbf16>, vector<64x32xbf16>, vector<2x32xf32> -> vector<2x32xf32>
    %10 = arith.addf %4, %9 : vector<2x32xf32>
    %c0_11 = arith.constant 0 : index
    %c0_12 = arith.constant 0 : index
    %c0_13 = arith.constant 0 : index
    %11 = vector.load %arg3[%c0_11, %c0_12, %c0_13] : memref<1x2x64xbf16, #tpu.memory_space<vmem>>, vector<1x2x64xbf16>
    %12 = vector.shape_cast %11 : vector<1x2x64xbf16> to vector<2x64xbf16>
    %c2 = arith.constant 2 : index
    %c0_14 = arith.constant 0 : index
    %c0_15 = arith.constant 0 : index
    %13 = vector.load %arg4[%c2, %c0_14, %c0_15] : memref<3x64x32xbf16, #tpu.memory_space<vmem>>, vector<1x64x32xbf16>
    %14 = vector.shape_cast %13 : vector<1x64x32xbf16> to vector<64x32xbf16>
    %cst_16 = arith.constant dense<0.000000e+00> : vector<2x32xf32>
    %15 = tpu.matmul %12, %14, %cst_16 {dimension_numbers = #tpu.dot_dimension_numbers<[1], [0], [0], [1], [0, 0, 1, 1], [], []>} : vector<2x64xbf16>, vector<64x32xbf16>, vector<2x32xf32> -> vector<2x32xf32>
    %16 = arith.addf %10, %15 : vector<2x32xf32>
    %c0_17 = arith.constant 0 : index
    %c0_18 = arith.constant 0 : index
    %17 = vector.load %arg5[%c0_17, %c0_18] : memref<1x32xf32, #tpu.memory_space<vmem>>, vector<1x32xf32>
    %18 = vector.broadcast %17 : vector<1x32xf32> to vector<2x32xf32>
    %19 = arith.mulf %16, %18 : vector<2x32xf32>
    %c0_19 = arith.constant 0 : index
    %c0_20 = arith.constant 0 : index
    %20 = vector.load %arg6[%c0_19, %c0_20] : memref<1x32xf32, #tpu.memory_space<vmem>>, vector<1x32xf32>
    %21 = vector.broadcast %20 : vector<1x32xf32> to vector<2x32xf32>
    %22 = arith.addf %19, %21 : vector<2x32xf32>
    %cst_21 = arith.constant 0.000000e+00 : f32
    %23 = vector.broadcast %cst_21 : f32 to vector<2x32xf32>
    %24 = arith.maximumf %22, %23 : vector<2x32xf32>
    %25 = arith.truncf %24 : vector<2x32xf32> to vector<2x32xbf16>
    %c0_22 = arith.constant 0 : index
    %c0_23 = arith.constant 0 : index
    %c0_24 = arith.constant 0 : index
    %26 = vector.load %arg7[%c0_22, %c0_23, %c0_24] : memref<1x2x32xbf16, #tpu.memory_space<vmem>>, vector<1x2x32xbf16>
    %27 = vector.shape_cast %26 : vector<1x2x32xbf16> to vector<2x32xbf16>
    %28 = vector.shape_cast %25 : vector<2x32xbf16> to vector<1x2x32xbf16>
    tpu.vector_store %arg7[%c0_22, %c0_23, %c0_24], %28 {strides = array<i32>} : memref<1x2x32xbf16, #tpu.memory_space<vmem>>, vector<1x2x32xbf16>,
    return
  }
  func.func @transform_0(%arg0: i32) -> (i32, i32, i32) {
    %c0_i32 = arith.constant 0 : i32
    %c0_i32_0 = arith.constant 0 : i32
    %c0_i32_1 = arith.constant 0 : i32
    return %arg0, %c0_i32, %c0_i32_0 : i32, i32, i32
  }
  func.func @transform_1(%arg0: i32) -> (i32, i32, i32) {
    %c0_i32 = arith.constant 0 : i32
    %c0_i32_0 = arith.constant 0 : i32
    %c0_i32_1 = arith.constant 0 : i32
    return %arg0, %c0_i32, %c0_i32_0 : i32, i32, i32
  }
  func.func @transform_2(%arg0: i32) -> (i32, i32, i32) {
    %c0_i32 = arith.constant 0 : i32
    %c0_i32_0 = arith.constant 0 : i32
    %c0_i32_1 = arith.constant 0 : i32
    return %arg0, %c0_i32, %c0_i32_0 : i32, i32, i32
  }
  func.func @transform_3(%arg0: i32) -> (i32, i32, i32) {
    %c0_i32 = arith.constant 0 : i32
    %c0_i32_0 = arith.constant 0 : i32
    %c0_i32_1 = arith.constant 0 : i32
    %c0_i32_2 = arith.constant 0 : i32
    return %c0_i32, %c0_i32_0, %c0_i32_1 : i32, i32, i32
  }
  func.func @transform_4(%arg0: i32) -> (i32, i32) {
    %c0_i32 = arith.constant 0 : i32
    %c0_i32_0 = arith.constant 0 : i32
    %c0_i32_1 = arith.constant 0 : i32
    return %c0_i32, %c0_i32_0 : i32, i32
  }
  func.func @transform_5(%arg0: i32) -> (i32, i32) {
    %c0_i32 = arith.constant 0 : i32
    %c0_i32_0 = arith.constant 0 : i32
    %c0_i32_1 = arith.constant 0 : i32
    return %c0_i32, %c0_i32_0 : i32, i32
  }
  func.func @transform_6(%arg0: i32) -> (i32, i32, i32) {
    %c0_i32 = arith.constant 0 : i32
    %c0_i32_0 = arith.constant 0 : i32
    %c0_i32_1 = arith.constant 0 : i32
    return %arg0, %c0_i32, %c0_i32_0 : i32, i32, i32
  }
}

module attributes {stable_mosaic.version = 11 : i64} {
  func.func @_conv_bn_act_kernel(%arg0: i32, %arg1: memref<1x4x32xbf16, #tpu.memory_space<vmem>>, %arg2: memref<3x32x32xbf16, #tpu.memory_space<vmem>>, %arg3: memref<1x32xf32, #tpu.memory_space<vmem>>, %arg4: memref<1x32xf32, #tpu.memory_space<vmem>>, %arg5: memref<1x2x32xbf16, #tpu.memory_space<vmem>>) attributes {dimension_semantics = [#tpu.dimension_semantics<parallel>], iteration_bounds = array<i64: 2>, scalar_prefetch = 0 : i64, scratch_operands = 0 : i64, tpu.core_type = #tpu.core_type<tc>, window_params = [{transform_indices = @transform_0, window_bounds = array<i64: 1, 4, 32>}, {pipeline_mode = #tpu.pipeline_mode<synchronous>, transform_indices = @transform_1, window_bounds = array<i64: 3, 32, 32>}, {pipeline_mode = #tpu.pipeline_mode<synchronous>, transform_indices = @transform_2, window_bounds = array<i64: 1, 32>}, {pipeline_mode = #tpu.pipeline_mode<synchronous>, transform_indices = @transform_3, window_bounds = array<i64: 1, 32>}, {transform_indices = @transform_4, window_bounds = array<i64: 1, 2, 32>}]} {
    %c0 = arith.constant 0 : index
    %c0_0 = arith.constant 0 : index
    %c0_1 = arith.constant 0 : index
    %0 = vector.load %arg1[%c0, %c0_0, %c0_1] : memref<1x4x32xbf16, #tpu.memory_space<vmem>>, vector<1x2x32xbf16>
    %1 = vector.shape_cast %0 : vector<1x2x32xbf16> to vector<2x32xbf16>
    %c0_2 = arith.constant 0 : index
    %c0_3 = arith.constant 0 : index
    %c0_4 = arith.constant 0 : index
    %2 = vector.load %arg2[%c0_2, %c0_3, %c0_4] : memref<3x32x32xbf16, #tpu.memory_space<vmem>>, vector<1x32x32xbf16>
    %3 = vector.shape_cast %2 : vector<1x32x32xbf16> to vector<32x32xbf16>
    %cst = arith.constant dense<0.000000e+00> : vector<2x32xf32>
    %4 = tpu.matmul %1, %3, %cst {dimension_numbers = #tpu.dot_dimension_numbers<[1], [0], [0], [1], [0, 0, 1, 1], [], []>} : vector<2x32xbf16>, vector<32x32xbf16>, vector<2x32xf32> -> vector<2x32xf32>
    %c0_5 = arith.constant 0 : index
    %c1 = arith.constant 1 : index
    %c0_6 = arith.constant 0 : index
    %5 = vector.load %arg1[%c0_5, %c1, %c0_6] : memref<1x4x32xbf16, #tpu.memory_space<vmem>>, vector<1x2x32xbf16>
    %6 = vector.shape_cast %5 : vector<1x2x32xbf16> to vector<2x32xbf16>
    %c1_7 = arith.constant 1 : index
    %c0_8 = arith.constant 0 : index
    %c0_9 = arith.constant 0 : index
    %7 = vector.load %arg2[%c1_7, %c0_8, %c0_9] : memref<3x32x32xbf16, #tpu.memory_space<vmem>>, vector<1x32x32xbf16>
    %8 = vector.shape_cast %7 : vector<1x32x32xbf16> to vector<32x32xbf16>
    %cst_10 = arith.constant dense<0.000000e+00> : vector<2x32xf32>
    %9 = tpu.matmul %6, %8, %cst_10 {dimension_numbers = #tpu.dot_dimension_numbers<[1], [0], [0], [1], [0, 0, 1, 1], [], []>} : vector<2x32xbf16>, vector<32x32xbf16>, vector<2x32xf32> -> vector<2x32xf32>
    %10 = arith.addf %4, %9 : vector<2x32xf32>
    %c0_11 = arith.constant 0 : index
    %c2 = arith.constant 2 : index
    %c0_12 = arith.constant 0 : index
    %11 = vector.load %arg1[%c0_11, %c2, %c0_12] : memref<1x4x32xbf16, #tpu.memory_space<vmem>>, vector<1x2x32xbf16>
    %12 = vector.shape_cast %11 : vector<1x2x32xbf16> to vector<2x32xbf16>
    %c2_13 = arith.constant 2 : index
    %c0_14 = arith.constant 0 : index
    %c0_15 = arith.constant 0 : index
    %13 = vector.load %arg2[%c2_13, %c0_14, %c0_15] : memref<3x32x32xbf16, #tpu.memory_space<vmem>>, vector<1x32x32xbf16>
    %14 = vector.shape_cast %13 : vector<1x32x32xbf16> to vector<32x32xbf16>
    %cst_16 = arith.constant dense<0.000000e+00> : vector<2x32xf32>
    %15 = tpu.matmul %12, %14, %cst_16 {dimension_numbers = #tpu.dot_dimension_numbers<[1], [0], [0], [1], [0, 0, 1, 1], [], []>} : vector<2x32xbf16>, vector<32x32xbf16>, vector<2x32xf32> -> vector<2x32xf32>
    %16 = arith.addf %10, %15 : vector<2x32xf32>
    %c0_17 = arith.constant 0 : index
    %c0_18 = arith.constant 0 : index
    %17 = vector.load %arg3[%c0_17, %c0_18] : memref<1x32xf32, #tpu.memory_space<vmem>>, vector<1x32xf32>
    %18 = vector.broadcast %17 : vector<1x32xf32> to vector<2x32xf32>
    %19 = arith.mulf %16, %18 : vector<2x32xf32>
    %c0_19 = arith.constant 0 : index
    %c0_20 = arith.constant 0 : index
    %20 = vector.load %arg4[%c0_19, %c0_20] : memref<1x32xf32, #tpu.memory_space<vmem>>, vector<1x32xf32>
    %21 = vector.broadcast %20 : vector<1x32xf32> to vector<2x32xf32>
    %22 = arith.addf %19, %21 : vector<2x32xf32>
    %cst_21 = arith.constant 0.000000e+00 : f32
    %23 = vector.broadcast %cst_21 : f32 to vector<2x32xf32>
    %24 = arith.maximumf %22, %23 : vector<2x32xf32>
    %25 = arith.truncf %24 : vector<2x32xf32> to vector<2x32xbf16>
    %c0_22 = arith.constant 0 : index
    %c0_23 = arith.constant 0 : index
    %c0_24 = arith.constant 0 : index
    %26 = vector.load %arg5[%c0_22, %c0_23, %c0_24] : memref<1x2x32xbf16, #tpu.memory_space<vmem>>, vector<1x2x32xbf16>
    %27 = vector.shape_cast %26 : vector<1x2x32xbf16> to vector<2x32xbf16>
    %28 = vector.shape_cast %25 : vector<2x32xbf16> to vector<1x2x32xbf16>
    tpu.vector_store %arg5[%c0_22, %c0_23, %c0_24], %28 {strides = array<i32>} : memref<1x2x32xbf16, #tpu.memory_space<vmem>>, vector<1x2x32xbf16>,
    return
  }
  func.func @transform_0(%arg0: i32) -> (i32, i32, i32) {
    %c0_i32 = arith.constant 0 : i32
    %c0_i32_0 = arith.constant 0 : i32
    %c0_i32_1 = arith.constant 0 : i32
    return %arg0, %c0_i32, %c0_i32_0 : i32, i32, i32
  }
  func.func @transform_1(%arg0: i32) -> (i32, i32, i32) {
    %c0_i32 = arith.constant 0 : i32
    %c0_i32_0 = arith.constant 0 : i32
    %c0_i32_1 = arith.constant 0 : i32
    %c0_i32_2 = arith.constant 0 : i32
    return %c0_i32, %c0_i32_0, %c0_i32_1 : i32, i32, i32
  }
  func.func @transform_2(%arg0: i32) -> (i32, i32) {
    %c0_i32 = arith.constant 0 : i32
    %c0_i32_0 = arith.constant 0 : i32
    %c0_i32_1 = arith.constant 0 : i32
    return %c0_i32, %c0_i32_0 : i32, i32
  }
  func.func @transform_3(%arg0: i32) -> (i32, i32) {
    %c0_i32 = arith.constant 0 : i32
    %c0_i32_0 = arith.constant 0 : i32
    %c0_i32_1 = arith.constant 0 : i32
    return %c0_i32, %c0_i32_0 : i32, i32
  }
  func.func @transform_4(%arg0: i32) -> (i32, i32, i32) {
    %c0_i32 = arith.constant 0 : i32
    %c0_i32_0 = arith.constant 0 : i32
    %c0_i32_1 = arith.constant 0 : i32
    return %arg0, %c0_i32, %c0_i32_0 : i32, i32, i32
  }
}

module attributes {stable_mosaic.version = 11 : i64} {
  func.func @_conv_bn_act_kernel(%arg0: i32, %arg1: memref<1x4x32xbf16, #tpu.memory_space<vmem>>, %arg2: memref<3x32x32xbf16, #tpu.memory_space<vmem>>, %arg3: memref<1x32xf32, #tpu.memory_space<vmem>>, %arg4: memref<1x32xf32, #tpu.memory_space<vmem>>, %arg5: memref<1x2x32xbf16, #tpu.memory_space<vmem>>, %arg6: memref<1x2x32xbf16, #tpu.memory_space<vmem>>) attributes {dimension_semantics = [#tpu.dimension_semantics<parallel>], iteration_bounds = array<i64: 2>, scalar_prefetch = 0 : i64, scratch_operands = 0 : i64, tpu.core_type = #tpu.core_type<tc>, window_params = [{transform_indices = @transform_0, window_bounds = array<i64: 1, 4, 32>}, {pipeline_mode = #tpu.pipeline_mode<synchronous>, transform_indices = @transform_1, window_bounds = array<i64: 3, 32, 32>}, {pipeline_mode = #tpu.pipeline_mode<synchronous>, transform_indices = @transform_2, window_bounds = array<i64: 1, 32>}, {pipeline_mode = #tpu.pipeline_mode<synchronous>, transform_indices = @transform_3, window_bounds = array<i64: 1, 32>}, {transform_indices = @transform_4, window_bounds = array<i64: 1, 2, 32>}, {transform_indices = @transform_5, window_bounds = array<i64: 1, 2, 32>}]} {
    %c0 = arith.constant 0 : index
    %c0_0 = arith.constant 0 : index
    %c0_1 = arith.constant 0 : index
    %0 = vector.load %arg1[%c0, %c0_0, %c0_1] : memref<1x4x32xbf16, #tpu.memory_space<vmem>>, vector<1x2x32xbf16>
    %1 = vector.shape_cast %0 : vector<1x2x32xbf16> to vector<2x32xbf16>
    %c0_2 = arith.constant 0 : index
    %c0_3 = arith.constant 0 : index
    %c0_4 = arith.constant 0 : index
    %2 = vector.load %arg2[%c0_2, %c0_3, %c0_4] : memref<3x32x32xbf16, #tpu.memory_space<vmem>>, vector<1x32x32xbf16>
    %3 = vector.shape_cast %2 : vector<1x32x32xbf16> to vector<32x32xbf16>
    %cst = arith.constant dense<0.000000e+00> : vector<2x32xf32>
    %4 = tpu.matmul %1, %3, %cst {dimension_numbers = #tpu.dot_dimension_numbers<[1], [0], [0], [1], [0, 0, 1, 1], [], []>} : vector<2x32xbf16>, vector<32x32xbf16>, vector<2x32xf32> -> vector<2x32xf32>
    %c0_5 = arith.constant 0 : index
    %c1 = arith.constant 1 : index
    %c0_6 = arith.constant 0 : index
    %5 = vector.load %arg1[%c0_5, %c1, %c0_6] : memref<1x4x32xbf16, #tpu.memory_space<vmem>>, vector<1x2x32xbf16>
    %6 = vector.shape_cast %5 : vector<1x2x32xbf16> to vector<2x32xbf16>
    %c1_7 = arith.constant 1 : index
    %c0_8 = arith.constant 0 : index
    %c0_9 = arith.constant 0 : index
    %7 = vector.load %arg2[%c1_7, %c0_8, %c0_9] : memref<3x32x32xbf16, #tpu.memory_space<vmem>>, vector<1x32x32xbf16>
    %8 = vector.shape_cast %7 : vector<1x32x32xbf16> to vector<32x32xbf16>
    %cst_10 = arith.constant dense<0.000000e+00> : vector<2x32xf32>
    %9 = tpu.matmul %6, %8, %cst_10 {dimension_numbers = #tpu.dot_dimension_numbers<[1], [0], [0], [1], [0, 0, 1, 1], [], []>} : vector<2x32xbf16>, vector<32x32xbf16>, vector<2x32xf32> -> vector<2x32xf32>
    %10 = arith.addf %4, %9 : vector<2x32xf32>
    %c0_11 = arith.constant 0 : index
    %c2 = arith.constant 2 : index
    %c0_12 = arith.constant 0 : index
    %11 = vector.load %arg1[%c0_11, %c2, %c0_12] : memref<1x4x32xbf16, #tpu.memory_space<vmem>>, vector<1x2x32xbf16>
    %12 = vector.shape_cast %11 : vector<1x2x32xbf16> to vector<2x32xbf16>
    %c2_13 = arith.constant 2 : index
    %c0_14 = arith.constant 0 : index
    %c0_15 = arith.constant 0 : index
    %13 = vector.load %arg2[%c2_13, %c0_14, %c0_15] : memref<3x32x32xbf16, #tpu.memory_space<vmem>>, vector<1x32x32xbf16>
    %14 = vector.shape_cast %13 : vector<1x32x32xbf16> to vector<32x32xbf16>
    %cst_16 = arith.constant dense<0.000000e+00> : vector<2x32xf32>
    %15 = tpu.matmul %12, %14, %cst_16 {dimension_numbers = #tpu.dot_dimension_numbers<[1], [0], [0], [1], [0, 0, 1, 1], [], []>} : vector<2x32xbf16>, vector<32x32xbf16>, vector<2x32xf32> -> vector<2x32xf32>
    %16 = arith.addf %10, %15 : vector<2x32xf32>
    %c0_17 = arith.constant 0 : index
    %c0_18 = arith.constant 0 : index
    %17 = vector.load %arg3[%c0_17, %c0_18] : memref<1x32xf32, #tpu.memory_space<vmem>>, vector<1x32xf32>
    %18 = vector.broadcast %17 : vector<1x32xf32> to vector<2x32xf32>
    %19 = arith.mulf %16, %18 : vector<2x32xf32>
    %c0_19 = arith.constant 0 : index
    %c0_20 = arith.constant 0 : index
    %20 = vector.load %arg4[%c0_19, %c0_20] : memref<1x32xf32, #tpu.memory_space<vmem>>, vector<1x32xf32>
    %21 = vector.broadcast %20 : vector<1x32xf32> to vector<2x32xf32>
    %22 = arith.addf %19, %21 : vector<2x32xf32>
    %cst_21 = arith.constant 0.000000e+00 : f32
    %23 = vector.broadcast %cst_21 : f32 to vector<2x32xf32>
    %24 = arith.maximumf %22, %23 : vector<2x32xf32>
    %c0_22 = arith.constant 0 : index
    %c0_23 = arith.constant 0 : index
    %c0_24 = arith.constant 0 : index
    %25 = vector.load %arg5[%c0_22, %c0_23, %c0_24] : memref<1x2x32xbf16, #tpu.memory_space<vmem>>, vector<1x2x32xbf16>
    %26 = vector.shape_cast %25 : vector<1x2x32xbf16> to vector<2x32xbf16>
    %27 = arith.extf %26 : vector<2x32xbf16> to vector<2x32xf32>
    %28 = arith.addf %24, %27 : vector<2x32xf32>
    %cst_25 = arith.constant 0.000000e+00 : f32
    %29 = vector.broadcast %cst_25 : f32 to vector<2x32xf32>
    %30 = arith.maximumf %28, %29 : vector<2x32xf32>
    %31 = arith.truncf %30 : vector<2x32xf32> to vector<2x32xbf16>
    %c0_26 = arith.constant 0 : index
    %c0_27 = arith.constant 0 : index
    %c0_28 = arith.constant 0 : index
    %32 = vector.load %arg6[%c0_26, %c0_27, %c0_28] : memref<1x2x32xbf16, #tpu.memory_space<vmem>>, vector<1x2x32xbf16>
    %33 = vector.shape_cast %32 : vector<1x2x32xbf16> to vector<2x32xbf16>
    %34 = vector.shape_cast %31 : vector<2x32xbf16> to vector<1x2x32xbf16>
    tpu.vector_store %arg6[%c0_26, %c0_27, %c0_28], %34 {strides = array<i32>} : memref<1x2x32xbf16, #tpu.memory_space<vmem>>, vector<1x2x32xbf16>,
    return
  }
  func.func @transform_0(%arg0: i32) -> (i32, i32, i32) {
    %c0_i32 = arith.constant 0 : i32
    %c0_i32_0 = arith.constant 0 : i32
    %c0_i32_1 = arith.constant 0 : i32
    return %arg0, %c0_i32, %c0_i32_0 : i32, i32, i32
  }
  func.func @transform_1(%arg0: i32) -> (i32, i32, i32) {
    %c0_i32 = arith.constant 0 : i32
    %c0_i32_0 = arith.constant 0 : i32
    %c0_i32_1 = arith.constant 0 : i32
    %c0_i32_2 = arith.constant 0 : i32
    return %c0_i32, %c0_i32_0, %c0_i32_1 : i32, i32, i32
  }
  func.func @transform_2(%arg0: i32) -> (i32, i32) {
    %c0_i32 = arith.constant 0 : i32
    %c0_i32_0 = arith.constant 0 : i32
    %c0_i32_1 = arith.constant 0 : i32
    return %c0_i32, %c0_i32_0 : i32, i32
  }
  func.func @transform_3(%arg0: i32) -> (i32, i32) {
    %c0_i32 = arith.constant 0 : i32
    %c0_i32_0 = arith.constant 0 : i32
    %c0_i32_1 = arith.constant 0 : i32
    return %c0_i32, %c0_i32_0 : i32, i32
  }
  func.func @transform_4(%arg0: i32) -> (i32, i32, i32) {
    %c0_i32 = arith.constant 0 : i32
    %c0_i32_0 = arith.constant 0 : i32
    %c0_i32_1 = arith.constant 0 : i32
    return %arg0, %c0_i32, %c0_i32_0 : i32, i32, i32
  }
  func.func @transform_5(%arg0: i32) -> (i32, i32, i32) {
    %c0_i32 = arith.constant 0 : i32
    %c0_i32_0 = arith.constant 0 : i32
    %c0_i32_1 = arith.constant 0 : i32
    return %arg0, %c0_i32, %c0_i32_0 : i32, i32, i32
  }
}

module attributes {stable_mosaic.version = 11 : i64} {
  func.func @_conv_bn_act_kernel(%arg0: i32, %arg1: memref<1x1x32xbf16, #tpu.memory_space<vmem>>, %arg2: memref<1x1x32xbf16, #tpu.memory_space<vmem>>, %arg3: memref<1x1x32xbf16, #tpu.memory_space<vmem>>, %arg4: memref<3x32x64xbf16, #tpu.memory_space<vmem>>, %arg5: memref<1x64xf32, #tpu.memory_space<vmem>>, %arg6: memref<1x64xf32, #tpu.memory_space<vmem>>, %arg7: memref<1x1x64xbf16, #tpu.memory_space<vmem>>) attributes {dimension_semantics = [#tpu.dimension_semantics<parallel>], iteration_bounds = array<i64: 2>, scalar_prefetch = 0 : i64, scratch_operands = 0 : i64, tpu.core_type = #tpu.core_type<tc>, window_params = [{transform_indices = @transform_0, window_bounds = array<i64: 1, 1, 32>}, {transform_indices = @transform_1, window_bounds = array<i64: 1, 1, 32>}, {transform_indices = @transform_2, window_bounds = array<i64: 1, 1, 32>}, {pipeline_mode = #tpu.pipeline_mode<synchronous>, transform_indices = @transform_3, window_bounds = array<i64: 3, 32, 64>}, {pipeline_mode = #tpu.pipeline_mode<synchronous>, transform_indices = @transform_4, window_bounds = array<i64: 1, 64>}, {pipeline_mode = #tpu.pipeline_mode<synchronous>, transform_indices = @transform_5, window_bounds = array<i64: 1, 64>}, {transform_indices = @transform_6, window_bounds = array<i64: 1, 1, 64>}]} {
    %c0 = arith.constant 0 : index
    %c0_0 = arith.constant 0 : index
    %c0_1 = arith.constant 0 : index
    %0 = vector.load %arg1[%c0, %c0_0, %c0_1] : memref<1x1x32xbf16, #tpu.memory_space<vmem>>, vector<1x1x32xbf16>
    %1 = vector.shape_cast %0 : vector<1x1x32xbf16> to vector<1x32xbf16>
    %c0_2 = arith.constant 0 : index
    %c0_3 = arith.constant 0 : index
    %c0_4 = arith.constant 0 : index
    %2 = vector.load %arg4[%c0_2, %c0_3, %c0_4] : memref<3x32x64xbf16, #tpu.memory_space<vmem>>, vector<1x32x64xbf16>
    %3 = vector.shape_cast %2 : vector<1x32x64xbf16> to vector<32x64xbf16>
    %cst = arith.constant dense<0.000000e+00> : vector<1x64xf32>
    %4 = tpu.matmul %1, %3, %cst {dimension_numbers = #tpu.dot_dimension_numbers<[1], [0], [0], [1], [0, 0, 1, 1], [], []>} : vector<1x32xbf16>, vector<32x64xbf16>, vector<1x64xf32> -> vector<1x64xf32>
    %c0_5 = arith.constant 0 : index
    %c0_6 = arith.constant 0 : index
    %c0_7 = arith.constant 0 : index
    %5 = vector.load %arg2[%c0_5, %c0_6, %c0_7] : memref<1x1x32xbf16, #tpu.memory_space<vmem>>, vector<1x1x32xbf16>
    %6 = vector.shape_cast %5 : vector<1x1x32xbf16> to vector<1x32xbf16>
    %c1 = arith.constant 1 : index
    %c0_8 = arith.constant 0 : index
    %c0_9 = arith.constant 0 : index
    %7 = vector.load %arg4[%c1, %c0_8, %c0_9] : memref<3x32x64xbf16, #tpu.memory_space<vmem>>, vector<1x32x64xbf16>
    %8 = vector.shape_cast %7 : vector<1x32x64xbf16> to vector<32x64xbf16>
    %cst_10 = arith.constant dense<0.000000e+00> : vector<1x64xf32>
    %9 = tpu.matmul %6, %8, %cst_10 {dimension_numbers = #tpu.dot_dimension_numbers<[1], [0], [0], [1], [0, 0, 1, 1], [], []>} : vector<1x32xbf16>, vector<32x64xbf16>, vector<1x64xf32> -> vector<1x64xf32>
    %10 = arith.addf %4, %9 : vector<1x64xf32>
    %c0_11 = arith.constant 0 : index
    %c0_12 = arith.constant 0 : index
    %c0_13 = arith.constant 0 : index
    %11 = vector.load %arg3[%c0_11, %c0_12, %c0_13] : memref<1x1x32xbf16, #tpu.memory_space<vmem>>, vector<1x1x32xbf16>
    %12 = vector.shape_cast %11 : vector<1x1x32xbf16> to vector<1x32xbf16>
    %c2 = arith.constant 2 : index
    %c0_14 = arith.constant 0 : index
    %c0_15 = arith.constant 0 : index
    %13 = vector.load %arg4[%c2, %c0_14, %c0_15] : memref<3x32x64xbf16, #tpu.memory_space<vmem>>, vector<1x32x64xbf16>
    %14 = vector.shape_cast %13 : vector<1x32x64xbf16> to vector<32x64xbf16>
    %cst_16 = arith.constant dense<0.000000e+00> : vector<1x64xf32>
    %15 = tpu.matmul %12, %14, %cst_16 {dimension_numbers = #tpu.dot_dimension_numbers<[1], [0], [0], [1], [0, 0, 1, 1], [], []>} : vector<1x32xbf16>, vector<32x64xbf16>, vector<1x64xf32> -> vector<1x64xf32>
    %16 = arith.addf %10, %15 : vector<1x64xf32>
    %c0_17 = arith.constant 0 : index
    %c0_18 = arith.constant 0 : index
    %17 = vector.load %arg5[%c0_17, %c0_18] : memref<1x64xf32, #tpu.memory_space<vmem>>, vector<1x64xf32>
    %18 = arith.mulf %16, %17 : vector<1x64xf32>
    %c0_19 = arith.constant 0 : index
    %c0_20 = arith.constant 0 : index
    %19 = vector.load %arg6[%c0_19, %c0_20] : memref<1x64xf32, #tpu.memory_space<vmem>>, vector<1x64xf32>
    %20 = arith.addf %18, %19 : vector<1x64xf32>
    %cst_21 = arith.constant 0.000000e+00 : f32
    %21 = vector.broadcast %cst_21 : f32 to vector<1x64xf32>
    %22 = arith.maximumf %20, %21 : vector<1x64xf32>
    %23 = arith.truncf %22 : vector<1x64xf32> to vector<1x64xbf16>
    %c0_22 = arith.constant 0 : index
    %c0_23 = arith.constant 0 : index
    %c0_24 = arith.constant 0 : index
    %24 = vector.load %arg7[%c0_22, %c0_23, %c0_24] : memref<1x1x64xbf16, #tpu.memory_space<vmem>>, vector<1x1x64xbf16>
    %25 = vector.shape_cast %24 : vector<1x1x64xbf16> to vector<1x64xbf16>
    %26 = vector.shape_cast %23 : vector<1x64xbf16> to vector<1x1x64xbf16>
    tpu.vector_store %arg7[%c0_22, %c0_23, %c0_24], %26 {strides = array<i32>} : memref<1x1x64xbf16, #tpu.memory_space<vmem>>, vector<1x1x64xbf16>,
    return
  }
  func.func @transform_0(%arg0: i32) -> (i32, i32, i32) {
    %c0_i32 = arith.constant 0 : i32
    %c0_i32_0 = arith.constant 0 : i32
    %c0_i32_1 = arith.constant 0 : i32
    return %arg0, %c0_i32, %c0_i32_0 : i32, i32, i32
  }
  func.func @transform_1(%arg0: i32) -> (i32, i32, i32) {
    %c0_i32 = arith.constant 0 : i32
    %c0_i32_0 = arith.constant 0 : i32
    %c0_i32_1 = arith.constant 0 : i32
    return %arg0, %c0_i32, %c0_i32_0 : i32, i32, i32
  }
  func.func @transform_2(%arg0: i32) -> (i32, i32, i32) {
    %c0_i32 = arith.constant 0 : i32
    %c0_i32_0 = arith.constant 0 : i32
    %c0_i32_1 = arith.constant 0 : i32
    return %arg0, %c0_i32, %c0_i32_0 : i32, i32, i32
  }
  func.func @transform_3(%arg0: i32) -> (i32, i32, i32) {
    %c0_i32 = arith.constant 0 : i32
    %c0_i32_0 = arith.constant 0 : i32
    %c0_i32_1 = arith.constant 0 : i32
    %c0_i32_2 = arith.constant 0 : i32
    return %c0_i32, %c0_i32_0, %c0_i32_1 : i32, i32, i32
  }
  func.func @transform_4(%arg0: i32) -> (i32, i32) {
    %c0_i32 = arith.constant 0 : i32
    %c0_i32_0 = arith.constant 0 : i32
    %c0_i32_1 = arith.constant 0 : i32
    return %c0_i32, %c0_i32_0 : i32, i32
  }
  func.func @transform_5(%arg0: i32) -> (i32, i32) {
    %c0_i32 = arith.constant 0 : i32
    %c0_i32_0 = arith.constant 0 : i32
    %c0_i32_1 = arith.constant 0 : i32
    return %c0_i32, %c0_i32_0 : i32, i32
  }
  func.func @transform_6(%arg0: i32) -> (i32, i32, i32) {
    %c0_i32 = arith.constant 0 : i32
    %c0_i32_0 = arith.constant 0 : i32
    %c0_i32_1 = arith.constant 0 : i32
    return %arg0, %c0_i32, %c0_i32_0 : i32, i32, i32
  }
}

module attributes {stable_mosaic.version = 11 : i64} {
  func.func @_conv_bn_act_kernel(%arg0: i32, %arg1: memref<1x1x32xbf16, #tpu.memory_space<vmem>>, %arg2: memref<1x32x64xbf16, #tpu.memory_space<vmem>>, %arg3: memref<1x64xf32, #tpu.memory_space<vmem>>, %arg4: memref<1x64xf32, #tpu.memory_space<vmem>>, %arg5: memref<1x1x64xbf16, #tpu.memory_space<vmem>>) attributes {dimension_semantics = [#tpu.dimension_semantics<parallel>], iteration_bounds = array<i64: 2>, scalar_prefetch = 0 : i64, scratch_operands = 0 : i64, tpu.core_type = #tpu.core_type<tc>, window_params = [{transform_indices = @transform_0, window_bounds = array<i64: 1, 1, 32>}, {pipeline_mode = #tpu.pipeline_mode<synchronous>, transform_indices = @transform_1, window_bounds = array<i64: 1, 32, 64>}, {pipeline_mode = #tpu.pipeline_mode<synchronous>, transform_indices = @transform_2, window_bounds = array<i64: 1, 64>}, {pipeline_mode = #tpu.pipeline_mode<synchronous>, transform_indices = @transform_3, window_bounds = array<i64: 1, 64>}, {transform_indices = @transform_4, window_bounds = array<i64: 1, 1, 64>}]} {
    %c0 = arith.constant 0 : index
    %c0_0 = arith.constant 0 : index
    %c0_1 = arith.constant 0 : index
    %0 = vector.load %arg1[%c0, %c0_0, %c0_1] : memref<1x1x32xbf16, #tpu.memory_space<vmem>>, vector<1x1x32xbf16>
    %1 = vector.shape_cast %0 : vector<1x1x32xbf16> to vector<1x32xbf16>
    %c0_2 = arith.constant 0 : index
    %c0_3 = arith.constant 0 : index
    %c0_4 = arith.constant 0 : index
    %2 = vector.load %arg2[%c0_2, %c0_3, %c0_4] : memref<1x32x64xbf16, #tpu.memory_space<vmem>>, vector<1x32x64xbf16>
    %3 = vector.shape_cast %2 : vector<1x32x64xbf16> to vector<32x64xbf16>
    %cst = arith.constant dense<0.000000e+00> : vector<1x64xf32>
    %4 = tpu.matmul %1, %3, %cst {dimension_numbers = #tpu.dot_dimension_numbers<[1], [0], [0], [1], [0, 0, 1, 1], [], []>} : vector<1x32xbf16>, vector<32x64xbf16>, vector<1x64xf32> -> vector<1x64xf32>
    %c0_5 = arith.constant 0 : index
    %c0_6 = arith.constant 0 : index
    %5 = vector.load %arg3[%c0_5, %c0_6] : memref<1x64xf32, #tpu.memory_space<vmem>>, vector<1x64xf32>
    %6 = arith.mulf %4, %5 : vector<1x64xf32>
    %c0_7 = arith.constant 0 : index
    %c0_8 = arith.constant 0 : index
    %7 = vector.load %arg4[%c0_7, %c0_8] : memref<1x64xf32, #tpu.memory_space<vmem>>, vector<1x64xf32>
    %8 = arith.addf %6, %7 : vector<1x64xf32>
    %9 = arith.truncf %8 : vector<1x64xf32> to vector<1x64xbf16>
    %c0_9 = arith.constant 0 : index
    %c0_10 = arith.constant 0 : index
    %c0_11 = arith.constant 0 : index
    %10 = vector.load %arg5[%c0_9, %c0_10, %c0_11] : memref<1x1x64xbf16, #tpu.memory_space<vmem>>, vector<1x1x64xbf16>
    %11 = vector.shape_cast %10 : vector<1x1x64xbf16> to vector<1x64xbf16>
    %12 = vector.shape_cast %9 : vector<1x64xbf16> to vector<1x1x64xbf16>
    tpu.vector_store %arg5[%c0_9, %c0_10, %c0_11], %12 {strides = array<i32>} : memref<1x1x64xbf16, #tpu.memory_space<vmem>>, vector<1x1x64xbf16>,
    return
  }
  func.func @transform_0(%arg0: i32) -> (i32, i32, i32) {
    %c0_i32 = arith.constant 0 : i32
    %c0_i32_0 = arith.constant 0 : i32
    %c0_i32_1 = arith.constant 0 : i32
    return %arg0, %c0_i32, %c0_i32_0 : i32, i32, i32
  }
  func.func @transform_1(%arg0: i32) -> (i32, i32, i32) {
    %c0_i32 = arith.constant 0 : i32
    %c0_i32_0 = arith.constant 0 : i32
    %c0_i32_1 = arith.constant 0 : i32
    %c0_i32_2 = arith.constant 0 : i32
    return %c0_i32, %c0_i32_0, %c0_i32_1 : i32, i32, i32
  }
  func.func @transform_2(%arg0: i32) -> (i32, i32) {
    %c0_i32 = arith.constant 0 : i32
    %c0_i32_0 = arith.constant 0 : i32
    %c0_i32_1 = arith.constant 0 : i32
    return %c0_i32, %c0_i32_0 : i32, i32
  }
  func.func @transform_3(%arg0: i32) -> (i32, i32) {
    %c0_i32 = arith.constant 0 : i32
    %c0_i32_0 = arith.constant 0 : i32
    %c0_i32_1 = arith.constant 0 : i32
    return %c0_i32, %c0_i32_0 : i32, i32
  }
  func.func @transform_4(%arg0: i32) -> (i32, i32, i32) {
    %c0_i32 = arith.constant 0 : i32
    %c0_i32_0 = arith.constant 0 : i32
    %c0_i32_1 = arith.constant 0 : i32
    return %arg0, %c0_i32, %c0_i32_0 : i32, i32, i32
  }
}

module attributes {stable_mosaic.version = 11 : i64} {
  func.func @_conv_bn_act_kernel(%arg0: i32, %arg1: memref<1x3x64xbf16, #tpu.memory_space<vmem>>, %arg2: memref<3x64x64xbf16, #tpu.memory_space<vmem>>, %arg3: memref<1x64xf32, #tpu.memory_space<vmem>>, %arg4: memref<1x64xf32, #tpu.memory_space<vmem>>, %arg5: memref<1x1x64xbf16, #tpu.memory_space<vmem>>, %arg6: memref<1x1x64xbf16, #tpu.memory_space<vmem>>) attributes {dimension_semantics = [#tpu.dimension_semantics<parallel>], iteration_bounds = array<i64: 2>, scalar_prefetch = 0 : i64, scratch_operands = 0 : i64, tpu.core_type = #tpu.core_type<tc>, window_params = [{transform_indices = @transform_0, window_bounds = array<i64: 1, 3, 64>}, {pipeline_mode = #tpu.pipeline_mode<synchronous>, transform_indices = @transform_1, window_bounds = array<i64: 3, 64, 64>}, {pipeline_mode = #tpu.pipeline_mode<synchronous>, transform_indices = @transform_2, window_bounds = array<i64: 1, 64>}, {pipeline_mode = #tpu.pipeline_mode<synchronous>, transform_indices = @transform_3, window_bounds = array<i64: 1, 64>}, {transform_indices = @transform_4, window_bounds = array<i64: 1, 1, 64>}, {transform_indices = @transform_5, window_bounds = array<i64: 1, 1, 64>}]} {
    %c0 = arith.constant 0 : index
    %c0_0 = arith.constant 0 : index
    %c0_1 = arith.constant 0 : index
    %0 = vector.load %arg1[%c0, %c0_0, %c0_1] : memref<1x3x64xbf16, #tpu.memory_space<vmem>>, vector<1x1x64xbf16>
    %1 = vector.shape_cast %0 : vector<1x1x64xbf16> to vector<1x64xbf16>
    %c0_2 = arith.constant 0 : index
    %c0_3 = arith.constant 0 : index
    %c0_4 = arith.constant 0 : index
    %2 = vector.load %arg2[%c0_2, %c0_3, %c0_4] : memref<3x64x64xbf16, #tpu.memory_space<vmem>>, vector<1x64x64xbf16>
    %3 = vector.shape_cast %2 : vector<1x64x64xbf16> to vector<64x64xbf16>
    %cst = arith.constant dense<0.000000e+00> : vector<1x64xf32>
    %4 = tpu.matmul %1, %3, %cst {dimension_numbers = #tpu.dot_dimension_numbers<[1], [0], [0], [1], [0, 0, 1, 1], [], []>} : vector<1x64xbf16>, vector<64x64xbf16>, vector<1x64xf32> -> vector<1x64xf32>
    %c0_5 = arith.constant 0 : index
    %c1 = arith.constant 1 : index
    %c0_6 = arith.constant 0 : index
    %5 = vector.load %arg1[%c0_5, %c1, %c0_6] : memref<1x3x64xbf16, #tpu.memory_space<vmem>>, vector<1x1x64xbf16>
    %6 = vector.shape_cast %5 : vector<1x1x64xbf16> to vector<1x64xbf16>
    %c1_7 = arith.constant 1 : index
    %c0_8 = arith.constant 0 : index
    %c0_9 = arith.constant 0 : index
    %7 = vector.load %arg2[%c1_7, %c0_8, %c0_9] : memref<3x64x64xbf16, #tpu.memory_space<vmem>>, vector<1x64x64xbf16>
    %8 = vector.shape_cast %7 : vector<1x64x64xbf16> to vector<64x64xbf16>
    %cst_10 = arith.constant dense<0.000000e+00> : vector<1x64xf32>
    %9 = tpu.matmul %6, %8, %cst_10 {dimension_numbers = #tpu.dot_dimension_numbers<[1], [0], [0], [1], [0, 0, 1, 1], [], []>} : vector<1x64xbf16>, vector<64x64xbf16>, vector<1x64xf32> -> vector<1x64xf32>
    %10 = arith.addf %4, %9 : vector<1x64xf32>
    %c0_11 = arith.constant 0 : index
    %c2 = arith.constant 2 : index
    %c0_12 = arith.constant 0 : index
    %11 = vector.load %arg1[%c0_11, %c2, %c0_12] : memref<1x3x64xbf16, #tpu.memory_space<vmem>>, vector<1x1x64xbf16>
    %12 = vector.shape_cast %11 : vector<1x1x64xbf16> to vector<1x64xbf16>
    %c2_13 = arith.constant 2 : index
    %c0_14 = arith.constant 0 : index
    %c0_15 = arith.constant 0 : index
    %13 = vector.load %arg2[%c2_13, %c0_14, %c0_15] : memref<3x64x64xbf16, #tpu.memory_space<vmem>>, vector<1x64x64xbf16>
    %14 = vector.shape_cast %13 : vector<1x64x64xbf16> to vector<64x64xbf16>
    %cst_16 = arith.constant dense<0.000000e+00> : vector<1x64xf32>
    %15 = tpu.matmul %12, %14, %cst_16 {dimension_numbers = #tpu.dot_dimension_numbers<[1], [0], [0], [1], [0, 0, 1, 1], [], []>} : vector<1x64xbf16>, vector<64x64xbf16>, vector<1x64xf32> -> vector<1x64xf32>
    %16 = arith.addf %10, %15 : vector<1x64xf32>
    %c0_17 = arith.constant 0 : index
    %c0_18 = arith.constant 0 : index
    %17 = vector.load %arg3[%c0_17, %c0_18] : memref<1x64xf32, #tpu.memory_space<vmem>>, vector<1x64xf32>
    %18 = arith.mulf %16, %17 : vector<1x64xf32>
    %c0_19 = arith.constant 0 : index
    %c0_20 = arith.constant 0 : index
    %19 = vector.load %arg4[%c0_19, %c0_20] : memref<1x64xf32, #tpu.memory_space<vmem>>, vector<1x64xf32>
    %20 = arith.addf %18, %19 : vector<1x64xf32>
    %cst_21 = arith.constant 0.000000e+00 : f32
    %21 = vector.broadcast %cst_21 : f32 to vector<1x64xf32>
    %22 = arith.maximumf %20, %21 : vector<1x64xf32>
    %c0_22 = arith.constant 0 : index
    %c0_23 = arith.constant 0 : index
    %c0_24 = arith.constant 0 : index
    %23 = vector.load %arg5[%c0_22, %c0_23, %c0_24] : memref<1x1x64xbf16, #tpu.memory_space<vmem>>, vector<1x1x64xbf16>
    %24 = vector.shape_cast %23 : vector<1x1x64xbf16> to vector<1x64xbf16>
    %25 = arith.extf %24 : vector<1x64xbf16> to vector<1x64xf32>
    %26 = arith.addf %22, %25 : vector<1x64xf32>
    %cst_25 = arith.constant 0.000000e+00 : f32
    %27 = vector.broadcast %cst_25 : f32 to vector<1x64xf32>
    %28 = arith.maximumf %26, %27 : vector<1x64xf32>
    %29 = arith.truncf %28 : vector<1x64xf32> to vector<1x64xbf16>
    %c0_26 = arith.constant 0 : index
    %c0_27 = arith.constant 0 : index
    %c0_28 = arith.constant 0 : index
    %30 = vector.load %arg6[%c0_26, %c0_27, %c0_28] : memref<1x1x64xbf16, #tpu.memory_space<vmem>>, vector<1x1x64xbf16>
    %31 = vector.shape_cast %30 : vector<1x1x64xbf16> to vector<1x64xbf16>
    %32 = vector.shape_cast %29 : vector<1x64xbf16> to vector<1x1x64xbf16>
    tpu.vector_store %arg6[%c0_26, %c0_27, %c0_28], %32 {strides = array<i32>} : memref<1x1x64xbf16, #tpu.memory_space<vmem>>, vector<1x1x64xbf16>,
    return
  }
  func.func @transform_0(%arg0: i32) -> (i32, i32, i32) {
    %c0_i32 = arith.constant 0 : i32
    %c0_i32_0 = arith.constant 0 : i32
    %c0_i32_1 = arith.constant 0 : i32
    return %arg0, %c0_i32, %c0_i32_0 : i32, i32, i32
  }
  func.func @transform_1(%arg0: i32) -> (i32, i32, i32) {
    %c0_i32 = arith.constant 0 : i32
    %c0_i32_0 = arith.constant 0 : i32
    %c0_i32_1 = arith.constant 0 : i32
    %c0_i32_2 = arith.constant 0 : i32
    return %c0_i32, %c0_i32_0, %c0_i32_1 : i32, i32, i32
  }
  func.func @transform_2(%arg0: i32) -> (i32, i32) {
    %c0_i32 = arith.constant 0 : i32
    %c0_i32_0 = arith.constant 0 : i32
    %c0_i32_1 = arith.constant 0 : i32
    return %c0_i32, %c0_i32_0 : i32, i32
  }
  func.func @transform_3(%arg0: i32) -> (i32, i32) {
    %c0_i32 = arith.constant 0 : i32
    %c0_i32_0 = arith.constant 0 : i32
    %c0_i32_1 = arith.constant 0 : i32
    return %c0_i32, %c0_i32_0 : i32, i32
  }
  func.func @transform_4(%arg0: i32) -> (i32, i32, i32) {
    %c0_i32 = arith.constant 0 : i32
    %c0_i32_0 = arith.constant 0 : i32
    %c0_i32_1 = arith.constant 0 : i32
    return %arg0, %c0_i32, %c0_i32_0 : i32, i32, i32
  }
  func.func @transform_5(%arg0: i32) -> (i32, i32, i32) {
    %c0_i32 = arith.constant 0 : i32
    %c0_i32_0 = arith.constant 0 : i32
    %c0_i32_1 = arith.constant 0 : i32
    return %arg0, %c0_i32, %c0_i32_0 : i32, i32, i32
  }
}

module attributes {stable_mosaic.version = 11 : i64} {
  func.func @_conv_bn_act_kernel(%arg0: i32, %arg1: memref<1x3x64xbf16, #tpu.memory_space<vmem>>, %arg2: memref<3x64x64xbf16, #tpu.memory_space<vmem>>, %arg3: memref<1x64xf32, #tpu.memory_space<vmem>>, %arg4: memref<1x64xf32, #tpu.memory_space<vmem>>, %arg5: memref<1x1x64xbf16, #tpu.memory_space<vmem>>) attributes {dimension_semantics = [#tpu.dimension_semantics<parallel>], iteration_bounds = array<i64: 2>, scalar_prefetch = 0 : i64, scratch_operands = 0 : i64, tpu.core_type = #tpu.core_type<tc>, window_params = [{transform_indices = @transform_0, window_bounds = array<i64: 1, 3, 64>}, {pipeline_mode = #tpu.pipeline_mode<synchronous>, transform_indices = @transform_1, window_bounds = array<i64: 3, 64, 64>}, {pipeline_mode = #tpu.pipeline_mode<synchronous>, transform_indices = @transform_2, window_bounds = array<i64: 1, 64>}, {pipeline_mode = #tpu.pipeline_mode<synchronous>, transform_indices = @transform_3, window_bounds = array<i64: 1, 64>}, {transform_indices = @transform_4, window_bounds = array<i64: 1, 1, 64>}]} {
    %c0 = arith.constant 0 : index
    %c0_0 = arith.constant 0 : index
    %c0_1 = arith.constant 0 : index
    %0 = vector.load %arg1[%c0, %c0_0, %c0_1] : memref<1x3x64xbf16, #tpu.memory_space<vmem>>, vector<1x1x64xbf16>
    %1 = vector.shape_cast %0 : vector<1x1x64xbf16> to vector<1x64xbf16>
    %c0_2 = arith.constant 0 : index
    %c0_3 = arith.constant 0 : index
    %c0_4 = arith.constant 0 : index
    %2 = vector.load %arg2[%c0_2, %c0_3, %c0_4] : memref<3x64x64xbf16, #tpu.memory_space<vmem>>, vector<1x64x64xbf16>
    %3 = vector.shape_cast %2 : vector<1x64x64xbf16> to vector<64x64xbf16>
    %cst = arith.constant dense<0.000000e+00> : vector<1x64xf32>
    %4 = tpu.matmul %1, %3, %cst {dimension_numbers = #tpu.dot_dimension_numbers<[1], [0], [0], [1], [0, 0, 1, 1], [], []>} : vector<1x64xbf16>, vector<64x64xbf16>, vector<1x64xf32> -> vector<1x64xf32>
    %c0_5 = arith.constant 0 : index
    %c1 = arith.constant 1 : index
    %c0_6 = arith.constant 0 : index
    %5 = vector.load %arg1[%c0_5, %c1, %c0_6] : memref<1x3x64xbf16, #tpu.memory_space<vmem>>, vector<1x1x64xbf16>
    %6 = vector.shape_cast %5 : vector<1x1x64xbf16> to vector<1x64xbf16>
    %c1_7 = arith.constant 1 : index
    %c0_8 = arith.constant 0 : index
    %c0_9 = arith.constant 0 : index
    %7 = vector.load %arg2[%c1_7, %c0_8, %c0_9] : memref<3x64x64xbf16, #tpu.memory_space<vmem>>, vector<1x64x64xbf16>
    %8 = vector.shape_cast %7 : vector<1x64x64xbf16> to vector<64x64xbf16>
    %cst_10 = arith.constant dense<0.000000e+00> : vector<1x64xf32>
    %9 = tpu.matmul %6, %8, %cst_10 {dimension_numbers = #tpu.dot_dimension_numbers<[1], [0], [0], [1], [0, 0, 1, 1], [], []>} : vector<1x64xbf16>, vector<64x64xbf16>, vector<1x64xf32> -> vector<1x64xf32>
    %10 = arith.addf %4, %9 : vector<1x64xf32>
    %c0_11 = arith.constant 0 : index
    %c2 = arith.constant 2 : index
    %c0_12 = arith.constant 0 : index
    %11 = vector.load %arg1[%c0_11, %c2, %c0_12] : memref<1x3x64xbf16, #tpu.memory_space<vmem>>, vector<1x1x64xbf16>
    %12 = vector.shape_cast %11 : vector<1x1x64xbf16> to vector<1x64xbf16>
    %c2_13 = arith.constant 2 : index
    %c0_14 = arith.constant 0 : index
    %c0_15 = arith.constant 0 : index
    %13 = vector.load %arg2[%c2_13, %c0_14, %c0_15] : memref<3x64x64xbf16, #tpu.memory_space<vmem>>, vector<1x64x64xbf16>
    %14 = vector.shape_cast %13 : vector<1x64x64xbf16> to vector<64x64xbf16>
    %cst_16 = arith.constant dense<0.000000e+00> : vector<1x64xf32>
    %15 = tpu.matmul %12, %14, %cst_16 {dimension_numbers = #tpu.dot_dimension_numbers<[1], [0], [0], [1], [0, 0, 1, 1], [], []>} : vector<1x64xbf16>, vector<64x64xbf16>, vector<1x64xf32> -> vector<1x64xf32>
    %16 = arith.addf %10, %15 : vector<1x64xf32>
    %c0_17 = arith.constant 0 : index
    %c0_18 = arith.constant 0 : index
    %17 = vector.load %arg3[%c0_17, %c0_18] : memref<1x64xf32, #tpu.memory_space<vmem>>, vector<1x64xf32>
    %18 = arith.mulf %16, %17 : vector<1x64xf32>
    %c0_19 = arith.constant 0 : index
    %c0_20 = arith.constant 0 : index
    %19 = vector.load %arg4[%c0_19, %c0_20] : memref<1x64xf32, #tpu.memory_space<vmem>>, vector<1x64xf32>
    %20 = arith.addf %18, %19 : vector<1x64xf32>
    %cst_21 = arith.constant 0.000000e+00 : f32
    %21 = vector.broadcast %cst_21 : f32 to vector<1x64xf32>
    %22 = arith.maximumf %20, %21 : vector<1x64xf32>
    %23 = arith.truncf %22 : vector<1x64xf32> to vector<1x64xbf16>
    %c0_22 = arith.constant 0 : index
    %c0_23 = arith.constant 0 : index
    %c0_24 = arith.constant 0 : index
    %24 = vector.load %arg5[%c0_22, %c0_23, %c0_24] : memref<1x1x64xbf16, #tpu.memory_space<vmem>>, vector<1x1x64xbf16>
    %25 = vector.shape_cast %24 : vector<1x1x64xbf16> to vector<1x64xbf16>
    %26 = vector.shape_cast %23 : vector<1x64xbf16> to vector<1x1x64xbf16>
    tpu.vector_store %arg5[%c0_22, %c0_23, %c0_24], %26 {strides = array<i32>} : memref<1x1x64xbf16, #tpu.memory_space<vmem>>, vector<1x1x64xbf16>,
    return
  }
  func.func @transform_0(%arg0: i32) -> (i32, i32, i32) {
    %c0_i32 = arith.constant 0 : i32
    %c0_i32_0 = arith.constant 0 : i32
    %c0_i32_1 = arith.constant 0 : i32
    return %arg0, %c0_i32, %c0_i32_0 : i32, i32, i32
  }
  func.func @transform_1(%arg0: i32) -> (i32, i32, i32) {
    %c0_i32 = arith.constant 0 : i32
    %c0_i32_0 = arith.constant 0 : i32
    %c0_i32_1 = arith.constant 0 : i32
    %c0_i32_2 = arith.constant 0 : i32
    return %c0_i32, %c0_i32_0, %c0_i32_1 : i32, i32, i32
  }
  func.func @transform_2(%arg0: i32) -> (i32, i32) {
    %c0_i32 = arith.constant 0 : i32
    %c0_i32_0 = arith.constant 0 : i32
    %c0_i32_1 = arith.constant 0 : i32
    return %c0_i32, %c0_i32_0 : i32, i32
  }
  func.func @transform_3(%arg0: i32) -> (i32, i32) {
    %c0_i32 = arith.constant 0 : i32
    %c0_i32_0 = arith.constant 0 : i32
    %c0_i32_1 = arith.constant 0 : i32
    return %c0_i32, %c0_i32_0 : i32, i32
  }
  func.func @transform_4(%arg0: i32) -> (i32, i32, i32) {
    %c0_i32 = arith.constant 0 : i32
    %c0_i32_0 = arith.constant 0 : i32
    %c0_i32_1 = arith.constant 0 : i32
    return %arg0, %c0_i32, %c0_i32_0 : i32, i32, i32
  }
}

module attributes {stable_mosaic.version = 11 : i64} {
  func.func @_linear_kernel(%arg0: i32, %arg1: memref<2x64xbf16, #tpu.memory_space<vmem>>, %arg2: memref<64x32xbf16, #tpu.memory_space<vmem>>, %arg3: memref<1x32xf32, #tpu.memory_space<vmem>>, %arg4: memref<2x32xf32, #tpu.memory_space<vmem>>) attributes {dimension_semantics = [#tpu.dimension_semantics<arbitrary>], iteration_bounds = array<i64: 1>, scalar_prefetch = 0 : i64, scratch_operands = 0 : i64, tpu.core_type = #tpu.core_type<tc>, window_params = [{pipeline_mode = #tpu.pipeline_mode<synchronous>, transform_indices = @transform_0, window_bounds = array<i64: 2, 64>}, {pipeline_mode = #tpu.pipeline_mode<synchronous>, transform_indices = @transform_1, window_bounds = array<i64: 64, 32>}, {pipeline_mode = #tpu.pipeline_mode<synchronous>, transform_indices = @transform_2, window_bounds = array<i64: 1, 32>}, {pipeline_mode = #tpu.pipeline_mode<synchronous>, transform_indices = @transform_3, window_bounds = array<i64: 2, 32>}]} {
    %c0 = arith.constant 0 : index
    %c0_0 = arith.constant 0 : index
    %0 = vector.load %arg1[%c0, %c0_0] : memref<2x64xbf16, #tpu.memory_space<vmem>>, vector<2x64xbf16>
    %c0_1 = arith.constant 0 : index
    %c0_2 = arith.constant 0 : index
    %1 = vector.load %arg2[%c0_1, %c0_2] : memref<64x32xbf16, #tpu.memory_space<vmem>>, vector<64x32xbf16>
    %cst = arith.constant dense<0.000000e+00> : vector<2x32xf32>
    %2 = tpu.matmul %0, %1, %cst {dimension_numbers = #tpu.dot_dimension_numbers<[1], [0], [0], [1], [0, 0, 1, 1], [], []>} : vector<2x64xbf16>, vector<64x32xbf16>, vector<2x32xf32> -> vector<2x32xf32>
    %c0_3 = arith.constant 0 : index
    %c0_4 = arith.constant 0 : index
    %3 = vector.load %arg3[%c0_3, %c0_4] : memref<1x32xf32, #tpu.memory_space<vmem>>, vector<1x32xf32>
    %4 = vector.broadcast %3 : vector<1x32xf32> to vector<2x32xf32>
    %5 = arith.addf %2, %4 : vector<2x32xf32>
    %c0_5 = arith.constant 0 : index
    %c0_6 = arith.constant 0 : index
    %6 = vector.load %arg4[%c0_5, %c0_6] : memref<2x32xf32, #tpu.memory_space<vmem>>, vector<2x32xf32>
    tpu.vector_store %arg4[%c0_5, %c0_6], %5 {strides = array<i32>} : memref<2x32xf32, #tpu.memory_space<vmem>>, vector<2x32xf32>,
    return
  }
  func.func @transform_0(%arg0: i32) -> (i32, i32) {
    %c0_i32 = arith.constant 0 : i32
    %c0_i32_0 = arith.constant 0 : i32
    %c0_i32_1 = arith.constant 0 : i32
    return %c0_i32, %c0_i32_0 : i32, i32
  }
  func.func @transform_1(%arg0: i32) -> (i32, i32) {
    %c0_i32 = arith.constant 0 : i32
    %c0_i32_0 = arith.constant 0 : i32
    %c0_i32_1 = arith.constant 0 : i32
    return %c0_i32, %c0_i32_0 : i32, i32
  }
  func.func @transform_2(%arg0: i32) -> (i32, i32) {
    %c0_i32 = arith.constant 0 : i32
    %c0_i32_0 = arith.constant 0 : i32
    %c0_i32_1 = arith.constant 0 : i32
    return %c0_i32, %c0_i32_0 : i32, i32
  }
  func.func @transform_3(%arg0: i32) -> (i32, i32) {
    %c0_i32 = arith.constant 0 : i32
    %c0_i32_0 = arith.constant 0 : i32
    %c0_i32_1 = arith.constant 0 : i32
    return %c0_i32, %c0_i32_0 : i32, i32
  }
}

</mosaic_0001>

<bundles_post_ra>
// kernel: _lambda_.24
= control target key start
LH: loop header
LB: loop body
LE: loop exit
PB: predicated region body
PF: predicated region fallthrough
CT: control target
= control target key end

     0   :  { %s265_s6 = smov 0   ;;  %s296_s0 = inlined_call_operand.vmem [shape: bf16[2,18,256], index: 0, kind: input, shape index: {}]   ;;  %s297_s1 = inlined_call_operand.vmem [shape: bf16[2,16,256], index: 1, kind: output, shape index: {}]  }
   0x1 LB: > { %s226_s7 = sadd.s32 4294967295, %s253_s6   ;;  %p230_p0 = scmp.ge.s32.totalorder %s253_s6, 1  ;;  %s253_s6 = sphi %s265_s6, %s11_s6  }
   0x2   : > { %p87_p1 = scmp.lt.s32.totalorder %s253_s6, 3 }
   0x4   : > { %p88_p2 = pnand %p230_p0, %p87_p1 }
   0x5   : > { %p107_p3 = scmp.lt.s32.totalorder (!%p88_p2), %s226_s7, 1  ;;  %vm121_vm0 = vsmask.f32 (!%p88_p2), 3328  ;;  %vm122_vm1 = vsmask.f32 (!%p88_p2), 7440  ;;  %vm155_vm2 = vcmask (!%p88_p2), 1042432  }
   0x6   : > { %91 = sbr.rel (%p88_p2) target bundleno = 33 (0x21), region = 24  ;;  %vm156_vm3 = vcmask (!%p88_p2), 1046532   ;;  %vm281_vm4 = vmor (!%p88_p2), %vm121_vm0, %vm122_vm1 }
   0x7   : > { %vm157_vm5 = vmor (!%p88_p2), %vm155_vm2, %vm156_vm3 }
   0xd   : > { %s301_s7 = smov (!%p107_p3, %s226_s7), 1 }
   0xe   : > { %s238_s8 = smul.u32 24, %s301_s7  ;;  %s237_s12 = sshll.u32 %s301_s7, 4 }
   0xf   : > { %s116_s15 = scalar_lea.vmem %s297_s1, %s237_s12 }
  0x10   : > { %s111_s11 = scalar_lea.vmem %s296_s0, %s238_s8 }
  0x11   : > { %v117_v0 = vld [vmem:[%s111_s11] sm:$0xff]  ;;  %v118_v1 = vld [vmem:[%s111_s11 + $0x8] sm:$0xff]  ;;  %v119_v5 = vld [vmem:[%s111_s11 + $0x10] sm:$0x11] }
  0x12   : > { %v125_v2 = vshrl.u32 %v117_v0, 16  ;;  %v128_v3 = vshll.u32 %v117_v0, 16  ;;  %v134_v4 = vshll.u32 %v118_v1, 16  ;;  %v120_v6 = vld [vmem:[%s111_s11] sm:$0xee]  ;;  %v160_v7 = vrot.slane %v118_v1, 5 }
  0x13   : > { %v138_v8 = vshrl.u32 %v118_v1, 16  ;;  %v144_v9 = vshll.u32 %v119_v5, 16  ;;  %v234_v16 = vrot.slane %v120_v6, 9  ;;  %v163_v20 = vrot.slane %v119_v5, 5 }
  0x14   : > { %v127_v10 = vrot.slane %v125_v2, 4  ;;  %v130_v11 = vrot.slane %v128_v3, 5  ;;  %v136_v12 = vrot.slane %v134_v4, 5  ;;  %v162_v19 = vrot.slane %v160_v7, 4 }
  0x15   : > { %v140_v13 = vrot.slane %v138_v8, 4  ;;  %v146_v18 = vrot.slane %v144_v9, 5  ;;  %v161_v24 = vsel %vm157_vm5, %v234_v16, %v160_v7 }
  0x16   : > { %v131_v15 = vor.u32 %v130_v11, %v127_v10  ;;  %v164_v27 = vsel %vm157_vm5, %v162_v19, %v163_v20 }
  0x17   : > { %v141_v17 = vor.u32 %v140_v13, %v136_v12 }
  0x18   : > { %v132_v21 = vrot.slane %v131_v15, 4 }
  0x19   : > { %v142_v22 = vrot.slane %v141_v17, 4 }
  0x1a   : > { %v137_v23 = vsel %vm281_vm4, %v132_v21, %v136_v12 }
  0x1b   : > { %v150_v25 = vmax.bf16 %v137_v23, %v117_v0  ;;  %v147_v26 = vsel %vm281_vm4, %v142_v22, %v146_v18 }
  0x1c   : > { %v151_v28 = vmax.bf16 %v147_v26, %v118_v1 }
  0x1d   : > { %v167_v29 = vmax.bf16 %v161_v24, %v150_v25 }
  0x1e   : > { %v168_v30 = vmax.bf16 %v164_v27, %v151_v28 }
  0x1f   : > { %169 = vst [vmem:[%s116_s15] sm:$0xff] %v167_v29 }
  0x20   : > { %170 = vst [vmem:[%s116_s15 + $0x8] sm:$0xff] %v168_v30 }
  0x21 PF: > { %s11_s6 = sadd.s32 1, %s253_s6  }
  0x22   : > { %p8_p4 = scmp.ge.s32.totalorder %s11_s6, 4  }
  0x24   :  { %10 = sbr.rel (!%p8_p4) target bundleno = 1 (0x1), region = 54 }

// kernel: _lambda_.26
= control target key start
LH: loop header
LB: loop body
LE: loop exit
PB: predicated region body
PF: predicated region fallthrough
CT: control target
= control target key end

     0   :  { %s556_s15 = smov 0   ;;  %s631_s0 = inlined_call_operand.vmem [shape: bf16[2,8,256], index: 0, kind: input, shape index: {}]   ;;  %s632_s1 = inlined_call_operand.vmem [shape: bf16[1,256,128], index: 1, kind: input, shape index: {}]   ;;  %s633_s2 = inlined_call_operand.vmem [shape: f32[1,128], index: 2, kind: input, shape index: {}]   ;;  %s634_s3 = inlined_call_operand.vmem [shape: f32[1,128], index: 3, kind: input, shape index: {}]   ;;  %s635_s4 = inlined_call_operand.vmem [shape: bf16[2,8,128], index: 4, kind: output, shape index: {}]  }
   0x1 LB: > { %s444_s16 = sadd.s32 4294967295, %s529_s15   ;;  %p448_p0 = scmp.ge.s32.totalorder %s529_s15, 1  ;;  %s529_s15 = sphi %s556_s15, %s14_s15  }
   0x2   : > { %p162_p1 = scmp.lt.s32.totalorder %s529_s15, 3 }
   0x4   : > { %p163_p2 = pnand %p448_p0, %p162_p1 }
   0x5   : > { %v505_v0 = vld [vmem:[%s632_s1 + $0x40] sm:$0xff] (!%p163_p2)   ;;  %v507_v2 = vld [vmem:[%s632_s1 + $0x48] sm:$0xff] (!%p163_p2)   ;;  %p187_p3 = scmp.lt.s32.totalorder (!%p163_p2), %s444_s16, 1  ;;  %v509_v4 = vld [vmem:[%s632_s1 + $0x50] sm:$0xff] (!%p163_p2)  }
   0x6   : > { %166 = sbr.rel (%p163_p2) target bundleno = 260 (0x104), region = 36  ;;  %v506_v1 = vld [vmem:[%s632_s1] sm:$0xff] (!%p163_p2)   ;;  %475 = vmatprep.subr.bf16.mxu0 (!%p163_p2), %v505_v0  ;;  %v508_v3 = vld [vmem:[%s632_s1 + $0x8] sm:$0xff] (!%p163_p2)   ;;  %v510_v5 = vld [vmem:[%s632_s1 + $0x10] sm:$0xff] (!%p163_p2)  }
   0x7   : > { %476 = vmatpush3.bf16.msra.mxu0 (!%p163_p2), %v506_v1  ;;  %v511_v6 = vld [vmem:[%s632_s1 + $0x58] sm:$0xff] (!%p163_p2)   ;;  %v513_v8 = vld [vmem:[%s632_s1 + $0x60] sm:$0xff] (!%p163_p2)   ;;  %v515_v10 = vld [vmem:[%s632_s1 + $0x68] sm:$0xff] (!%p163_p2)  }
   0x8   : > { %477 = vmatprep.subr.bf16.mxu0 (!%p163_p2), %v507_v2  ;;  %v512_v7 = vld [vmem:[%s632_s1 + $0x18] sm:$0xff] (!%p163_p2)   ;;  %v514_v9 = vld [vmem:[%s632_s1 + $0x20] sm:$0xff] (!%p163_p2)   ;;  %v516_v13 = vld [vmem:[%s632_s1 + $0x28] sm:$0xff] (!%p163_p2)  }
   0x9   : > { %v517_v14 = vld [vmem:[%s632_s1 + $0x70] sm:$0xff] (!%p163_p2)   ;;  %v519_v16 = vld [vmem:[%s632_s1 + $0x78] sm:$0xff] (!%p163_p2)   ;;  %v470_v21 = vld [vmem:[%s633_s2] ss:$0 sm:$0xff] (!%p163_p2) }
   0xa   : > { %v518_v15 = vld [vmem:[%s632_s1 + $0x30] sm:$0xff] (!%p163_p2)   ;;  %v520_v17 = vld [vmem:[%s632_s1 + $0x38] sm:$0xff] (!%p163_p2)   ;;  %v471_v24 = vld [vmem:[%s634_s3] ss:$0 sm:$0xff] (!%p163_p2) }
   0xb   : > { %478 = vmatpush3.bf16.msra.mxu0 (!%p163_p2), %v508_v3 }
   0xc   : > { %479 = vmatprep.subr.bf16.mxu0 (!%p163_p2), %v509_v4 }
   0xd   : > { %s637_s16 = smov (!%p187_p3, %s444_s16), 1 }
   0xe   : > { %s474_s5 = sshll.u32 %s637_s16, 3  ;;  %s451_s7 = sshll.u32 %s637_s16, 2 }
   0xf   : > { %480 = vmatpush3.bf16.msra.mxu0 %v510_v5  ;;  %s191_s12 = scalar_lea.vmem %s631_s0, %s474_s5  ;;  %s195_s10 = scalar_lea.vmem %s635_s4, %s451_s7 }
  0x10   : > { %481 = vmatprep.subr.bf16.mxu0 %v511_v6  ;;  %v197_v11 = vld [vmem:[%s191_s12] sm:$0xff] }
  0x11   : > { %v453_v12 = vcombine.high %v197_v11, %v197_v11  ;;  %v452_v18 = vcombine.low %v197_v11, %v197_v11 }
  0x13   : > { %482 = vmatpush3.bf16.msra.mxu0 %v512_v7  ;;  %365 = vmatprep.mubr.bf16.mxu0 %v453_v12 }
  0x14   : > { %483 = vmatprep.subr.bf16.mxu0 %v513_v8 }
  0x17   : > { %484 = vmatpush3.bf16.msra.mxu0 %v514_v9 }
  0x18   : > { %485 = vmatprep.subr.bf16.mxu0 %v515_v10 }
  0x1b   : > { %486 = vmatpush3.bf16.msra.mxu0 %v516_v13 }
  0x1c   : > { %487 = vmatprep.subr.bf16.mxu0 %v517_v14 }
  0x1f   : > { %488 = vmatpush3.bf16.msra.mxu0 %v518_v15 }
  0x20   : > { %489 = vmatprep.subr.bf16.mxu0 %v519_v16 }
  0x23   : > { %490 = vmatpush3.bf16.msra.mxu0 %v520_v17 }
  0x26   : > { %366 = vmatmul.mubr.bf16.vlgmr.msra.gmra.mrb[0].mxu0 %v452_v18 }
  0xf9   : > { %v491_v19 = vpop.f32.mrb[0].mxu0 }
  0xfa   : > { %v492_v20 = vpop.f32.mrb[1].mxu0 }
  0xfb   : > { %v493_v22 = vadd.f32 %v492_v20, %v491_v19  ;;  %v494_v23 = vpop.f32.mrb[2].mxu0 }
  0xfc   : > { %v495_v25 = vpop.f32.mrb[3].mxu0 }
  0xfd   : > { %v380_v26 = vmul.f32 %v493_v22, %v470_v21 }
  0xff   : > { %v388_v27 = vadd.f32 %v471_v24, %v380_v26 }
 0x101   : > { %v389_v28 = vpack.c.bf16 %v388_v27, %v388_v27 }
 0x103   : > { %390 = vst [vmem:[%s195_s10] sm:$0xf] %v389_v28 }
 0x104 PF: > { %s14_s15 = sadd.s32 1, %s529_s15  }
 0x105   : > { %p11_p4 = scmp.ge.s32.totalorder %s14_s15, 4  }
 0x107   :  { %13 = sbr.rel (!%p11_p4) target bundleno = 1 (0x1), region = 66 }

// kernel: _lambda_.25
= control target key start
LH: loop header
LB: loop body
LE: loop exit
PB: predicated region body
PF: predicated region fallthrough
CT: control target
= control target key end

     0   :  { %s1226_s21 = smov 0   ;;  %s1412_s0 = inlined_call_operand.vmem [shape: bf16[2,8,256], index: 0, kind: input, shape index: {}]   ;;  %s1413_s1 = inlined_call_operand.vmem [shape: bf16[2,8,256], index: 1, kind: input, shape index: {}]   ;;  %s1414_s2 = inlined_call_operand.vmem [shape: bf16[2,8,256], index: 2, kind: input, shape index: {}]   ;;  %s1415_s3 = inlined_call_operand.vmem [shape: bf16[3,256,128], index: 3, kind: input, shape index: {}]   ;;  %s1416_s4 = inlined_call_operand.vmem [shape: f32[1,128], index: 4, kind: input, shape index: {}]   ;;  %s1417_s5 = inlined_call_operand.vmem [shape: f32[1,128], index: 5, kind: input, shape index: {}]   ;;  %s1418_s6 = inlined_call_operand.vmem [shape: bf16[2,8,128], index: 6, kind: output, shape index: {}]  }
   0x1 LB: > { %s918_s22 = sadd.s32 4294967295, %s1189_s21   ;;  %p922_p0 = scmp.ge.s32.totalorder %s1189_s21, 1  ;;  %s1189_s21 = sphi %s1226_s21, %s16_s21  }
   0x2   : > { %p232_p1 = scmp.lt.s32.totalorder %s1189_s21, 3 }
   0x4   : > { %p233_p2 = pnand %p922_p0, %p232_p1 }
   0x5   : > { %v1129_v0 = vld [vmem:[%s1415_s3 + $0xc0] sm:$0xff] (!%p233_p2)   ;;  %v1133_v4 = vld [vmem:[%s1415_s3 + $0xc8] sm:$0xff] (!%p233_p2)   ;;  %v1137_v8 = vld [vmem:[%s1415_s3 + $0xd0] sm:$0xff] (!%p233_p2)   ;;  %p271_p3 = scmp.lt.s32.totalorder (!%p233_p2), %s918_s22, 1 }
   0x6   : > { %236 = sbr.rel (%p233_p2) target bundleno = 297 (0x129), region = 44  ;;  %v1130_v1 = vld [vmem:[%s1415_s3 + $0x40] sm:$0xff] (!%p233_p2)   ;;  %1055 = vmatprep.subr.bf16.mxu0 (!%p233_p2), %v1129_v0  ;;  %v1134_v5 = vld [vmem:[%s1415_s3 + $0x48] sm:$0xff] (!%p233_p2)   ;;  %v1138_v9 = vld [vmem:[%s1415_s3 + $0x50] sm:$0xff] (!%p233_p2)  }
   0x7   : > { %v1131_v2 = vld [vmem:[%s1415_s3 + $0x80] sm:$0xff] (!%p233_p2)   ;;  %1077 = vmatprep.subr.bf16.mxu1 (!%p233_p2), %v1130_v1  ;;  %v1135_v6 = vld [vmem:[%s1415_s3 + $0x88] sm:$0xff] (!%p233_p2)   ;;  %v1139_v10 = vld [vmem:[%s1415_s3 + $0x90] sm:$0xff] (!%p233_p2)  }
   0x8   : > { %v1132_v3 = vld [vmem:[%s1415_s3] sm:$0xff] (!%p233_p2)   ;;  %1056 = vmatpush3.bf16.msra.mxu0 (!%p233_p2), %v1131_v2  ;;  %v1136_v7 = vld [vmem:[%s1415_s3 + $0x8] sm:$0xff] (!%p233_p2)   ;;  %v1140_v11 = vld [vmem:[%s1415_s3 + $0x10] sm:$0xff] (!%p233_p2)  }
   0x9   : > { %1078 = vmatpush3.bf16.msra.mxu1 (!%p233_p2), %v1132_v3  ;;  %1057 = vmatprep.subr.bf16.mxu0 (!%p233_p2), %v1133_v4  ;;  %v1141_v12 = vld [vmem:[%s1415_s3 + $0xd8] sm:$0xff] (!%p233_p2)   ;;  %v1145_v16 = vld [vmem:[%s1415_s3 + $0xe0] sm:$0xff] (!%p233_p2)   ;;  %v1149_v20 = vld [vmem:[%s1415_s3 + $0xe8] sm:$0xff] (!%p233_p2)  }
   0xa   : > { %1079 = vmatprep.subr.bf16.mxu1 (!%p233_p2), %v1134_v5  ;;  %v1142_v13 = vld [vmem:[%s1415_s3 + $0x58] sm:$0xff] (!%p233_p2)   ;;  %v1146_v17 = vld [vmem:[%s1415_s3 + $0x60] sm:$0xff] (!%p233_p2)   ;;  %v1150_v21 = vld [vmem:[%s1415_s3 + $0x68] sm:$0xff] (!%p233_p2)  }
   0xb   : > { %v1143_v14 = vld [vmem:[%s1415_s3 + $0x98] sm:$0xff] (!%p233_p2)   ;;  %v1147_v18 = vld [vmem:[%s1415_s3 + $0xa0] sm:$0xff] (!%p233_p2)   ;;  %v1151_v22 = vld [vmem:[%s1415_s3 + $0xa8] sm:$0xff] (!%p233_p2)  }
   0xc   : > { %1058 = vmatpush3.bf16.msra.mxu0 (!%p233_p2), %v1135_v6  ;;  %v1144_v15 = vld [vmem:[%s1415_s3 + $0x18] sm:$0xff] (!%p233_p2)   ;;  %v1148_v19 = vld [vmem:[%s1415_s3 + $0x20] sm:$0xff] (!%p233_p2)   ;;  %v1152_v23 = vld [vmem:[%s1415_s3 + $0x28] sm:$0xff] (!%p233_p2)  }
   0xd   : > { %1080 = vmatpush3.bf16.msra.mxu1 %v1136_v7  ;;  %1059 = vmatprep.subr.bf16.mxu0 %v1137_v8  ;;  %s1420_s22 = smov (!%p271_p3, %s918_s22), 1  ;;  %v1153_v24 = vld [vmem:[%s1415_s3 + $0xf0] sm:$0xff]   ;;  %v1157_v28 = vld [vmem:[%s1415_s3 + $0xf8] sm:$0xff]   ;;  %v1165_v38 = vld [vmem:[%s1415_s3 + $0x140] sm:$0xff]  }
   0xe   : > { %1081 = vmatprep.subr.bf16.mxu1 %v1138_v9  ;;  %v1154_v25 = vld [vmem:[%s1415_s3 + $0x70] sm:$0xff]   ;;  %s1322_s9 = sshll.u32 %s1420_s22, 3  ;;  %v1158_v29 = vld [vmem:[%s1415_s3 + $0x78] sm:$0xff]   ;;  %v1166_v39 = vld [vmem:[%s1415_s3 + $0x100] sm:$0xff]   ;;  %s929_s24 = sshll.u32 %s1420_s22, 2 }
   0xf   : > { %v1155_v26 = vld [vmem:[%s1415_s3 + $0xb0] sm:$0xff]   ;;  %s280_s18 = scalar_lea.vmem %s1413_s1, %s1322_s9  ;;  %s275_s23 = scalar_lea.vmem %s1412_s0, %s1322_s9  ;;  %v1159_v30 = vld [vmem:[%s1415_s3 + $0xb8] sm:$0xff]   ;;  %v1167_v40 = vld [vmem:[%s1415_s3 + $0x148] sm:$0xff]  }
  0x10   : > { %1060 = vmatpush3.bf16.msra.mxu0 %v1139_v10  ;;  %v1156_v27 = vld [vmem:[%s1415_s3 + $0x30] sm:$0xff]   ;;  %v1160_v31 = vld [vmem:[%s1415_s3 + $0x38] sm:$0xff]   ;;  %v324_v32 = vld [vmem:[%s280_s18] sm:$0xff]  ;;  %s289_s27 = scalar_lea.vmem %s1418_s6, %s929_s24 }
  0x11   : > { %1082 = vmatpush3.bf16.msra.mxu1 %v1140_v11  ;;  %1061 = vmatprep.subr.bf16.mxu0 %v1141_v12  ;;  %v291_v33 = vld [vmem:[%s275_s23] sm:$0xff]  ;;  %v962_v34 = vcombine.low %v324_v32, %v324_v32  ;;  %v963_v35 = vcombine.high %v324_v32, %v324_v32  ;;  %v1168_v41 = vld [vmem:[%s1415_s3 + $0x108] sm:$0xff]   ;;  %v1169_v42 = vld [vmem:[%s1415_s3 + $0x150] sm:$0xff]   ;;  %s285_s23 = scalar_lea.vmem %s1414_s2, %s1322_s9 }
  0x12   : > { %1083 = vmatprep.subr.bf16.mxu1 %v1142_v13  ;;  %v980_v36 = vcombine.low %v291_v33, %v291_v33  ;;  %v981_v37 = vcombine.high %v291_v33, %v291_v33  ;;  %v1170_v43 = vld [vmem:[%s1415_s3 + $0x110] sm:$0xff]   ;;  %v1171_v44 = vld [vmem:[%s1415_s3 + $0x158] sm:$0xff]   ;;  %v1173_v46 = vld [vmem:[%s1415_s3 + $0x160] sm:$0xff]  }
  0x13   : > { %493 = vmatprep.mubr.bf16.mxu0 %v963_v35  ;;  %v1172_v45 = vld [vmem:[%s1415_s3 + $0x118] sm:$0xff]   ;;  %v644_v47 = vld [vmem:[%s285_s23] sm:$0xff]  ;;  %v1175_v50 = vld [vmem:[%s1415_s3 + $0x168] sm:$0xff]  }
  0x14   : > { %1062 = vmatpush3.bf16.msra.mxu0 %v1143_v14  ;;  %636 = vmatprep.mubr.bf16.mxu1 %v981_v37  ;;  %v1031_v48 = vcombine.high %v644_v47, %v644_v47  ;;  %v1174_v49 = vld [vmem:[%s1415_s3 + $0x120] sm:$0xff]   ;;  %v1176_v51 = vld [vmem:[%s1415_s3 + $0x128] sm:$0xff]   ;;  %v1177_v52 = vld [vmem:[%s1415_s3 + $0x170] sm:$0xff]   ;;  %v1030_v56 = vcombine.low %v644_v47, %v644_v47 }
  0x15   : > { %1084 = vmatpush3.bf16.msra.mxu1 %v1144_v15  ;;  %1063 = vmatprep.subr.bf16.mxu0 %v1145_v16  ;;  %v1178_v53 = vld [vmem:[%s1415_s3 + $0x130] sm:$0xff]   ;;  %v1179_v54 = vld [vmem:[%s1415_s3 + $0x178] sm:$0xff]   ;;  %v1048_v8 = vld [vmem:[%s1416_s4] ss:$0 sm:$0xff] }
  0x16   : > { %1085 = vmatprep.subr.bf16.mxu1 %v1146_v17  ;;  %v1180_v55 = vld [vmem:[%s1415_s3 + $0x138] sm:$0xff]   ;;  %v1049_v11 = vld [vmem:[%s1417_s5] ss:$0 sm:$0xff] }
  0x18   : > { %1064 = vmatpush3.bf16.msra.mxu0 %v1147_v18 }
  0x19   : > { %1086 = vmatpush3.bf16.msra.mxu1 %v1148_v19  ;;  %1065 = vmatprep.subr.bf16.mxu0 %v1149_v20 }
  0x1a   : > { %1087 = vmatprep.subr.bf16.mxu1 %v1150_v21 }
  0x1c   : > { %1066 = vmatpush3.bf16.msra.mxu0 %v1151_v22 }
  0x1d   : > { %1088 = vmatpush3.bf16.msra.mxu1 %v1152_v23  ;;  %1067 = vmatprep.subr.bf16.mxu0 %v1153_v24 }
  0x1e   : > { %1089 = vmatprep.subr.bf16.mxu1 %v1154_v25 }
  0x20   : > { %1068 = vmatpush3.bf16.msra.mxu0 %v1155_v26 }
  0x21   : > { %1090 = vmatpush3.bf16.msra.mxu1 %v1156_v27  ;;  %1069 = vmatprep.subr.bf16.mxu0 %v1157_v28 }
  0x22   : > { %1091 = vmatprep.subr.bf16.mxu1 %v1158_v29 }
  0x24   : > { %1070 = vmatpush3.bf16.msra.mxu0 %v1159_v30 }
  0x25   : > { %1092 = vmatpush3.bf16.msra.mxu1 %v1160_v31  ;;  %1099 = vmatprep.subr.bf16.mxu0 %v1165_v38 }
  0x27   : > { %494 = vmatmul.mubr.bf16.vlgmr.msra.gmra.mrb[0].mxu0 %v962_v34 }
  0x28   : > { %637 = vmatmul.mubr.bf16.vlgmr.msra.gmra.mrb[0].mxu1 %v980_v36  ;;  %1100 = vmatpush3.bf16.msra.mxu0 %v1166_v39 }
  0x29   : > { %1101 = vmatprep.subr.bf16.mxu0 %v1167_v40  ;;  %813 = vmatprep.mubr.bf16.mxu0 %v1031_v48 }
  0x2c   : > { %1102 = vmatpush3.bf16.msra.mxu0 %v1168_v41 }
  0x2d   : > { %1103 = vmatprep.subr.bf16.mxu0 %v1169_v42 }
  0x30   : > { %1104 = vmatpush3.bf16.msra.mxu0 %v1170_v43 }
  0x31   : > { %1105 = vmatprep.subr.bf16.mxu0 %v1171_v44 }
  0x34   : > { %1106 = vmatpush3.bf16.msra.mxu0 %v1172_v45 }
  0x35   : > { %1107 = vmatprep.subr.bf16.mxu0 %v1173_v46 }
  0x38   : > { %1108 = vmatpush3.bf16.msra.mxu0 %v1174_v49 }
  0x39   : > { %1109 = vmatprep.subr.bf16.mxu0 %v1175_v50 }
  0x3c   : > { %1110 = vmatpush3.bf16.msra.mxu0 %v1176_v51 }
  0x3d   : > { %1111 = vmatprep.subr.bf16.mxu0 %v1177_v52 }
  0x40   : > { %1112 = vmatpush3.bf16.msra.mxu0 %v1178_v53 }
  0x41   : > { %1113 = vmatprep.subr.bf16.mxu0 %v1179_v54 }
  0x44   : > { %1114 = vmatpush3.bf16.msra.mxu0 %v1180_v55 }
  0x47   : > { %814 = vmatmul.mubr.bf16.vlgmr.msra.gmra.mrb[4].mxu0 %v1030_v56 }
  0xfa   : > { %v1071_v57 = vpop.f32.mrb[0].mxu0 }
  0xfb   : > { %v1093_v58 = vpop.f32.mrb[0].mxu1  ;;  %v1072_v59 = vpop.f32.mrb[1].mxu0 }
  0xfc   : > { %v1094_v60 = vpop.f32.mrb[1].mxu1  ;;  %v1073_v61 = vadd.f32 %v1072_v59, %v1071_v57  ;;  %v1074_v63 = vpop.f32.mrb[2].mxu0 }
  0xfd   : > { %v1095_v62 = vadd.f32 %v1094_v60, %v1093_v58  ;;  %v1096_v0 = vpop.f32.mrb[2].mxu1  ;;  %v1075_v1 = vpop.f32.mrb[3].mxu0 }
  0xfe   : > { %v1097_v2 = vpop.f32.mrb[3].mxu1 }
  0xff   : > { %v639_v3 = vadd.f32 %v1095_v62, %v1073_v61 }
 0x11a   : > { %v1115_v4 = vpop.f32.mrb[4].mxu0 }
 0x11b   : > { %v1116_v5 = vpop.f32.mrb[5].mxu0 }
 0x11c   : > { %v1117_v6 = vadd.f32 %v1116_v5, %v1115_v4  ;;  %v1118_v7 = vpop.f32.mrb[6].mxu0 }
 0x11d   : > { %v1119_v9 = vpop.f32.mrb[7].mxu0 }
 0x11e   : > { %v821_v10 = vadd.f32 %v1117_v6, %v639_v3 }
 0x120   : > { %v829_v12 = vmul.f32 %v1048_v8, %v821_v10 }
 0x122   : > { %v837_v13 = vadd.f32 %v1049_v11, %v829_v12 }
 0x124   : > { %v838_v14 = vmax.f32 %v837_v13, 0.0 }
 0x126   : > { %v839_v15 = vpack.c.bf16 %v838_v14, %v838_v14 }
 0x128   : > { %840 = vst [vmem:[%s289_s27] sm:$0xf] %v839_v15 }
 0x129 PF: > { %s16_s21 = sadd.s32 1, %s1189_s21  }
 0x12a   : > { %p13_p4 = scmp.ge.s32.totalorder %s16_s21, 4  }
 0x12c   :  { %15 = sbr.rel (!%p13_p4) target bundleno = 1 (0x1), region = 82 }

// kernel: _lambda_.23
= control target key start
LH: loop header
LB: loop body
LE: loop exit
PB: predicated region body
PF: predicated region fallthrough
CT: control target
= control target key end

     0   :  { %9 = vsyncpa [#allocation3], 0  ;;  %s1814_s15 = smov 0   ;;  %s1947_s0 = inlined_call_operand.vmem [shape: bf16[2,18,294], index: 0, kind: input, shape index: {}]   ;;  %s1948_s1 = inlined_call_operand.hbm [shape: bf16[3,294,256], index: 1, kind: input, shape index: {}]   ;;  %s1949_s2 = inlined_call_operand.vmem [shape: f32[1,256], index: 2, kind: input, shape index: {}]   ;;  %s1950_s3 = inlined_call_operand.vmem [shape: f32[1,256], index: 3, kind: input, shape index: {}]   ;;  %s1951_s4 = inlined_call_operand.vmem [shape: bf16[2,16,256], index: 4, kind: output, shape index: {}]  }
   0x1 LB: > { %s1820_s16 = sadd.s32 4294967295, %s1783_s15   ;;  %p1381_p0 = scmp.ge.s32.totalorder %s1783_s15, 1  ;;  %s1783_s15 = sphi %s1814_s15, %s15_s15  }
   0x2   : > { %p135_p1 = scmp.lt.s32.totalorder %s1783_s15, 3  ;;  %s1785_s17 = smov [#allocation2]  }
   0x3   : > { %s147_s18 = sshll.u32 %s1785_s17, 4  ;;  %p1952_p3 = scmp.eq.s32.totalorder %s1820_s16, 0  ;;  %s148_s18 = int_to_ptr.vmem [resolvable:$true] %s147_s18 }
   0x4   : > { %p1824_p2 = pnand %p1381_p0, %p135_p1  ;;  %s1745_s23 = scalar_lea.hbm %s1948_s1, 14208 }
   0x5   : > { %p1746_p6 = scmp.ne.s32.totalorder %s1948_s1, %s1745_s23  ;;  %p1752_p10 = scmp.lt.u32.totalorder %s1745_s23, %s1948_s1 }
   0x6   : > { %s1954_s19 = scalar_select %p1824_p2, 1, 0 }
   0x7   : > { %p1550_p4 = pneg %p1824_p2 }
   0x9   : > { %p1833_p5 = pnand %p1952_p3, %p1550_p4 }
   0xb   : > { %p1747_p7 = pneg %p1833_p5 }
   0xd   : > { %p1748_p8 = pnand %p1747_p7, %p1746_p6 }
   0xf   : > { %p1749_p9 = pneg %p1748_p8 }
  0x11   : > { %p1754_p11 = pnand %p1752_p10, %p1749_p9 }
  0x13   : > { %1757 = shalt.err (!%p1754_p11)
}
  0x14   : > { %s1758_s28 = scalar_lea.vmem %s148_s18, 14208  ;;  %p1766_p1 = scmp.lt.s32.totalorder %s148_s18, %s148_s18 }
  0x15   : > { %p1759_p12 = scmp.ne.s32.totalorder %s148_s18, %s1758_s28  ;;  %p1767_p4 = scmp.lt.s32.totalorder %s1758_s28, %s1758_s28 }
  0x17   : > { %p1761_p13 = pnand %p1759_p12, %p1747_p7  ;;  %p1768_p3 = por %p1767_p4, %p1766_p1 }
  0x19   : > { %p1762_p0 = pneg %p1761_p13 }
  0x1b   : > { %p1769_p2 = pnand %p1768_p3, %p1762_p0 }
  0x1d   : > { %1772 = shalt.err (!%p1769_p2)
}
  0x1e   : > { %s1786_s29 = smov 128   ;;  %s1787_s30 = smov 8  }
  0x1f   : > { %1553 = dma.hbm_to_vmem [thread:$0]  (!%p1833_p5), %s1948_s1, 14208, %s148_s18, [#allocation3], %s1786_s29, %s1786_s29, %s1787_s30  }
  0x20   : > { %p1956_p6 = scmp.ne.s32.totalorder %s1954_s19, 0 }
  0x21   : > { %p1957_p8 = scmp.eq.s32.totalorder (!%p1956_p6), %s1820_s16, 0 }
  0x22   : > { %177 = sbr.rel (%p1956_p6) target bundleno = 399 (0x18f), region = 36 }
  0x29   : > { %1778 = dma.done.wait (%p1957_p8), [#allocation3], 14208   ;;  %p1958_p7 = pmov %p1957_p8 }
  0x2a   : > { %v1788_v0 = vmov 0   ;;  %p203_p2 = scmp.lt.s32.totalorder %s1820_s16, 1  ;;  %v1568_v1 = vld [vmem:[#allocation2 + $0x12c] ss:$8 sps:$4 sm:$0xff]   ;;  %v1572_v3 = vld [vmem:[#allocation2 + $0x128] ss:$8 sps:$4 sm:$0xff]  }
  0x2b   : > { %1780 = vsyncadd (%p1958_p7), [#allocation3], 4294953088  ;;  %626 = vmatprep.mubr.bf16.mxu0 %v1788_v0  ;;  %v1570_v2 = vld [vmem:[#allocation2 + $0x22c] ss:$8 sps:$4 sm:$0xff]   ;;  %551 = vmatprep.subr.bf16.mxu1 %v1568_v1  ;;  %v1573_v4 = vld [vmem:[#allocation2 + $0x228] ss:$8 sps:$4 sm:$0xff]  }
  0x2c   : > { %s1960_s16 = smov (!%p203_p2, %s1820_s16), 1  ;;  %594 = vmatprep.subr.bf16.mxu0 %v1570_v2  ;;  %v1574_v5 = vld [vmem:[#allocation2 + $0x13c] ss:$8 sps:$4 sm:$0xff]   ;;  %552 = vmatpush1.bf16.msra.mxu1 %v1572_v3  ;;  %v1578_v7 = vld [vmem:[#allocation2 + $0x138] ss:$8 sps:$4 sm:$0xff]   ;;  %vm544_vm0 = vcmask 1042432  }
  0x2d   : > { %s1545_s7 = smul.u32 36, %s1960_s16  ;;  %595 = vmatpush1.bf16.msra.mxu0 %v1573_v4  ;;  %v1576_v6 = vld [vmem:[#allocation2 + $0x23c] ss:$8 sps:$4 sm:$0xff]   ;;  %553 = vmatprep.subr.bf16.mxu1 %v1574_v5  ;;  %v1579_v8 = vld [vmem:[#allocation2 + $0x238] ss:$8 sps:$4 sm:$0xff]   ;;  %vm540_vm2 = vcmask 310272  }
  0x2e   : > { %596 = vmatprep.subr.bf16.mxu0 %v1576_v6  ;;  %v1580_v9 = vld [vmem:[#allocation2 + $0x14c] ss:$8 sps:$4 sm:$0xff]   ;;  %v1583_v13 = vld [vmem:[#allocation2 + $0x148] ss:$8 sps:$4 sm:$0xff]   ;;  %v1585_v15 = vld [vmem:[#allocation2 + $0x15c] ss:$8 sps:$4 sm:$0xff]  }
  0x2f   : > { %v294_v10 = vld [vmem:[#allocation2 + $0x248] sm:$0x77]  ;;  %s1868_s10 = scalar_lea.vmem %s1947_s0, %s1545_s7  ;;  %v1590_v21 = vld [vmem:[#allocation2 + $0x158] ss:$8 sps:$4 sm:$0xff]   ;;  %vm316_vm1 = vsmask.f32 7424 }
  0x30   : > { %v1432_v11 = vcombine.high %v294_v10, %v294_v10  ;;  %v1431_v12 = vcombine.low %v294_v10, %v294_v10  ;;  %554 = vmatpush1.bf16.msra.mxu1 %v1578_v7  ;;  %v1589_v16 = vld [vmem:[#allocation2 + $0x104] ss:$8 sps:$4 sm:$0xff]   ;;  %v215_v17 = vld [vmem:[%s1868_s10 + $0x8] sm:$0xf]  ;;  %v1874_v18 = vld [vmem:[%s1868_s10 + $0x14] sm:$0xf] }
  0x31   : > { %597 = vmatpush1.bf16.msra.mxu0 %v1579_v8  ;;  %555 = vmatprep.subr.bf16.mxu1 %v1580_v9  ;;  %v1391_v19 = vcombine.low %v215_v17, %v1874_v18  ;;  %v1878_v20 = vld [vmem:[%s1868_s10 + $0x20] ss:$0 sps:$4 sm:$0x11]   ;;  %v1593_v25 = vld [vmem:[#allocation2 + $0x16c] ss:$8 sps:$4 sm:$0xff]   ;;  %vm966_vm3 = vcmask 1046528  }
  0x32   : > { %1433 = vmatprep.subr.msk.bf16.mxu0 %vm544_vm0, %v1432_v11  ;;  %v546_v14 = vsel %vm544_vm0, %v1431_v12, 0  ;;  %v349_v24 = vshll.u32 %v1878_v20, 16  ;;  %v1587_v26 = vld [vmem:[#allocation2 + $0x100] ss:$8 sps:$4 sm:$0xff]   ;;  %v1599_v31 = vld [vmem:[#allocation2 + $0x17c] ss:$8 sps:$4 sm:$0xff]  }
  0x33   : > { %v342_v22 = vshrl.u32 %v1391_v19, 16  ;;  %v344_v23 = vshll.u32 %v1391_v19, 16  ;;  %v1598_v29 = vld [vmem:[#allocation2 + $0x168] ss:$8 sps:$4 sm:$0xff]   ;;  %v1597_v32 = vld [vmem:[#allocation2 + $0x114] ss:$8 sps:$4 sm:$0xff]  }
  0x34   : > { %556 = vmatpush1.bf16.msra.mxu1 %v1583_v13  ;;  %v351_v28 = vrot.slane %v349_v24, 1  ;;  %v254_v34 = vld [vmem:[#allocation2 + $0x120] sm:$0x77]  ;;  %v1595_v35 = vld [vmem:[#allocation2 + $0x110] ss:$8 sps:$4 sm:$0xff]   ;;  %s1522_s17 = sshll.u32 %s1960_s16, 4 }
  0x35   : > { %599 = vmatpush1.bf16.msra.mxu0 %v546_v14  ;;  %557 = vmatprep.subr.bf16.mxu1 %v1585_v15  ;;  %v346_v27 = vrot.slane %v344_v23, 1  ;;  %v1602_v36 = vld [vmem:[#allocation2 + $0x178] ss:$8 sps:$4 sm:$0xff]   ;;  %v1604_v37 = vld [vmem:[#allocation2 + $0x18c] ss:$8 sps:$4 sm:$0xff]   ;;  %v1472_v38 = vcombine.high %v254_v34, %v254_v34  ;;  %v1471_v39 = vcombine.low %v254_v34, %v254_v34  ;;  %s212_s20 = scalar_lea.vmem %s1951_s4, %s1522_s17 }
  0x36   : > { %875 = vmatprep.subr.bf16.mxu0 %v1589_v16  ;;  %v1609_v40 = vld [vmem:[#allocation2 + $0x188] ss:$8 sps:$4 sm:$0xff]   ;;  %v1610_v41 = vld [vmem:[#allocation2 + $0x19c] ss:$8 sps:$4 sm:$0xff]   ;;  %v1615_v45 = vld [vmem:[#allocation2 + $0x198] ss:$8 sps:$4 sm:$0xff]  }
  0x37   : > { %v347_v30 = vor.u32 %v346_v27, %v342_v22  ;;  %v827_v42 = vsel %vm544_vm0, %v1471_v39, 0  ;;  %v1608_v43 = vld [vmem:[#allocation2 + $0x254] ss:$8 sps:$4 sm:$0xff]   ;;  %v1606_v44 = vld [vmem:[#allocation2 + $0x250] ss:$8 sps:$4 sm:$0xff]   ;;  %v214_v60 = vld [vmem:[%s1868_s10] sm:$0xff] }
  0x38   : > { %558 = vmatpush1.bf16.msra.mxu1 %v1590_v21  ;;  %v1616_v46 = vld [vmem:[#allocation2 + $0x1ac] ss:$8 sps:$4 sm:$0xff]   ;;  %v1612_v48 = vld [vmem:[#allocation2 + $0x260] ss:$8 sps:$4 sm:$0xff]   ;;  %v1622_v50 = vld [vmem:[#allocation2 + $0x1bc] ss:$8 sps:$4 sm:$0xff]  }
  0x39   : > { %559 = vmatprep.subr.bf16.mxu1 %v1593_v25  ;;  %v352_v33 = vsel %vm316_vm1, %v347_v30, %v351_v28  ;;  %v1614_v47 = vld [vmem:[#allocation2 + $0x264] ss:$8 sps:$4 sm:$0xff]   ;;  %v1621_v49 = vld [vmem:[#allocation2 + $0x1a8] ss:$8 sps:$4 sm:$0xff]   ;;  %v1620_v51 = vld [vmem:[#allocation2 + $0x274] ss:$8 sps:$4 sm:$0xff]  }
  0x3a   : > { %1434 = vmatmul.mubr.msk.bf16.vlgmr.msra.gmra.mrb[0].mxu0 %vm540_vm2, %v352_v33  ;;  %v1618_v52 = vld [vmem:[#allocation2 + $0x270] ss:$8 sps:$4 sm:$0xff]   ;;  %v1628_v54 = vld [vmem:[#allocation2 + $0x1cc] ss:$8 sps:$4 sm:$0xff]   ;;  %v1624_v56 = vld [vmem:[#allocation2 + $0x280] ss:$8 sps:$4 sm:$0xff]  }
  0x3b   : > { %876 = vmatpush1.bf16.msra.mxu0 %v1587_v26  ;;  %907 = vmatprep.mubr.bf16.mxu0 %v1788_v0  ;;  %v1627_v53 = vld [vmem:[#allocation2 + $0x1b8] ss:$8 sps:$4 sm:$0xff]   ;;  %v1626_v55 = vld [vmem:[#allocation2 + $0x284] ss:$8 sps:$4 sm:$0xff]   ;;  %v1633_v57 = vld [vmem:[#allocation2 + $0x1c8] ss:$8 sps:$4 sm:$0xff]  }
  0x3c   : > { %560 = vmatpush1.bf16.msra.mxu1 %v1598_v29  ;;  %877 = vmatprep.subr.bf16.mxu0 %v1597_v32  ;;  %v1634_v58 = vld [vmem:[#allocation2 + $0x1dc] ss:$8 sps:$4 sm:$0xff]   ;;  %v1889_v61 = vld [vmem:[%s1868_s10 + $0xc] sm:$0xff]  ;;  %v1639_v1 = vld [vmem:[#allocation2 + $0x1d8] ss:$8 sps:$4 sm:$0xff]  }
  0x3d   : > { %561 = vmatprep.subr.bf16.mxu1 %v1599_v31  ;;  %v1632_v59 = vld [vmem:[#allocation2 + $0x294] ss:$8 sps:$4 sm:$0xff]   ;;  %v1630_v63 = vld [vmem:[#allocation2 + $0x290] ss:$8 sps:$4 sm:$0xff]   ;;  %v1893_v2 = vcombine.high %v214_v60, %v1889_v61  ;;  %v1638_v5 = vld [vmem:[#allocation2 + $0x2a4] ss:$8 sps:$4 sm:$0xff]   ;;  %v1901_v12 = vcombine.low %v214_v60, %v1889_v61 }
  0x3e   : > { %v255_v62 = vld [vmem:[%s1868_s10 + $0x18] sm:$0x11]  ;;  %v1640_v4 = vld [vmem:[#allocation2 + $0x1ec] ss:$8 sps:$4 sm:$0xff]   ;;  %v1645_v9 = vld [vmem:[#allocation2 + $0x1e8] ss:$8 sps:$4 sm:$0xff]  }
  0x3f   : > { %878 = vmatpush1.bf16.msra.mxu0 %v1595_v35  ;;  %v1895_v3 = vcombine.high %v255_v62, %v255_v62  ;;  %v330_v6 = vshrl.u32 %v1893_v2, 16  ;;  %v332_v7 = vshll.u32 %v1893_v2, 16  ;;  %v1636_v13 = vld [vmem:[#allocation2 + $0x2a0] ss:$8 sps:$4 sm:$0xff]   ;;  %v1646_v14 = vld [vmem:[#allocation2 + $0x1fc] ss:$8 sps:$4 sm:$0xff]   ;;  %v1904_v21 = vcombine.low %v255_v62, %v255_v62 }
  0x40   : > { %562 = vmatpush1.bf16.msra.mxu1 %v1602_v36  ;;  %1473 = vmatprep.subr.msk.bf16.mxu0 %vm544_vm0, %v1472_v38  ;;  %v1644_v15 = vld [vmem:[#allocation2 + $0x2b4] ss:$8 sps:$4 sm:$0xff]   ;;  %v1651_v17 = vld [vmem:[#allocation2 + $0x1f8] ss:$8 sps:$4 sm:$0xff]   ;;  %v320_v22 = vshll.u32 %v1901_v12, 16  ;;  %v318_v27 = vshrl.u32 %v1901_v12, 16 }
  0x41   : > { %563 = vmatprep.subr.bf16.mxu1 %v1604_v37  ;;  %v337_v8 = vshll.u32 %v1895_v3, 16  ;;  %v334_v10 = vrot.slane %v332_v7, 1  ;;  %v1642_v23 = vld [vmem:[#allocation2 + $0x2b0] ss:$8 sps:$4 sm:$0xff]   ;;  %v1652_v24 = vld [vmem:[#allocation2 + $0x20c] ss:$8 sps:$4 sm:$0xff]  }
  0x42   : > { %v1650_v25 = vld [vmem:[#allocation2 + $0x2c4] ss:$8 sps:$4 sm:$0xff]   ;;  %v1657_v26 = vld [vmem:[#allocation2 + $0x208] ss:$8 sps:$4 sm:$0xff]   ;;  %v322_v28 = vrot.slane %v320_v22, 1  ;;  %v325_v29 = vshll.u32 %v1904_v21, 16 }
  0x43   : > { %880 = vmatpush1.bf16.msra.mxu0 %v827_v42  ;;  %v339_v11 = vrot.slane %v337_v8, 1  ;;  %v335_v16 = vor.u32 %v334_v10, %v330_v6  ;;  %v1648_v30 = vld [vmem:[#allocation2 + $0x2c0] ss:$8 sps:$4 sm:$0xff]   ;;  %v1658_v31 = vld [vmem:[#allocation2 + $0x21c] ss:$8 sps:$4 sm:$0xff]  }
  0x44   : > { %564 = vmatpush1.bf16.msra.mxu1 %v1609_v40  ;;  %1172 = vmatprep.subr.bf16.mxu0 %v1608_v43  ;;  %v1656_v32 = vld [vmem:[#allocation2 + $0x2d4] ss:$8 sps:$4 sm:$0xff]   ;;  %v1654_v33 = vld [vmem:[#allocation2 + $0x2d0] ss:$8 sps:$4 sm:$0xff]   ;;  %v323_v35 = vor.u32 %v322_v28, %v318_v27  ;;  %v327_v36 = vrot.slane %v325_v29, 1  ;;  %v971_v40 = vrot.slane %v1895_v3, 1 }
  0x45   : > { %565 = vmatprep.subr.bf16.mxu1 %v1610_v41  ;;  %v1663_v34 = vld [vmem:[#allocation2 + $0x218] ss:$8 sps:$4 sm:$0xff]   ;;  %v1670_v38 = vld [vmem:[#allocation2 + $0x4] ss:$8 sps:$4 sm:$0xff]   ;;  %v1685_v60 = vld [vmem:[#allocation2 + $0x314] ss:$8 sps:$4 sm:$0xff]  }
  0x46   : > { %1474 = vmatmul.mubr.msk.bf16.vlgmr.msra.gmra.mrb[4].mxu0 %vm540_vm2, %v1391_v19  ;;  %v340_v19 = vsel %vm316_vm1, %v335_v16, %v339_v11  ;;  %v1910_v37 = vld [vmem:[%s1868_s10] sm:$0xee]  ;;  %v1698_v6 = vld [vmem:[#allocation2 + $0x50] ss:$8 sps:$4 sm:$0xff]   ;;  %v1714_v16 = vld [vmem:[#allocation2 + $0x74] ss:$8 sps:$4 sm:$0xff]  }
  0x47   : > { %1173 = vmatpush1.bf16.msra.mxu0 %v1606_v44  ;;  %583 = vmatprep.mubr.bf16.mxu1 %v340_v19  ;;  %v1476_v39 = vcombine.high %v1910_v37, %v1889_v61  ;;  %v1662_v41 = vld [vmem:[#allocation2 + $0x2e4] ss:$8 sps:$4 sm:$0xff]   ;;  %v1660_v42 = vld [vmem:[#allocation2 + $0x2e0] ss:$8 sps:$4 sm:$0xff]   ;;  %v328_v44 = vsel %vm316_vm1, %v323_v35, %v327_v36  ;;  %v1695_v7 = vld [vmem:[#allocation2 + $0x330] ss:$8 sps:$4 sm:$0xff]  }
  0x48   : > { %566 = vmatpush1.bf16.msra.mxu1 %v1615_v45  ;;  %1174 = vmatprep.subr.bf16.mxu0 %v1614_v47  ;;  %v1668_v45 = vld [vmem:[#allocation2] ss:$8 sps:$4 sm:$0xff]   ;;  %v1707_v8 = vld [vmem:[#allocation2 + $0x64] ss:$8 sps:$4 sm:$0xff]   ;;  %v1712_v19 = vld [vmem:[#allocation2 + $0x70] ss:$8 sps:$4 sm:$0xff]  }
  0x49   : > { %567 = vmatprep.subr.bf16.mxu1 %v1616_v46  ;;  %v970_v43 = vrot.slane %v1476_v39, 1  ;;  %v1676_v46 = vld [vmem:[#allocation2 + $0x14] ss:$8 sps:$4 sm:$0xff]   ;;  %v1689_v3 = vld [vmem:[#allocation2 + $0x320] ss:$8 sps:$4 sm:$0xff]  }
  0x4a   : > { %v1703_v10 = vld [vmem:[#allocation2 + $0x344] ss:$8 sps:$4 sm:$0xff]   ;;  %v1705_v11 = vld [vmem:[#allocation2 + $0x60] ss:$8 sps:$4 sm:$0xff]   ;;  %v1730_v35 = vld [vmem:[#allocation2 + $0xb0] ss:$8 sps:$4 sm:$0xff]  }
  0x4b   : > { %1175 = vmatpush1.bf16.msra.mxu0 %v1612_v48  ;;  %v972_v47 = vsel %vm966_vm3, %v970_v43, %v971_v40  ;;  %v1673_v48 = vld [vmem:[#allocation2 + $0x2f4] ss:$8 sps:$4 sm:$0xff]   ;;  %v1715_v27 = vld [vmem:[#allocation2 + $0x360] ss:$8 sps:$4 sm:$0xff]   ;;  %v1741_v39 = vld [vmem:[#allocation2 + $0xe4] ss:$8 sps:$4 sm:$0xff]  }
  0x4c   : > { %568 = vmatpush1.bf16.msra.mxu1 %v1621_v49  ;;  %1176 = vmatprep.subr.bf16.mxu0 %v1620_v51  ;;  %v1674_v49 = vld [vmem:[#allocation2 + $0x10] ss:$8 sps:$4 sm:$0xff]   ;;  %v1682_v51 = vld [vmem:[#allocation2 + $0x24] ss:$8 sps:$4 sm:$0xff]   ;;  %v1733_v36 = vld [vmem:[#allocation2 + $0xc0] ss:$8 sps:$4 sm:$0xff]  }
  0x4d   : > { %569 = vmatprep.subr.bf16.mxu1 %v1622_v50  ;;  %1204 = vmatprep.mubr.bf16.mxu0 %v972_v47  ;;  %v1671_v50 = vld [vmem:[#allocation2 + $0x2f0] ss:$8 sps:$4 sm:$0xff]   ;;  %v1739_v40 = vld [vmem:[#allocation2 + $0xe0] ss:$8 sps:$4 sm:$0xff]  }
  0x4f   : > { %1177 = vmatpush1.bf16.msra.mxu0 %v1618_v52  ;;  %v919_v52 = vld [vmem:[%s1868_s10 + $0x8] sm:$0xe] }
  0x50   : > { %570 = vmatpush1.bf16.msra.mxu1 %v1627_v53  ;;  %1178 = vmatprep.subr.bf16.mxu0 %v1626_v55  ;;  %v1679_v53 = vld [vmem:[#allocation2 + $0x304] ss:$8 sps:$4 sm:$0xff]   ;;  %v974_v55 = vrot.slane %v1878_v20, 1 }
  0x51   : > { %571 = vmatprep.subr.bf16.mxu1 %v1628_v54  ;;  %v1477_v54 = vcombine.low %v919_v52, %v1874_v18  ;;  %v1694_v18 = vld [vmem:[#allocation2 + $0x44] ss:$8 sps:$4 sm:$0xff]  }
  0x52   : > { %v1691_v20 = vld [vmem:[#allocation2 + $0x324] ss:$8 sps:$4 sm:$0xff]  }
  0x53   : > { %1179 = vmatpush1.bf16.msra.mxu0 %v1624_v56  ;;  %v1680_v56 = vld [vmem:[#allocation2 + $0x20] ss:$8 sps:$4 sm:$0xff]  }
  0x54   : > { %572 = vmatpush1.bf16.msra.mxu1 %v1633_v57  ;;  %1180 = vmatprep.subr.bf16.mxu0 %v1632_v59  ;;  %v973_v57 = vrot.slane %v1477_v54, 1  ;;  %v1688_v59 = vld [vmem:[#allocation2 + $0x34] ss:$8 sps:$4 sm:$0xff]  }
  0x55   : > { %573 = vmatprep.subr.bf16.mxu1 %v1634_v58  ;;  %v1677_v58 = vld [vmem:[#allocation2 + $0x300] ss:$8 sps:$4 sm:$0xff]  }
  0x56   : > { %v1922_v62 = vsel %vm966_vm3, %v973_v57, %v974_v55 }
  0x57   : > { %1181 = vmatpush1.bf16.msra.mxu0 %v1630_v63  ;;  %v1686_v63 = vld [vmem:[#allocation2 + $0x30] ss:$8 sps:$4 sm:$0xff]  }
  0x58   : > { %574 = vmatpush1.bf16.msra.mxu1 %v1639_v1  ;;  %1182 = vmatprep.subr.bf16.mxu0 %v1638_v5  ;;  %v1683_v1 = vld [vmem:[#allocation2 + $0x310] ss:$8 sps:$4 sm:$0xff]   ;;  %v1697_v5 = vld [vmem:[#allocation2 + $0x334] ss:$8 sps:$4 sm:$0xff]  }
  0x59   : > { %575 = vmatprep.subr.bf16.mxu1 %v1640_v4  ;;  %v1700_v4 = vld [vmem:[#allocation2 + $0x54] ss:$8 sps:$4 sm:$0xff]  }
  0x5b   : > { %1183 = vmatpush1.bf16.msra.mxu0 %v1636_v13  ;;  %v1701_v13 = vld [vmem:[#allocation2 + $0x340] ss:$8 sps:$4 sm:$0xff]  }
  0x5c   : > { %576 = vmatpush1.bf16.msra.mxu1 %v1645_v9  ;;  %1184 = vmatprep.subr.bf16.mxu0 %v1644_v15  ;;  %v1475_v9 = vcombine.low %v1910_v37, %v1889_v61  ;;  %v968_v15 = vrot.slane %v1904_v21, 1  ;;  %v1720_v61 = vld [vmem:[#allocation2 + $0x84] ss:$8 sps:$4 sm:$0xff]   ;;  %v1725_v21 = vld [vmem:[#allocation2 + $0x94] ss:$8 sps:$4 sm:$0xff]  }
  0x5d   : > { %577 = vmatprep.subr.bf16.mxu1 %v1646_v14  ;;  %v1738_v37 = vld [vmem:[#allocation2 + $0xd4] ss:$8 sps:$4 sm:$0xff]  }
  0x5e   : > { %v967_v14 = vrot.slane %v1475_v9, 1 }
  0x5f   : > { %1185 = vmatpush1.bf16.msra.mxu0 %v1642_v23  ;;  %v1709_v23 = vld [vmem:[#allocation2 + $0x350] ss:$8 sps:$4 sm:$0xff]  }
  0x60   : > { %578 = vmatpush1.bf16.msra.mxu1 %v1651_v17  ;;  %1186 = vmatprep.subr.bf16.mxu0 %v1650_v25  ;;  %v1711_v17 = vld [vmem:[#allocation2 + $0x354] ss:$8 sps:$4 sm:$0xff]   ;;  %v969_v22 = vsel %vm966_vm3, %v967_v14, %v968_v15 }
  0x61   : > { %579 = vmatprep.subr.bf16.mxu1 %v1652_v24  ;;  %v1717_v24 = vld [vmem:[#allocation2 + $0x364] ss:$8 sps:$4 sm:$0xff]   ;;  %v957_v25 = vld [vmem:[#allocation2 + $0x370] sm:$0x77] }
  0x62   : > { %v1515_v28 = vcombine.high %v957_v25, %v957_v25  ;;  %v1514_v29 = vcombine.low %v957_v25, %v957_v25 }
  0x63   : > { %1187 = vmatpush1.bf16.msra.mxu0 %v1648_v30  ;;  %v1723_v30 = vld [vmem:[#allocation2 + $0x90] ss:$8 sps:$4 sm:$0xff]  }
  0x64   : > { %580 = vmatpush1.bf16.msra.mxu1 %v1657_v26  ;;  %1188 = vmatprep.subr.bf16.mxu0 %v1656_v32  ;;  %v1718_v26 = vld [vmem:[#allocation2 + $0x80] ss:$8 sps:$4 sm:$0xff]   ;;  %v1167_v32 = vsel %vm544_vm0, %v1514_v29, 0 }
  0x65   : > { %581 = vmatprep.subr.bf16.mxu1 %v1658_v31  ;;  %v1729_v31 = vld [vmem:[#allocation2 + $0xa4] ss:$8 sps:$4 sm:$0xff]  }
  0x67   : > { %1189 = vmatpush1.bf16.msra.mxu0 %v1654_v33  ;;  %v1727_v33 = vld [vmem:[#allocation2 + $0xa0] ss:$8 sps:$4 sm:$0xff]  }
  0x68   : > { %582 = vmatpush1.bf16.msra.mxu1 %v1663_v34  ;;  %1190 = vmatprep.subr.bf16.mxu0 %v1662_v41  ;;  %v1732_v34 = vld [vmem:[#allocation2 + $0xb4] ss:$8 sps:$4 sm:$0xff]  }
  0x69   : > { %832 = vmatprep.subr.bf16.mxu1 %v1670_v38  ;;  %v1736_v38 = vld [vmem:[#allocation2 + $0xd0] ss:$8 sps:$4 sm:$0xff]   ;;  %v1744_v41 = vld [vmem:[#allocation2 + $0xf4] ss:$8 sps:$4 sm:$0xff]  }
  0x6b   : > { %584 = vmatmul.mubr.bf16.vlgmr.msra.gmra.mrb[0].mxu1 %v328_v44  ;;  %1191 = vmatpush1.bf16.msra.mxu0 %v1660_v42  ;;  %v1742_v42 = vld [vmem:[#allocation2 + $0xf0] ss:$8 sps:$4 sm:$0xff]  }
  0x6c   : > { %833 = vmatpush1.bf16.msra.mxu1 %v1668_v45  ;;  %864 = vmatprep.mubr.bf16.mxu1 %v1893_v2  ;;  %v1692_v2 = vld [vmem:[#allocation2 + $0x40] ss:$8 sps:$4 sm:$0xff]  }
  0x6d   : > { %834 = vmatprep.subr.bf16.mxu1 %v1676_v46  ;;  %1192 = vmatprep.subr.bf16.mxu0 %v1673_v48 }
  0x6f   : > { %1193 = vmatpush1.bf16.msra.mxu0 %v1671_v50 }
  0x70   : > { %835 = vmatpush1.bf16.msra.mxu1 %v1674_v49  ;;  %1194 = vmatprep.subr.bf16.mxu0 %v1679_v53 }
  0x71   : > { %836 = vmatprep.subr.bf16.mxu1 %v1682_v51 }
  0x73   : > { %1195 = vmatpush1.bf16.msra.mxu0 %v1677_v58 }
  0x74   : > { %837 = vmatpush1.bf16.msra.mxu1 %v1680_v56  ;;  %1196 = vmatprep.subr.bf16.mxu0 %v1685_v60 }
  0x75   : > { %838 = vmatprep.subr.bf16.mxu1 %v1688_v59  ;;  %v1264_v59 = vlaneseq }
  0x77   : > { %1197 = vmatpush1.bf16.msra.mxu0 %v1683_v1  ;;  %v1265_v60 = vshrl.u32 %v1264_v59, 7 }
  0x78   : > { %839 = vmatpush1.bf16.msra.mxu1 %v1686_v63  ;;  %1198 = vmatprep.subr.bf16.mxu0 %v1691_v20 }
  0x79   : > { %840 = vmatprep.subr.bf16.mxu1 %v1694_v18  ;;  %v1270_v63 = vsub.s32 1, %v1265_v60  ;;  %v1278_v18 = vld [vmem:[%s1950_s3] sm:$0x3] }
  0x7b   : > { %1199 = vmatpush1.bf16.msra.mxu0 %v1689_v3 }
  0x7c   : > { %841 = vmatpush1.bf16.msra.mxu1 %v1692_v2  ;;  %1200 = vmatprep.subr.bf16.mxu0 %v1697_v5 }
  0x7d   : > { %842 = vmatprep.subr.bf16.mxu1 %v1700_v4 }
  0x7f   : > { %1201 = vmatpush1.bf16.msra.mxu0 %v1695_v7 }
  0x80   : > { %843 = vmatpush1.bf16.msra.mxu1 %v1698_v6  ;;  %1202 = vmatprep.subr.bf16.mxu0 %v1703_v10 }
  0x81   : > { %844 = vmatprep.subr.bf16.mxu1 %v1707_v8 }
  0x83   : > { %1203 = vmatpush1.bf16.msra.mxu0 %v1701_v13  ;;  %v1287_v13 = vrot.slane %v1278_v18, %v1270_v63 }
  0x84   : > { %845 = vmatpush1.bf16.msra.mxu1 %v1705_v11  ;;  %1215 = vmatprep.subr.bf16.mxu0 %v1711_v17 }
  0x85   : > { %846 = vmatprep.subr.bf16.mxu1 %v1714_v16 }
  0x86   : > { %1205 = vmatmul.mubr.bf16.vlgmr.msra.gmra.mrb[4].mxu0 %v969_v22 }
  0x87   : > { %1216 = vmatpush1.bf16.msra.mxu0 %v1709_v23  ;;  %1247 = vmatprep.mubr.bf16.mxu0 %v1788_v0  ;;  %v1735_v0 = vld [vmem:[#allocation2 + $0xc4] ss:$8 sps:$4 sm:$0xff]  }
  0x88   : > { %847 = vmatpush1.bf16.msra.mxu1 %v1712_v19  ;;  %1217 = vmatprep.subr.bf16.mxu0 %v1717_v24 }
  0x89   : > { %848 = vmatprep.subr.bf16.mxu1 %v1720_v61 }
  0x8b   : > { %1218 = vmatpush1.bf16.msra.mxu0 %v1715_v27 }
  0x8c   : > { %849 = vmatpush1.bf16.msra.mxu1 %v1718_v26  ;;  %1516 = vmatprep.subr.msk.bf16.mxu0 %vm544_vm0, %v1515_v28 }
  0x8d   : > { %850 = vmatprep.subr.bf16.mxu1 %v1725_v21 }
  0x8f   : > { %1220 = vmatpush1.bf16.msra.mxu0 %v1167_v32 }
  0x90   : > { %851 = vmatpush1.bf16.msra.mxu1 %v1723_v30 }
  0x91   : > { %852 = vmatprep.subr.bf16.mxu1 %v1729_v31 }
  0x92   : > { %1517 = vmatmul.mubr.msk.bf16.vlgmr.msra.gmra.mrb[4].mxu0 %vm540_vm2, %v1922_v62  ;;  %v1266_v62 = vsub.s32 0, %v1265_v60 }
  0x94   : > { %853 = vmatpush1.bf16.msra.mxu1 %v1727_v33  ;;  %v1283_v8 = vrot.slane %v1278_v18, %v1266_v62 }
  0x95   : > { %854 = vmatprep.subr.bf16.mxu1 %v1732_v34 }
  0x98   : > { %855 = vmatpush1.bf16.msra.mxu1 %v1730_v35 }
  0x99   : > { %856 = vmatprep.subr.bf16.mxu1 %v1735_v0 }
  0x9c   : > { %857 = vmatpush1.bf16.msra.mxu1 %v1733_v36 }
  0x9d   : > { %858 = vmatprep.subr.bf16.mxu1 %v1738_v37 }
  0xa0   : > { %859 = vmatpush1.bf16.msra.mxu1 %v1736_v38 }
  0xa1   : > { %860 = vmatprep.subr.bf16.mxu1 %v1741_v39 }
  0xa4   : > { %861 = vmatpush1.bf16.msra.mxu1 %v1739_v40 }
  0xa5   : > { %862 = vmatprep.subr.bf16.mxu1 %v1744_v41 }
  0xa8   : > { %863 = vmatpush1.bf16.msra.mxu1 %v1742_v42 }
  0xab   : > { %865 = vmatmul.mubr.bf16.vlgmr.msra.gmra.mrb[4].mxu1 %v1901_v12  ;;  %v1262_v12 = vld [vmem:[%s1949_s2] sm:$0x3] }
  0xac   : > { %v1267_v2 = vrot.slane %v1262_v12, %v1266_v62  ;;  %v1271_v5 = vrot.slane %v1262_v12, %v1270_v63 }
 0x10d   : > { %v628_v43 = vpop.f32.mrb[0].mxu0 }
 0x10e   : > { %v630_v44 = vpop.f32.mrb[1].mxu0 }
 0x10f   : > { %v632_v45 = vpop.f32.mrb[2].mxu0 }
 0x110   : > { %v634_v46 = vpop.f32.mrb[3].mxu0 }
 0x13e   : > { %v585_v47 = vpop.f32.mrb[0].mxu1 }
 0x13f   : > { %v629_v48 = vadd.f32 %v628_v43, %v585_v47  ;;  %v587_v49 = vpop.f32.mrb[1].mxu1 }
 0x140   : > { %v631_v50 = vadd.f32 %v630_v44, %v587_v49  ;;  %v589_v51 = vpop.f32.mrb[2].mxu1 }
 0x141   : > { %v633_v52 = vadd.f32 %v632_v45, %v589_v51  ;;  %v591_v53 = vpop.f32.mrb[3].mxu1 }
 0x142   : > { %v635_v54 = vadd.f32 %v634_v46, %v591_v53 }
 0x165   : > { %v1249_v55 = vpop.f32.mrb[4].mxu0 }
 0x166   : > { %v1251_v56 = vpop.f32.mrb[5].mxu0 }
 0x167   : > { %v1253_v57 = vpop.f32.mrb[6].mxu0 }
 0x168   : > { %v1255_v58 = vpop.f32.mrb[7].mxu0 }
 0x17e   : > { %v866_v1 = vpop.f32.mrb[4].mxu1 }
 0x17f   : > { %v867_v20 = vadd.f32 %v866_v1, %v629_v48  ;;  %v868_v3 = vpop.f32.mrb[5].mxu1 }
 0x180   : > { %v869_v4 = vadd.f32 %v868_v3, %v631_v50  ;;  %v870_v6 = vpop.f32.mrb[6].mxu1 }
 0x181   : > { %v1527_v7 = vadd.f32 %v1249_v55, %v867_v20  ;;  %v871_v9 = vadd.f32 %v870_v6, %v633_v52  ;;  %v872_v10 = vpop.f32.mrb[7].mxu1 }
 0x182   : > { %v1530_v11 = vadd.f32 %v1251_v56, %v869_v4  ;;  %v873_v14 = vadd.f32 %v872_v10, %v635_v54 }
 0x183   : > { %v1274_v15 = vmul.f32 %v1527_v7, %v1267_v2  ;;  %v1533_v16 = vadd.f32 %v1253_v57, %v871_v9 }
 0x184   : > { %v1275_v17 = vmul.f32 %v1530_v11, %v1271_v5  ;;  %v1536_v19 = vadd.f32 %v1255_v58, %v873_v14 }
 0x185   : > { %v1290_v22 = vadd.f32 %v1283_v8, %v1274_v15  ;;  %v1276_v23 = vmul.f32 %v1533_v16, %v1267_v2 }
 0x186   : > { %v1291_v61 = vadd.f32 %v1287_v13, %v1275_v17  ;;  %v1277_v24 = vmul.f32 %v1536_v19, %v1271_v5 }
 0x187   : > { %v1294_v25 = vmax.f32 %v1290_v22, 0.0  ;;  %v1292_v26 = vadd.f32 %v1283_v8, %v1276_v23 }
 0x188   : > { %v1295_v27 = vmax.f32 %v1291_v61, 0.0  ;;  %v1293_v21 = vadd.f32 %v1287_v13, %v1277_v24 }
 0x189   : > { %v1296_v28 = vmax.f32 %v1292_v26, 0.0 }
 0x18a   : > { %v1523_v29 = vpack.c.bf16 %v1295_v27, %v1294_v25  ;;  %v1297_v30 = vmax.f32 %v1293_v21, 0.0 }
 0x18c   : > { %1310 = vst [vmem:[%s212_s20] sm:$0xff] %v1523_v29  ;;  %v1524_v31 = vpack.c.bf16 %v1297_v30, %v1296_v28 }
 0x18e   : > { %1311 = vst [vmem:[%s212_s20 + $0x8] sm:$0xff] %v1524_v31 }
 0x18f PF: > { %s15_s15 = sadd.s32 1, %s1783_s15  }
 0x190   : > { %p12_p3 = scmp.ge.s32.totalorder %s15_s15, 4  }
 0x192   :  { %14 = sbr.rel (!%p12_p3) target bundleno = 1 (0x1), region = 73 }
 0x199   :  { %1333 = vsyncpa [#allocation3], 1 }
 0x19a   :  { %1335 = vsyncpa [#allocation3 + $0x1], 1 }

// kernel: _lambda_.27
= control target key start
LH: loop header
LB: loop body
LE: loop exit
PB: predicated region body
PF: predicated region fallthrough
CT: control target
= control target key end

     0   :  { %s905_s18 = smov 0   ;;  %s1042_s0 = inlined_call_operand.vmem [shape: bf16[2,10,128], index: 0, kind: input, shape index: {}]   ;;  %s1043_s1 = inlined_call_operand.vmem [shape: bf16[3,128,128], index: 1, kind: input, shape index: {}]   ;;  %s1044_s2 = inlined_call_operand.vmem [shape: f32[1,128], index: 2, kind: input, shape index: {}]   ;;  %s1045_s3 = inlined_call_operand.vmem [shape: f32[1,128], index: 3, kind: input, shape index: {}]   ;;  %s1046_s4 = inlined_call_operand.vmem [shape: bf16[2,8,128], index: 4, kind: input, shape index: {}]   ;;  %s1047_s5 = inlined_call_operand.vmem [shape: bf16[2,8,128], index: 5, kind: output, shape index: {}]  }
   0x1 LB: > { %s665_s19 = sadd.s32 4294967295, %s871_s18   ;;  %p669_p0 = scmp.ge.s32.totalorder %s871_s18, 1  ;;  %s871_s18 = sphi %s905_s18, %s15_s18  }
   0x2   : > { %p196_p1 = scmp.lt.s32.totalorder %s871_s18, 3 }
   0x4   : > { %p197_p2 = pnand %p669_p0, %p196_p1 }
   0x5   : > { %v839_v0 = vld [vmem:[%s1043_s1] sm:$0xff] (!%p197_p2)   ;;  %v873_v1 = vmov (!%p197_p2), 0.0   ;;  %v840_v2 = vld [vmem:[%s1043_s1 + $0x8] sm:$0xff] (!%p197_p2)   ;;  %vm874_vm0 = vmmov (!%p197_p2), 0   ;;  %v841_v3 = vld [vmem:[%s1043_s1 + $0x10] sm:$0xff] (!%p197_p2)   ;;  %p227_p3 = scmp.lt.s32.totalorder (!%p197_p2), %s665_s19, 1 }
   0x6   : > { %200 = sbr.rel (%p197_p2) target bundleno = 297 (0x129), region = 40  ;;  %784 = vmatprep.subr.bf16.mxu0 (!%p197_p2), %v873_v1  ;;  %764 = vmatprep.subr.bf16.mxu1 (!%p197_p2), %v873_v1  ;;  %v847_v4 = vld [vmem:[%s1043_s1 + $0x40] sm:$0xff] (!%p197_p2)   ;;  %v842_v5 = vld [vmem:[%s1043_s1 + $0x18] sm:$0xff] (!%p197_p2)   ;;  %v851_v6 = vld [vmem:[%s1043_s1 + $0x48] sm:$0xff] (!%p197_p2)  }
   0x7   : > { %785 = vmatpush3.bf16.msra.mxu0 (!%p197_p2), %v839_v0  ;;  %800 = vmatprep.mubr.msk.bf16.mxu0 (!%p197_p2), %vm874_vm0, %v873_v1  ;;  %v843_v7 = vld [vmem:[%s1043_s1 + $0x20] sm:$0xff] (!%p197_p2)   ;;  %v853_v8 = vld [vmem:[%s1043_s1 + $0x50] sm:$0xff] (!%p197_p2)   ;;  %v844_v9 = vld [vmem:[%s1043_s1 + $0x28] sm:$0xff] (!%p197_p2)  }
   0x8   : > { %786 = vmatprep.subr.bf16.mxu0 (!%p197_p2), %v873_v1  ;;  %780 = vmatprep.mubr.msk.bf16.mxu1 (!%p197_p2), %vm874_vm0, %v873_v1  ;;  %v855_v10 = vld [vmem:[%s1043_s1 + $0x58] sm:$0xff] (!%p197_p2)   ;;  %v845_v11 = vld [vmem:[%s1043_s1 + $0x30] sm:$0xff] (!%p197_p2)   ;;  %v857_v13 = vld [vmem:[%s1043_s1 + $0x60] sm:$0xff] (!%p197_p2)  }
   0x9   : > { %765 = vmatpush3.bf16.msra.mxu1 (!%p197_p2), %v847_v4  ;;  %v846_v16 = vld [vmem:[%s1043_s1 + $0x38] sm:$0xff] (!%p197_p2)   ;;  %v859_v17 = vld [vmem:[%s1043_s1 + $0x68] sm:$0xff] (!%p197_p2)   ;;  %v850_v19 = vld [vmem:[%s1043_s1 + $0x80] sm:$0xff] (!%p197_p2)  }
   0xa   : > { %766 = vmatprep.subr.bf16.mxu1 (!%p197_p2), %v873_v1  ;;  %v861_v20 = vld [vmem:[%s1043_s1 + $0x70] sm:$0xff] (!%p197_p2)   ;;  %v852_v23 = vld [vmem:[%s1043_s1 + $0x88] sm:$0xff] (!%p197_p2)   ;;  %v863_v24 = vld [vmem:[%s1043_s1 + $0x78] sm:$0xff] (!%p197_p2)  }
   0xb   : > { %787 = vmatpush3.bf16.msra.mxu0 (!%p197_p2), %v840_v2  ;;  %v854_v26 = vld [vmem:[%s1043_s1 + $0x90] sm:$0xff] (!%p197_p2)   ;;  %v856_v27 = vld [vmem:[%s1043_s1 + $0x98] sm:$0xff] (!%p197_p2)   ;;  %v858_v28 = vld [vmem:[%s1043_s1 + $0xa0] sm:$0xff] (!%p197_p2)  }
   0xc   : > { %788 = vmatprep.subr.bf16.mxu0 (!%p197_p2), %v873_v1  ;;  %v860_v29 = vld [vmem:[%s1043_s1 + $0xa8] sm:$0xff] (!%p197_p2)   ;;  %v862_v31 = vld [vmem:[%s1043_s1 + $0xb0] sm:$0xff] (!%p197_p2)   ;;  %v864_v33 = vld [vmem:[%s1043_s1 + $0xb8] sm:$0xff] (!%p197_p2)  }
   0xd   : > { %s1049_s19 = smov (!%p227_p3, %s665_s19), 1  ;;  %767 = vmatpush3.bf16.msra.mxu1 %v851_v6  ;;  %v732_v40 = vld [vmem:[%s1044_s2] ss:$0 sm:$0xff] }
   0xe   : > { %768 = vmatprep.subr.bf16.mxu1 %v873_v1  ;;  %s736_s13 = sshll.u32 %s1049_s19, 3  ;;  %v733_v43 = vld [vmem:[%s1045_s3] ss:$0 sm:$0xff] }
   0xf   : > { %789 = vmatpush3.bf16.msra.mxu0 %v841_v3  ;;  %s966_s22 = scalar_lea.vmem %s1042_s0, %s736_s13 }
  0x10   : > { %790 = vmatprep.subr.bf16.mxu0 %v873_v1  ;;  %v258_v12 = vld [vmem:[%s966_s22 + $0x4] sm:$0x1]  ;;  %v241_v14 = vld [vmem:[%s966_s22] sm:$0xf] }
  0x11   : > { %769 = vmatpush3.bf16.msra.mxu1 %v853_v8  ;;  %v690_v15 = vcombine.low %v241_v14, %v258_v12  ;;  %v465_v30 = vld [vmem:[%s966_s22] sm:$0xe]  ;;  %s672_s22 = sshll.u32 %s1049_s19, 2 }
  0x12   : > { %770 = vmatprep.subr.bf16.mxu1 %v873_v1  ;;  %v723_v32 = vcombine.low %v465_v30, %v258_v12  ;;  %s235_s29 = scalar_lea.vmem %s1046_s4, %s672_s22  ;;  %s239_s10 = scalar_lea.vmem %s1047_s5, %s672_s22 }
  0x13   : > { %791 = vmatpush3.bf16.msra.mxu0 %v842_v5  ;;  %v284_v18 = vshll.u32 %v690_v15, 16  ;;  %v282_v21 = vshrl.u32 %v690_v15, 16  ;;  %v594_v44 = vld [vmem:[%s235_s29] sm:$0xf] }
  0x14   : > { %792 = vmatprep.subr.bf16.mxu0 %v873_v1  ;;  %v486_v34 = vrot.slane %v723_v32, 1  ;;  %v595_v49 = vunpack.c.l.bf16 %v594_v44 }
  0x15   : > { %771 = vmatpush3.bf16.msra.mxu1 %v855_v10  ;;  %v286_v22 = vrot.slane %v284_v18, 1 }
  0x16   : > { %772 = vmatprep.subr.bf16.mxu1 %v873_v1 }
  0x17   : > { %793 = vmatpush3.bf16.msra.mxu0 %v843_v7  ;;  %v287_v25 = vor.u32 %v286_v22, %v282_v21 }
  0x18   : > { %794 = vmatprep.subr.bf16.mxu0 %v873_v1 }
  0x19   : > { %773 = vmatpush3.bf16.msra.mxu1 %v857_v13 }
  0x1a   : > { %774 = vmatprep.subr.bf16.mxu1 %v873_v1 }
  0x1b   : > { %795 = vmatpush3.bf16.msra.mxu0 %v844_v9 }
  0x1c   : > { %796 = vmatprep.subr.bf16.mxu0 %v873_v1 }
  0x1d   : > { %775 = vmatpush3.bf16.msra.mxu1 %v859_v17 }
  0x1e   : > { %776 = vmatprep.subr.bf16.mxu1 %v873_v1 }
  0x1f   : > { %797 = vmatpush3.bf16.msra.mxu0 %v845_v11 }
  0x20   : > { %798 = vmatprep.subr.bf16.mxu0 %v873_v1 }
  0x21   : > { %777 = vmatpush3.bf16.msra.mxu1 %v861_v20 }
  0x22   : > { %778 = vmatprep.subr.bf16.mxu1 %v873_v1 }
  0x23   : > { %799 = vmatpush3.bf16.msra.mxu0 %v846_v16 }
  0x24   : > { %804 = vmatprep.subr.bf16.mxu0 %v873_v1 }
  0x25   : > { %779 = vmatpush3.bf16.msra.mxu1 %v863_v24 }
  0x26   : > { %801 = vmatmul.mubr.bf16.vlgmr.msra.gmra.mrb[0].mxu0 %v241_v14 }
  0x27   : > { %805 = vmatpush3.bf16.msra.mxu0 %v850_v19  ;;  %820 = vmatprep.mubr.msk.bf16.mxu0 %vm874_vm0, %v873_v1 }
  0x28   : > { %806 = vmatprep.subr.bf16.mxu0 %v873_v1  ;;  %781 = vmatmul.mubr.bf16.vlgmr.msra.gmra.mrb[0].mxu1 %v287_v25 }
  0x2b   : > { %807 = vmatpush3.bf16.msra.mxu0 %v852_v23 }
  0x2c   : > { %808 = vmatprep.subr.bf16.mxu0 %v873_v1 }
  0x2f   : > { %809 = vmatpush3.bf16.msra.mxu0 %v854_v26 }
  0x30   : > { %810 = vmatprep.subr.bf16.mxu0 %v873_v1 }
  0x33   : > { %811 = vmatpush3.bf16.msra.mxu0 %v856_v27 }
  0x34   : > { %812 = vmatprep.subr.bf16.mxu0 %v873_v1 }
  0x37   : > { %813 = vmatpush3.bf16.msra.mxu0 %v858_v28 }
  0x38   : > { %814 = vmatprep.subr.bf16.mxu0 %v873_v1 }
  0x3b   : > { %815 = vmatpush3.bf16.msra.mxu0 %v860_v29 }
  0x3c   : > { %816 = vmatprep.subr.bf16.mxu0 %v873_v1 }
  0x3f   : > { %817 = vmatpush3.bf16.msra.mxu0 %v862_v31 }
  0x40   : > { %818 = vmatprep.subr.bf16.mxu0 %v873_v1 }
  0x43   : > { %819 = vmatpush3.bf16.msra.mxu0 %v864_v33 }
  0x46   : > { %821 = vmatmul.mubr.bf16.vlgmr.msra.gmra.mrb[0].mxu0 %v486_v34 }
  0xfb   : > { %v371_v35 = vpop.f32.mrb[0].mxu1 }
  0xfc   : > { %v782_v36 = vpop.f32.mrb[1].mxu1 }
  0xfd   : > { %v374_v37 = vpop.f32.mrb[2].mxu1 }
  0xfe   : > { %v783_v38 = vpop.f32.mrb[3].mxu1 }
 0x119   : > { %v570_v39 = vpop.f32.mrb[0].mxu0 }
 0x11a   : > { %v824_v41 = vadd.f32 %v570_v39, %v371_v35  ;;  %v822_v42 = vpop.f32.mrb[1].mxu0 }
 0x11b   : > { %v573_v45 = vpop.f32.mrb[2].mxu0 }
 0x11c   : > { %v584_v46 = vmul.f32 %v824_v41, %v732_v40  ;;  %v823_v47 = vpop.f32.mrb[3].mxu0 }
 0x11e   : > { %v592_v48 = vadd.f32 %v733_v43, %v584_v46 }
 0x120   : > { %v593_v50 = vmax.f32 %v592_v48, 0.0 }
 0x122   : > { %v596_v51 = vadd.f32 %v595_v49, %v593_v50 }
 0x124   : > { %v597_v52 = vmax.f32 %v596_v51, 0.0 }
 0x126   : > { %v598_v53 = vpack.c.bf16 %v597_v52, %v597_v52 }
 0x128   : > { %599 = vst [vmem:[%s239_s10] sm:$0xf] %v598_v53 }
 0x129 PF: > { %s15_s18 = sadd.s32 1, %s871_s18  }
 0x12a   : > { %p12_p4 = scmp.ge.s32.totalorder %s15_s18, 4  }
 0x12c   :  { %14 = sbr.rel (!%p12_p4) target bundleno = 1 (0x1), region = 75 }

// kernel: _lambda_.28
= control target key start
LH: loop header
LB: loop body
LE: loop exit
PB: predicated region body
PF: predicated region fallthrough
CT: control target
= control target key end

     0   :  { %s839_s15 = smov 0   ;;  %s973_s0 = inlined_call_operand.vmem [shape: bf16[2,10,128], index: 0, kind: input, shape index: {}]   ;;  %s974_s1 = inlined_call_operand.vmem [shape: bf16[3,128,128], index: 1, kind: input, shape index: {}]   ;;  %s975_s2 = inlined_call_operand.vmem [shape: f32[1,128], index: 2, kind: input, shape index: {}]   ;;  %s976_s3 = inlined_call_operand.vmem [shape: f32[1,128], index: 3, kind: input, shape index: {}]   ;;  %s977_s4 = inlined_call_operand.vmem [shape: bf16[2,8,128], index: 4, kind: output, shape index: {}]  }
   0x1 LB: > { %s605_s16 = sadd.s32 4294967295, %s810_s15   ;;  %p609_p0 = scmp.ge.s32.totalorder %s810_s15, 1  ;;  %s810_s15 = sphi %s839_s15, %s14_s15  }
   0x2   : > { %p162_p1 = scmp.lt.s32.totalorder %s810_s15, 3 }
   0x4   : > { %p163_p2 = pnand %p609_p0, %p162_p1 }
   0x5   : > { %v778_v0 = vld [vmem:[%s974_s1] sm:$0xff] (!%p163_p2)   ;;  %v812_v1 = vmov (!%p163_p2), 0.0   ;;  %v779_v2 = vld [vmem:[%s974_s1 + $0x8] sm:$0xff] (!%p163_p2)   ;;  %vm813_vm0 = vmmov (!%p163_p2), 0   ;;  %v780_v3 = vld [vmem:[%s974_s1 + $0x10] sm:$0xff] (!%p163_p2)   ;;  %p187_p3 = scmp.lt.s32.totalorder (!%p163_p2), %s605_s16, 1 }
   0x6   : > { %166 = sbr.rel (%p163_p2) target bundleno = 293 (0x125), region = 36  ;;  %723 = vmatprep.subr.bf16.mxu0 (!%p163_p2), %v812_v1  ;;  %703 = vmatprep.subr.bf16.mxu1 (!%p163_p2), %v812_v1  ;;  %v786_v4 = vld [vmem:[%s974_s1 + $0x40] sm:$0xff] (!%p163_p2)   ;;  %v781_v5 = vld [vmem:[%s974_s1 + $0x18] sm:$0xff] (!%p163_p2)   ;;  %v790_v6 = vld [vmem:[%s974_s1 + $0x48] sm:$0xff] (!%p163_p2)  }
   0x7   : > { %724 = vmatpush3.bf16.msra.mxu0 (!%p163_p2), %v778_v0  ;;  %739 = vmatprep.mubr.msk.bf16.mxu0 (!%p163_p2), %vm813_vm0, %v812_v1  ;;  %v782_v7 = vld [vmem:[%s974_s1 + $0x20] sm:$0xff] (!%p163_p2)   ;;  %v792_v8 = vld [vmem:[%s974_s1 + $0x50] sm:$0xff] (!%p163_p2)   ;;  %v783_v9 = vld [vmem:[%s974_s1 + $0x28] sm:$0xff] (!%p163_p2)  }
   0x8   : > { %725 = vmatprep.subr.bf16.mxu0 (!%p163_p2), %v812_v1  ;;  %719 = vmatprep.mubr.msk.bf16.mxu1 (!%p163_p2), %vm813_vm0, %v812_v1  ;;  %v794_v10 = vld [vmem:[%s974_s1 + $0x58] sm:$0xff] (!%p163_p2)   ;;  %v784_v11 = vld [vmem:[%s974_s1 + $0x30] sm:$0xff] (!%p163_p2)   ;;  %v796_v13 = vld [vmem:[%s974_s1 + $0x60] sm:$0xff] (!%p163_p2)  }
   0x9   : > { %704 = vmatpush3.bf16.msra.mxu1 (!%p163_p2), %v786_v4  ;;  %v785_v16 = vld [vmem:[%s974_s1 + $0x38] sm:$0xff] (!%p163_p2)   ;;  %v798_v17 = vld [vmem:[%s974_s1 + $0x68] sm:$0xff] (!%p163_p2)   ;;  %v789_v19 = vld [vmem:[%s974_s1 + $0x80] sm:$0xff] (!%p163_p2)  }
   0xa   : > { %705 = vmatprep.subr.bf16.mxu1 (!%p163_p2), %v812_v1  ;;  %v800_v20 = vld [vmem:[%s974_s1 + $0x70] sm:$0xff] (!%p163_p2)   ;;  %v791_v23 = vld [vmem:[%s974_s1 + $0x88] sm:$0xff] (!%p163_p2)   ;;  %v802_v24 = vld [vmem:[%s974_s1 + $0x78] sm:$0xff] (!%p163_p2)  }
   0xb   : > { %726 = vmatpush3.bf16.msra.mxu0 (!%p163_p2), %v779_v2  ;;  %v793_v26 = vld [vmem:[%s974_s1 + $0x90] sm:$0xff] (!%p163_p2)   ;;  %v795_v27 = vld [vmem:[%s974_s1 + $0x98] sm:$0xff] (!%p163_p2)   ;;  %v797_v28 = vld [vmem:[%s974_s1 + $0xa0] sm:$0xff] (!%p163_p2)  }
   0xc   : > { %727 = vmatprep.subr.bf16.mxu0 (!%p163_p2), %v812_v1  ;;  %v799_v29 = vld [vmem:[%s974_s1 + $0xa8] sm:$0xff] (!%p163_p2)   ;;  %v801_v31 = vld [vmem:[%s974_s1 + $0xb0] sm:$0xff] (!%p163_p2)   ;;  %v803_v33 = vld [vmem:[%s974_s1 + $0xb8] sm:$0xff] (!%p163_p2)  }
   0xd   : > { %s979_s16 = smov (!%p187_p3, %s605_s16), 1  ;;  %706 = vmatpush3.bf16.msra.mxu1 %v790_v6  ;;  %v671_v40 = vld [vmem:[%s975_s2] ss:$0 sm:$0xff] }
   0xe   : > { %707 = vmatprep.subr.bf16.mxu1 %v812_v1  ;;  %s675_s9 = sshll.u32 %s979_s16, 3  ;;  %v672_v43 = vld [vmem:[%s976_s3] ss:$0 sm:$0xff]  ;;  %s612_s25 = sshll.u32 %s979_s16, 2 }
   0xf   : > { %728 = vmatpush3.bf16.msra.mxu0 %v780_v3  ;;  %s900_s18 = scalar_lea.vmem %s973_s0, %s675_s9  ;;  %s195_s28 = scalar_lea.vmem %s977_s4, %s612_s25 }
  0x10   : > { %729 = vmatprep.subr.bf16.mxu0 %v812_v1  ;;  %v214_v12 = vld [vmem:[%s900_s18 + $0x4] sm:$0x1]  ;;  %v197_v14 = vld [vmem:[%s900_s18] sm:$0xf] }
  0x11   : > { %708 = vmatpush3.bf16.msra.mxu1 %v792_v8  ;;  %v629_v15 = vcombine.low %v197_v14, %v214_v12  ;;  %v421_v30 = vld [vmem:[%s900_s18] sm:$0xe] }
  0x12   : > { %709 = vmatprep.subr.bf16.mxu1 %v812_v1  ;;  %v662_v32 = vcombine.low %v421_v30, %v214_v12 }
  0x13   : > { %730 = vmatpush3.bf16.msra.mxu0 %v781_v5  ;;  %v240_v18 = vshll.u32 %v629_v15, 16  ;;  %v238_v21 = vshrl.u32 %v629_v15, 16 }
  0x14   : > { %731 = vmatprep.subr.bf16.mxu0 %v812_v1  ;;  %v442_v34 = vrot.slane %v662_v32, 1 }
  0x15   : > { %710 = vmatpush3.bf16.msra.mxu1 %v794_v10  ;;  %v242_v22 = vrot.slane %v240_v18, 1 }
  0x16   : > { %711 = vmatprep.subr.bf16.mxu1 %v812_v1 }
  0x17   : > { %732 = vmatpush3.bf16.msra.mxu0 %v782_v7  ;;  %v243_v25 = vor.u32 %v242_v22, %v238_v21 }
  0x18   : > { %733 = vmatprep.subr.bf16.mxu0 %v812_v1 }
  0x19   : > { %712 = vmatpush3.bf16.msra.mxu1 %v796_v13 }
  0x1a   : > { %713 = vmatprep.subr.bf16.mxu1 %v812_v1 }
  0x1b   : > { %734 = vmatpush3.bf16.msra.mxu0 %v783_v9 }
  0x1c   : > { %735 = vmatprep.subr.bf16.mxu0 %v812_v1 }
  0x1d   : > { %714 = vmatpush3.bf16.msra.mxu1 %v798_v17 }
  0x1e   : > { %715 = vmatprep.subr.bf16.mxu1 %v812_v1 }
  0x1f   : > { %736 = vmatpush3.bf16.msra.mxu0 %v784_v11 }
  0x20   : > { %737 = vmatprep.subr.bf16.mxu0 %v812_v1 }
  0x21   : > { %716 = vmatpush3.bf16.msra.mxu1 %v800_v20 }
  0x22   : > { %717 = vmatprep.subr.bf16.mxu1 %v812_v1 }
  0x23   : > { %738 = vmatpush3.bf16.msra.mxu0 %v785_v16 }
  0x24   : > { %743 = vmatprep.subr.bf16.mxu0 %v812_v1 }
  0x25   : > { %718 = vmatpush3.bf16.msra.mxu1 %v802_v24 }
  0x26   : > { %740 = vmatmul.mubr.bf16.vlgmr.msra.gmra.mrb[0].mxu0 %v197_v14 }
  0x27   : > { %744 = vmatpush3.bf16.msra.mxu0 %v789_v19  ;;  %759 = vmatprep.mubr.msk.bf16.mxu0 %vm813_vm0, %v812_v1 }
  0x28   : > { %745 = vmatprep.subr.bf16.mxu0 %v812_v1  ;;  %720 = vmatmul.mubr.bf16.vlgmr.msra.gmra.mrb[0].mxu1 %v243_v25 }
  0x2b   : > { %746 = vmatpush3.bf16.msra.mxu0 %v791_v23 }
  0x2c   : > { %747 = vmatprep.subr.bf16.mxu0 %v812_v1 }
  0x2f   : > { %748 = vmatpush3.bf16.msra.mxu0 %v793_v26 }
  0x30   : > { %749 = vmatprep.subr.bf16.mxu0 %v812_v1 }
  0x33   : > { %750 = vmatpush3.bf16.msra.mxu0 %v795_v27 }
  0x34   : > { %751 = vmatprep.subr.bf16.mxu0 %v812_v1 }
  0x37   : > { %752 = vmatpush3.bf16.msra.mxu0 %v797_v28 }
  0x38   : > { %753 = vmatprep.subr.bf16.mxu0 %v812_v1 }
  0x3b   : > { %754 = vmatpush3.bf16.msra.mxu0 %v799_v29 }
  0x3c   : > { %755 = vmatprep.subr.bf16.mxu0 %v812_v1 }
  0x3f   : > { %756 = vmatpush3.bf16.msra.mxu0 %v801_v31 }
  0x40   : > { %757 = vmatprep.subr.bf16.mxu0 %v812_v1 }
  0x43   : > { %758 = vmatpush3.bf16.msra.mxu0 %v803_v33 }
  0x46   : > { %760 = vmatmul.mubr.bf16.vlgmr.msra.gmra.mrb[0].mxu0 %v442_v34 }
  0xfb   : > { %v327_v35 = vpop.f32.mrb[0].mxu1 }
  0xfc   : > { %v721_v36 = vpop.f32.mrb[1].mxu1 }
  0xfd   : > { %v330_v37 = vpop.f32.mrb[2].mxu1 }
  0xfe   : > { %v722_v38 = vpop.f32.mrb[3].mxu1 }
 0x119   : > { %v526_v39 = vpop.f32.mrb[0].mxu0 }
 0x11a   : > { %v763_v41 = vadd.f32 %v526_v39, %v327_v35  ;;  %v761_v42 = vpop.f32.mrb[1].mxu0 }
 0x11b   : > { %v529_v44 = vpop.f32.mrb[2].mxu0 }
 0x11c   : > { %v540_v45 = vmul.f32 %v763_v41, %v671_v40  ;;  %v762_v46 = vpop.f32.mrb[3].mxu0 }
 0x11e   : > { %v548_v47 = vadd.f32 %v672_v43, %v540_v45 }
 0x120   : > { %v549_v48 = vmax.f32 %v548_v47, 0.0 }
 0x122   : > { %v550_v49 = vpack.c.bf16 %v549_v48, %v549_v48 }
 0x124   : > { %551 = vst [vmem:[%s195_s28] sm:$0xf] %v550_v49 }
 0x125 PF: > { %s14_s15 = sadd.s32 1, %s810_s15  }
 0x126   : > { %p11_p4 = scmp.ge.s32.totalorder %s14_s15, 4  }
 0x128   :  { %13 = sbr.rel (!%p11_p4) target bundleno = 1 (0x1), region = 68 }

// kernel: _lambda_.31
= control target key start
LH: loop header
LB: loop body
LE: loop exit
PB: predicated region body
PF: predicated region fallthrough
CT: control target
= control target key end

     0   :  { %s472_s15 = smov 0   ;;  %s519_s0 = inlined_call_operand.vmem [shape: bf16[2,4,128], index: 0, kind: input, shape index: {}]   ;;  %s520_s1 = inlined_call_operand.vmem [shape: bf16[1,128,64], index: 1, kind: input, shape index: {}]   ;;  %s521_s2 = inlined_call_operand.vmem [shape: f32[1,64], index: 2, kind: input, shape index: {}]   ;;  %s522_s3 = inlined_call_operand.vmem [shape: f32[1,64], index: 3, kind: input, shape index: {}]   ;;  %s523_s4 = inlined_call_operand.vmem [shape: bf16[2,4,64], index: 4, kind: output, shape index: {}]  }
   0x1 LB: > { %s371_s16 = sadd.s32 4294967295, %s443_s15   ;;  %p375_p0 = scmp.ge.s32.totalorder %s443_s15, 1  ;;  %s443_s15 = sphi %s472_s15, %s14_s15  }
   0x2   : > { %p161_p1 = scmp.lt.s32.totalorder %s443_s15, 3 }
   0x4   : > { %p162_p2 = pnand %p375_p0, %p161_p1 }
   0x5   : > { %v429_v0 = vld [vmem:[%s520_s1] sm:$0xff] (!%p162_p2)   ;;  %v445_v1 = vmov (!%p162_p2), 0.0   ;;  %v430_v2 = vld [vmem:[%s520_s1 + $0x8] sm:$0xff] (!%p162_p2)   ;;  %vm446_vm0 = vmmov (!%p162_p2), 0   ;;  %v431_v3 = vld [vmem:[%s520_s1 + $0x10] sm:$0xff] (!%p162_p2)   ;;  %p185_p3 = scmp.lt.s32.totalorder (!%p162_p2), %s371_s16, 1 }
   0x6   : > { %165 = sbr.rel (%p162_p2) target bundleno = 257 (0x101), region = 36  ;;  %399 = vmatprep.subr.bf16.mxu0 (!%p162_p2), %v445_v1  ;;  %415 = vmatprep.mubr.msk.bf16.mxu0 (!%p162_p2), %vm446_vm0, %v445_v1  ;;  %v432_v4 = vld [vmem:[%s520_s1 + $0x18] sm:$0xff] (!%p162_p2)   ;;  %v433_v5 = vld [vmem:[%s520_s1 + $0x20] sm:$0xff] (!%p162_p2)   ;;  %v434_v6 = vld [vmem:[%s520_s1 + $0x28] sm:$0xff] (!%p162_p2)   ;;  %vm316_vm1 = vcmask (!%p162_p2), 517120  }
   0x7   : > { %400 = vmatpush3.bf16.msra.mxu0 (!%p162_p2), %v429_v0  ;;  %v435_v7 = vld [vmem:[%s520_s1 + $0x30] sm:$0xff] (!%p162_p2)   ;;  %v436_v8 = vld [vmem:[%s520_s1 + $0x38] sm:$0xff] (!%p162_p2)   ;;  %v386_v10 = vld [vmem:[%s521_s2] ss:$0 sm:$0xff] (!%p162_p2) }
   0x8   : > { %401 = vmatprep.subr.bf16.mxu0 (!%p162_p2), %v445_v1  ;;  %v387_v12 = vld [vmem:[%s522_s3] ss:$0 sm:$0xff] (!%p162_p2) }
   0xb   : > { %402 = vmatpush3.bf16.msra.mxu0 (!%p162_p2), %v430_v2 }
   0xc   : > { %403 = vmatprep.subr.bf16.mxu0 (!%p162_p2), %v445_v1 }
   0xd   : > { %s525_s16 = smov (!%p185_p3, %s371_s16), 1 }
   0xe   : > { %s376_s5 = sshll.u32 %s525_s16, 1 }
   0xf   : > { %404 = vmatpush3.bf16.msra.mxu0 %v431_v3  ;;  %s188_s10 = scalar_lea.vmem %s519_s0, %s376_s5  ;;  %s192_s18 = scalar_lea.vmem %s523_s4, %s376_s5 }
  0x10   : > { %405 = vmatprep.subr.bf16.mxu0 %v445_v1  ;;  %v194_v9 = vld [vmem:[%s188_s10] sm:$0x3] }
  0x13   : > { %406 = vmatpush3.bf16.msra.mxu0 %v432_v4 }
  0x14   : > { %407 = vmatprep.subr.bf16.mxu0 %v445_v1 }
  0x17   : > { %408 = vmatpush3.bf16.msra.mxu0 %v433_v5 }
  0x18   : > { %409 = vmatprep.subr.bf16.mxu0 %v445_v1 }
  0x1b   : > { %410 = vmatpush3.bf16.msra.mxu0 %v434_v6 }
  0x1c   : > { %411 = vmatprep.subr.bf16.mxu0 %v445_v1 }
  0x1f   : > { %412 = vmatpush3.bf16.msra.mxu0 %v435_v7 }
  0x20   : > { %413 = vmatprep.subr.bf16.mxu0 %v445_v1 }
  0x23   : > { %414 = vmatpush3.bf16.msra.mxu0 %v436_v8 }
  0x26   : > { %416 = vmatmul.mubr.bf16.vlgmr.msra.gmra.mrb[0].mxu0 %v194_v9 }
  0xf9   : > { %v293_v11 = vpop.f32.mrb[0].mxu0 }
  0xfa   : > { %v306_v13 = vmul.f32 %v386_v10, %v293_v11  ;;  %v417_v14 = vpop.f32.mrb[1].mxu0 }
  0xfb   : > { %v296_v15 = vpop.f32.mrb[2].mxu0 }
  0xfc   : > { %v314_v16 = vadd.f32 %v387_v12, %v306_v13  ;;  %v418_v17 = vpop.f32.mrb[3].mxu0 }
  0xfe   : > { %v315_v18 = vpack.c.bf16 %v314_v16, %v314_v16 }
 0x100   : > { %317 = vst.msk [vmem:[%s192_s18] sm:$0x3] %vm316_vm1, %v315_v18 }
 0x101 PF: > { %s14_s15 = sadd.s32 1, %s443_s15  }
 0x102   : > { %p11_p4 = scmp.ge.s32.totalorder %s14_s15, 4  }
 0x104   :  { %13 = sbr.rel (!%p11_p4) target bundleno = 1 (0x1), region = 66 }

// kernel: _lambda_.33
= control target key start
LH: loop header
LB: loop body
LE: loop exit
PB: predicated region body
PF: predicated region fallthrough
CT: control target
= control target key end

     0   :  { %s672_s15 = smov 0   ;;  %s746_s0 = inlined_call_operand.vmem [shape: bf16[2,6,64], index: 0, kind: input, shape index: {}]   ;;  %s747_s1 = inlined_call_operand.vmem [shape: bf16[3,64,64], index: 1, kind: input, shape index: {}]   ;;  %s748_s2 = inlined_call_operand.vmem [shape: f32[1,64], index: 2, kind: input, shape index: {}]   ;;  %s749_s3 = inlined_call_operand.vmem [shape: f32[1,64], index: 3, kind: input, shape index: {}]   ;;  %s750_s4 = inlined_call_operand.vmem [shape: bf16[2,4,64], index: 4, kind: output, shape index: {}]  }
   0x1 LB: > { %s513_s16 = sadd.s32 4294967295, %s643_s15   ;;  %p517_p0 = scmp.ge.s32.totalorder %s643_s15, 1  ;;  %s643_s15 = sphi %s672_s15, %s14_s15  }
   0x2   : > { %p161_p1 = scmp.lt.s32.totalorder %s643_s15, 3 }
   0x4   : > { %p162_p2 = pnand %p517_p0, %p161_p1 }
   0x5   : > { %v623_v0 = vld [vmem:[%s747_s1] sm:$0xff] (!%p162_p2)   ;;  %v645_v1 = vmov (!%p162_p2), 0.0   ;;  %v624_v2 = vld [vmem:[%s747_s1 + $0x8] sm:$0xff] (!%p162_p2)   ;;  %vm646_vm0 = vmmov (!%p162_p2), 0   ;;  %p185_p3 = scmp.lt.s32.totalorder (!%p162_p2), %s513_s16, 1  ;;  %v625_v4 = vld [vmem:[%s747_s1 + $0x10] sm:$0xff] (!%p162_p2)  }
   0x6   : > { %165 = sbr.rel (%p162_p2) target bundleno = 261 (0x105), region = 36  ;;  %584 = vmatprep.subr.bf16.mxu0 (!%p162_p2), %v645_v1  ;;  %572 = vmatprep.subr.bf16.mxu1 (!%p162_p2), %v645_v1  ;;  %v627_v3 = vld [vmem:[%s747_s1 + $0x20] sm:$0xff] (!%p162_p2)   ;;  %v631_v5 = vld [vmem:[%s747_s1 + $0x28] sm:$0xff] (!%p162_p2)   ;;  %v626_v7 = vld [vmem:[%s747_s1 + $0x18] sm:$0xff] (!%p162_p2)   ;;  %vm247_vm1 = vcmask (!%p162_p2), 523264   ;;  %vm458_vm2 = vcmask (!%p162_p2), 517120  }
   0x7   : > { %585 = vmatpush3.bf16.msra.mxu0 (!%p162_p2), %v623_v0  ;;  %592 = vmatprep.mubr.msk.bf16.mxu0 (!%p162_p2), %vm646_vm0, %v645_v1  ;;  %v633_v8 = vld [vmem:[%s747_s1 + $0x30] sm:$0xff] (!%p162_p2)   ;;  %v630_v12 = vld [vmem:[%s747_s1 + $0x40] sm:$0xff] (!%p162_p2)   ;;  %v635_v13 = vld [vmem:[%s747_s1 + $0x38] sm:$0xff] (!%p162_p2)  }
   0x8   : > { %586 = vmatprep.subr.bf16.mxu0 (!%p162_p2), %v645_v1  ;;  %580 = vmatprep.mubr.msk.bf16.mxu1 (!%p162_p2), %vm646_vm0, %v645_v1  ;;  %v632_v16 = vld [vmem:[%s747_s1 + $0x48] sm:$0xff] (!%p162_p2)   ;;  %v634_v17 = vld [vmem:[%s747_s1 + $0x50] sm:$0xff] (!%p162_p2)   ;;  %v636_v19 = vld [vmem:[%s747_s1 + $0x58] sm:$0xff] (!%p162_p2)  }
   0x9   : > { %573 = vmatpush3.bf16.msra.mxu1 (!%p162_p2), %v627_v3  ;;  %v553_v26 = vld [vmem:[%s748_s2] ss:$0 sm:$0xff] (!%p162_p2) }
   0xa   : > { %574 = vmatprep.subr.bf16.mxu1 (!%p162_p2), %v645_v1  ;;  %v554_v29 = vld [vmem:[%s749_s3] ss:$0 sm:$0xff] (!%p162_p2) }
   0xb   : > { %587 = vmatpush3.bf16.msra.mxu0 (!%p162_p2), %v624_v2 }
   0xc   : > { %588 = vmatprep.subr.bf16.mxu0 (!%p162_p2), %v645_v1 }
   0xd   : > { %s752_s16 = smov (!%p185_p3, %s513_s16), 1  ;;  %575 = vmatpush3.bf16.msra.mxu1 %v631_v5 }
   0xe   : > { %s518_s25 = sshll.u32 %s752_s16, 2  ;;  %576 = vmatprep.subr.bf16.mxu1 %v645_v1 }
   0xf   : > { %s700_s28 = scalar_lea.vmem %s746_s0, %s518_s25  ;;  %589 = vmatpush3.bf16.msra.mxu0 %v625_v4  ;;  %s519_s25 = sshll.u32 %s752_s16, 1 }
  0x10   : > { %v628_v6 = vld [vmem:[%s700_s28] ss:$0 sps:$4 sm:$0x77]   ;;  %590 = vmatprep.subr.bf16.mxu0 %v645_v1 }
  0x11   : > { %v217_v9 = vshrl.u32 %v628_v6, 16  ;;  %v219_v10 = vshll.u32 %v628_v6, 16  ;;  %v194_v11 = vld [vmem:[%s700_s28] sm:$0x3]  ;;  %577 = vmatpush3.bf16.msra.mxu1 %v633_v8 }
  0x12   : > { %578 = vmatprep.subr.bf16.mxu1 %v645_v1  ;;  %v629_v18 = vld [vmem:[%s700_s28] ss:$0 sps:$4 sm:$0x66]   ;;  %s192_s28 = scalar_lea.vmem %s750_s4, %s519_s25 }
  0x13   : > { %591 = vmatpush3.bf16.msra.mxu0 %v626_v7  ;;  %v221_v14 = vrot.slane %v219_v10, 1  ;;  %v371_v20 = vrot.slane %v629_v18, 1 }
  0x14   : > { %596 = vmatprep.subr.bf16.mxu0 %v645_v1 }
  0x15   : > { %v222_v15 = vor.u32 %v221_v14, %v217_v9  ;;  %579 = vmatpush3.bf16.msra.mxu1 %v635_v13 }
  0x16   : > { %593 = vmatmul.mubr.msk.bf16.vlgmr.msra.gmra.mrb[0].mxu0 %vm247_vm1, %v194_v11 }
  0x17   : > { %597 = vmatpush3.bf16.msra.mxu0 %v630_v12  ;;  %604 = vmatprep.mubr.msk.bf16.mxu0 %vm646_vm0, %v645_v1 }
  0x18   : > { %598 = vmatprep.subr.bf16.mxu0 %v645_v1  ;;  %581 = vmatmul.mubr.msk.bf16.vlgmr.msra.gmra.mrb[0].mxu1 %vm247_vm1, %v222_v15 }
  0x1b   : > { %599 = vmatpush3.bf16.msra.mxu0 %v632_v16 }
  0x1c   : > { %600 = vmatprep.subr.bf16.mxu0 %v645_v1 }
  0x1f   : > { %601 = vmatpush3.bf16.msra.mxu0 %v634_v17 }
  0x20   : > { %602 = vmatprep.subr.bf16.mxu0 %v645_v1 }
  0x23   : > { %603 = vmatpush3.bf16.msra.mxu0 %v636_v19 }
  0x26   : > { %605 = vmatmul.mubr.msk.bf16.vlgmr.msra.gmra.mrb[0].mxu0 %vm247_vm1, %v371_v20 }
  0xeb   : > { %v285_v21 = vpop.f32.mrb[0].mxu1 }
  0xec   : > { %v582_v22 = vpop.f32.mrb[1].mxu1 }
  0xed   : > { %v288_v23 = vpop.f32.mrb[2].mxu1 }
  0xee   : > { %v583_v24 = vpop.f32.mrb[3].mxu1 }
  0xf9   : > { %v433_v25 = vpop.f32.mrb[0].mxu0 }
  0xfa   : > { %v608_v27 = vadd.f32 %v433_v25, %v285_v21  ;;  %v606_v28 = vpop.f32.mrb[1].mxu0 }
  0xfb   : > { %v436_v30 = vpop.f32.mrb[2].mxu0 }
  0xfc   : > { %v447_v31 = vmul.f32 %v608_v27, %v553_v26  ;;  %v607_v32 = vpop.f32.mrb[3].mxu0 }
  0xfe   : > { %v455_v33 = vadd.f32 %v554_v29, %v447_v31 }
 0x100   : > { %v456_v34 = vmax.f32 %v455_v33, 0.0 }
 0x102   : > { %v457_v35 = vpack.c.bf16 %v456_v34, %v456_v34 }
 0x104   : > { %459 = vst.msk [vmem:[%s192_s28] sm:$0x3] %vm458_vm2, %v457_v35 }
 0x105 PF: > { %s14_s15 = sadd.s32 1, %s643_s15  }
 0x106   : > { %p11_p4 = scmp.ge.s32.totalorder %s14_s15, 4  }
 0x108   :  { %13 = sbr.rel (!%p11_p4) target bundleno = 1 (0x1), region = 68 }

// kernel: _lambda_.30
= control target key start
LH: loop header
LB: loop body
LE: loop exit
PB: predicated region body
PF: predicated region fallthrough
CT: control target
= control target key end

     0   :  { %s937_s21 = smov 0   ;;  %s1078_s0 = inlined_call_operand.vmem [shape: bf16[2,4,128], index: 0, kind: input, shape index: {}]   ;;  %s1079_s1 = inlined_call_operand.vmem [shape: bf16[2,4,128], index: 1, kind: input, shape index: {}]   ;;  %s1080_s2 = inlined_call_operand.vmem [shape: bf16[2,4,128], index: 2, kind: input, shape index: {}]   ;;  %s1081_s3 = inlined_call_operand.vmem [shape: bf16[3,128,64], index: 3, kind: input, shape index: {}]   ;;  %s1082_s4 = inlined_call_operand.vmem [shape: f32[1,64], index: 4, kind: input, shape index: {}]   ;;  %s1083_s5 = inlined_call_operand.vmem [shape: f32[1,64], index: 5, kind: input, shape index: {}]   ;;  %s1084_s6 = inlined_call_operand.vmem [shape: bf16[2,4,64], index: 6, kind: output, shape index: {}]  }
   0x1 LB: > { %s697_s22 = sadd.s32 4294967295, %s898_s21   ;;  %p701_p0 = scmp.ge.s32.totalorder %s898_s21, 1  ;;  %s898_s21 = sphi %s937_s21, %s16_s21  }
   0x2   : > { %p229_p1 = scmp.lt.s32.totalorder %s898_s21, 3 }
   0x4   : > { %p230_p2 = pnand %p701_p0, %p229_p1 }
   0x5   : > { %v868_v0 = vld [vmem:[%s1081_s3] sm:$0xff] (!%p230_p2)   ;;  %v900_v1 = vmov (!%p230_p2), 0.0   ;;  %v869_v2 = vld [vmem:[%s1081_s3 + $0x8] sm:$0xff] (!%p230_p2)   ;;  %vm901_vm0 = vmmov (!%p230_p2), 0   ;;  %v870_v3 = vld [vmem:[%s1081_s3 + $0x10] sm:$0xff] (!%p230_p2)   ;;  %p265_p3 = scmp.lt.s32.totalorder (!%p230_p2), %s697_s22, 1 }
   0x6   : > { %233 = sbr.rel (%p230_p2) target bundleno = 293 (0x125), region = 44  ;;  %813 = vmatprep.subr.bf16.mxu0 (!%p230_p2), %v900_v1  ;;  %793 = vmatprep.subr.bf16.mxu1 (!%p230_p2), %v900_v1  ;;  %v876_v4 = vld [vmem:[%s1081_s3 + $0x40] sm:$0xff] (!%p230_p2)   ;;  %v871_v5 = vld [vmem:[%s1081_s3 + $0x18] sm:$0xff] (!%p230_p2)   ;;  %v878_v6 = vld [vmem:[%s1081_s3 + $0x48] sm:$0xff] (!%p230_p2)   ;;  %vm618_vm1 = vcmask (!%p230_p2), 517120  }
   0x7   : > { %814 = vmatpush3.bf16.msra.mxu0 (!%p230_p2), %v868_v0  ;;  %829 = vmatprep.mubr.msk.bf16.mxu0 (!%p230_p2), %vm901_vm0, %v900_v1  ;;  %v872_v7 = vld [vmem:[%s1081_s3 + $0x20] sm:$0xff] (!%p230_p2)   ;;  %v880_v8 = vld [vmem:[%s1081_s3 + $0x50] sm:$0xff] (!%p230_p2)   ;;  %v873_v9 = vld [vmem:[%s1081_s3 + $0x28] sm:$0xff] (!%p230_p2)  }
   0x8   : > { %815 = vmatprep.subr.bf16.mxu0 (!%p230_p2), %v900_v1  ;;  %809 = vmatprep.mubr.msk.bf16.mxu1 (!%p230_p2), %vm901_vm0, %v900_v1  ;;  %v882_v10 = vld [vmem:[%s1081_s3 + $0x58] sm:$0xff] (!%p230_p2)   ;;  %v874_v11 = vld [vmem:[%s1081_s3 + $0x30] sm:$0xff] (!%p230_p2)   ;;  %v884_v12 = vld [vmem:[%s1081_s3 + $0x60] sm:$0xff] (!%p230_p2)  }
   0x9   : > { %794 = vmatpush3.bf16.msra.mxu1 (!%p230_p2), %v876_v4  ;;  %v875_v13 = vld [vmem:[%s1081_s3 + $0x38] sm:$0xff] (!%p230_p2)   ;;  %v886_v14 = vld [vmem:[%s1081_s3 + $0x68] sm:$0xff] (!%p230_p2)   ;;  %v877_v16 = vld [vmem:[%s1081_s3 + $0x80] sm:$0xff] (!%p230_p2)  }
   0xa   : > { %795 = vmatprep.subr.bf16.mxu1 (!%p230_p2), %v900_v1  ;;  %v888_v17 = vld [vmem:[%s1081_s3 + $0x70] sm:$0xff] (!%p230_p2)   ;;  %v879_v18 = vld [vmem:[%s1081_s3 + $0x88] sm:$0xff] (!%p230_p2)   ;;  %v890_v19 = vld [vmem:[%s1081_s3 + $0x78] sm:$0xff] (!%p230_p2)  }
   0xb   : > { %816 = vmatpush3.bf16.msra.mxu0 (!%p230_p2), %v869_v2  ;;  %v881_v20 = vld [vmem:[%s1081_s3 + $0x90] sm:$0xff] (!%p230_p2)   ;;  %v883_v22 = vld [vmem:[%s1081_s3 + $0x98] sm:$0xff] (!%p230_p2)   ;;  %v885_v23 = vld [vmem:[%s1081_s3 + $0xa0] sm:$0xff] (!%p230_p2)  }
   0xc   : > { %817 = vmatprep.subr.bf16.mxu0 (!%p230_p2), %v900_v1  ;;  %v887_v24 = vld [vmem:[%s1081_s3 + $0xa8] sm:$0xff] (!%p230_p2)   ;;  %v889_v25 = vld [vmem:[%s1081_s3 + $0xb0] sm:$0xff] (!%p230_p2)   ;;  %v891_v26 = vld [vmem:[%s1081_s3 + $0xb8] sm:$0xff] (!%p230_p2)  }
   0xd   : > { %796 = vmatpush3.bf16.msra.mxu1 %v878_v6  ;;  %s1086_s22 = smov (!%p265_p3, %s697_s22), 1  ;;  %v762_v33 = vld [vmem:[%s1082_s4] ss:$0 sm:$0xff] }
   0xe   : > { %797 = vmatprep.subr.bf16.mxu1 %v900_v1  ;;  %s1001_s25 = sshll.u32 %s1086_s22, 1  ;;  %v763_v36 = vld [vmem:[%s1083_s5] ss:$0 sm:$0xff] }
   0xf   : > { %818 = vmatpush3.bf16.msra.mxu0 %v870_v3  ;;  %s268_s8 = scalar_lea.vmem %s1078_s0, %s1001_s25  ;;  %s272_s18 = scalar_lea.vmem %s1079_s1, %s1001_s25 }
  0x10   : > { %819 = vmatprep.subr.bf16.mxu0 %v900_v1  ;;  %v282_v15 = vld [vmem:[%s268_s8] sm:$0x3]  ;;  %s276_s11 = scalar_lea.vmem %s1080_s2, %s1001_s25 }
  0x11   : > { %798 = vmatpush3.bf16.msra.mxu1 %v880_v8  ;;  %v299_v21 = vld [vmem:[%s272_s18] sm:$0x3]  ;;  %s280_s18 = scalar_lea.vmem %s1084_s6, %s1001_s25 }
  0x12   : > { %799 = vmatprep.subr.bf16.mxu1 %v900_v1  ;;  %v493_v27 = vld [vmem:[%s276_s11] sm:$0x3] }
  0x13   : > { %820 = vmatpush3.bf16.msra.mxu0 %v871_v5 }
  0x14   : > { %821 = vmatprep.subr.bf16.mxu0 %v900_v1 }
  0x15   : > { %800 = vmatpush3.bf16.msra.mxu1 %v882_v10 }
  0x16   : > { %801 = vmatprep.subr.bf16.mxu1 %v900_v1 }
  0x17   : > { %822 = vmatpush3.bf16.msra.mxu0 %v872_v7 }
  0x18   : > { %823 = vmatprep.subr.bf16.mxu0 %v900_v1 }
  0x19   : > { %802 = vmatpush3.bf16.msra.mxu1 %v884_v12 }
  0x1a   : > { %803 = vmatprep.subr.bf16.mxu1 %v900_v1 }
  0x1b   : > { %824 = vmatpush3.bf16.msra.mxu0 %v873_v9 }
  0x1c   : > { %825 = vmatprep.subr.bf16.mxu0 %v900_v1 }
  0x1d   : > { %804 = vmatpush3.bf16.msra.mxu1 %v886_v14 }
  0x1e   : > { %805 = vmatprep.subr.bf16.mxu1 %v900_v1 }
  0x1f   : > { %826 = vmatpush3.bf16.msra.mxu0 %v874_v11 }
  0x20   : > { %827 = vmatprep.subr.bf16.mxu0 %v900_v1 }
  0x21   : > { %806 = vmatpush3.bf16.msra.mxu1 %v888_v17 }
  0x22   : > { %807 = vmatprep.subr.bf16.mxu1 %v900_v1 }
  0x23   : > { %828 = vmatpush3.bf16.msra.mxu0 %v875_v13 }
  0x24   : > { %833 = vmatprep.subr.bf16.mxu0 %v900_v1 }
  0x25   : > { %808 = vmatpush3.bf16.msra.mxu1 %v890_v19 }
  0x26   : > { %830 = vmatmul.mubr.bf16.vlgmr.msra.gmra.mrb[0].mxu0 %v282_v15 }
  0x27   : > { %834 = vmatpush3.bf16.msra.mxu0 %v877_v16  ;;  %849 = vmatprep.mubr.msk.bf16.mxu0 %vm901_vm0, %v900_v1 }
  0x28   : > { %835 = vmatprep.subr.bf16.mxu0 %v900_v1  ;;  %810 = vmatmul.mubr.bf16.vlgmr.msra.gmra.mrb[0].mxu1 %v299_v21 }
  0x2b   : > { %836 = vmatpush3.bf16.msra.mxu0 %v879_v18 }
  0x2c   : > { %837 = vmatprep.subr.bf16.mxu0 %v900_v1 }
  0x2f   : > { %838 = vmatpush3.bf16.msra.mxu0 %v881_v20 }
  0x30   : > { %839 = vmatprep.subr.bf16.mxu0 %v900_v1 }
  0x33   : > { %840 = vmatpush3.bf16.msra.mxu0 %v883_v22 }
  0x34   : > { %841 = vmatprep.subr.bf16.mxu0 %v900_v1 }
  0x37   : > { %842 = vmatpush3.bf16.msra.mxu0 %v885_v23 }
  0x38   : > { %843 = vmatprep.subr.bf16.mxu0 %v900_v1 }
  0x3b   : > { %844 = vmatpush3.bf16.msra.mxu0 %v887_v24 }
  0x3c   : > { %845 = vmatprep.subr.bf16.mxu0 %v900_v1 }
  0x3f   : > { %846 = vmatpush3.bf16.msra.mxu0 %v889_v25 }
  0x40   : > { %847 = vmatprep.subr.bf16.mxu0 %v900_v1 }
  0x43   : > { %848 = vmatpush3.bf16.msra.mxu0 %v891_v26 }
  0x46   : > { %850 = vmatmul.mubr.bf16.vlgmr.msra.gmra.mrb[0].mxu0 %v493_v27 }
  0xfb   : > { %v399_v28 = vpop.f32.mrb[0].mxu1 }
  0xfc   : > { %v811_v29 = vpop.f32.mrb[1].mxu1 }
  0xfd   : > { %v402_v30 = vpop.f32.mrb[2].mxu1 }
  0xfe   : > { %v812_v31 = vpop.f32.mrb[3].mxu1 }
 0x119   : > { %v593_v32 = vpop.f32.mrb[0].mxu0 }
 0x11a   : > { %v853_v34 = vadd.f32 %v593_v32, %v399_v28  ;;  %v851_v35 = vpop.f32.mrb[1].mxu0 }
 0x11b   : > { %v596_v37 = vpop.f32.mrb[2].mxu0 }
 0x11c   : > { %v607_v38 = vmul.f32 %v853_v34, %v762_v33  ;;  %v852_v39 = vpop.f32.mrb[3].mxu0 }
 0x11e   : > { %v615_v40 = vadd.f32 %v763_v36, %v607_v38 }
 0x120   : > { %v616_v41 = vmax.f32 %v615_v40, 0.0 }
 0x122   : > { %v617_v42 = vpack.c.bf16 %v616_v41, %v616_v41 }
 0x124   : > { %619 = vst.msk [vmem:[%s280_s18] sm:$0x3] %vm618_vm1, %v617_v42 }
 0x125 PF: > { %s16_s21 = sadd.s32 1, %s898_s21  }
 0x126   : > { %p13_p4 = scmp.ge.s32.totalorder %s16_s21, 4  }
 0x128   :  { %15 = sbr.rel (!%p13_p4) target bundleno = 1 (0x1), region = 82 }

// kernel: _lambda_.32
= control target key start
LH: loop header
LB: loop body
LE: loop exit
PB: predicated region body
PF: predicated region fallthrough
CT: control target
= control target key end

     0   :  { %s738_s18 = smov 0   ;;  %s815_s0 = inlined_call_operand.vmem [shape: bf16[2,6,64], index: 0, kind: input, shape index: {}]   ;;  %s816_s1 = inlined_call_operand.vmem [shape: bf16[3,64,64], index: 1, kind: input, shape index: {}]   ;;  %s817_s2 = inlined_call_operand.vmem [shape: f32[1,64], index: 2, kind: input, shape index: {}]   ;;  %s818_s3 = inlined_call_operand.vmem [shape: f32[1,64], index: 3, kind: input, shape index: {}]   ;;  %s819_s4 = inlined_call_operand.vmem [shape: bf16[2,4,64], index: 4, kind: input, shape index: {}]   ;;  %s820_s5 = inlined_call_operand.vmem [shape: bf16[2,4,64], index: 5, kind: output, shape index: {}]  }
   0x1 LB: > { %s573_s19 = sadd.s32 4294967295, %s704_s18   ;;  %p577_p0 = scmp.ge.s32.totalorder %s704_s18, 1  ;;  %s704_s18 = sphi %s738_s18, %s15_s18  }
   0x2   : > { %p195_p1 = scmp.lt.s32.totalorder %s704_s18, 3 }
   0x4   : > { %p196_p2 = pnand %p577_p0, %p195_p1 }
   0x5   : > { %v684_v0 = vld [vmem:[%s816_s1] sm:$0xff] (!%p196_p2)   ;;  %v706_v1 = vmov (!%p196_p2), 0.0   ;;  %v685_v2 = vld [vmem:[%s816_s1 + $0x8] sm:$0xff] (!%p196_p2)   ;;  %vm707_vm0 = vmmov (!%p196_p2), 0   ;;  %p225_p3 = scmp.lt.s32.totalorder (!%p196_p2), %s573_s19, 1  ;;  %v686_v4 = vld [vmem:[%s816_s1 + $0x10] sm:$0xff] (!%p196_p2)  }
   0x6   : > { %199 = sbr.rel (%p196_p2) target bundleno = 265 (0x109), region = 40  ;;  %645 = vmatprep.subr.bf16.mxu0 (!%p196_p2), %v706_v1  ;;  %633 = vmatprep.subr.bf16.mxu1 (!%p196_p2), %v706_v1  ;;  %v688_v3 = vld [vmem:[%s816_s1 + $0x20] sm:$0xff] (!%p196_p2)   ;;  %v692_v5 = vld [vmem:[%s816_s1 + $0x28] sm:$0xff] (!%p196_p2)   ;;  %v687_v7 = vld [vmem:[%s816_s1 + $0x18] sm:$0xff] (!%p196_p2)   ;;  %vm291_vm1 = vcmask (!%p196_p2), 523264   ;;  %vm506_vm2 = vcmask (!%p196_p2), 517120  }
   0x7   : > { %646 = vmatpush3.bf16.msra.mxu0 (!%p196_p2), %v684_v0  ;;  %653 = vmatprep.mubr.msk.bf16.mxu0 (!%p196_p2), %vm707_vm0, %v706_v1  ;;  %v694_v8 = vld [vmem:[%s816_s1 + $0x30] sm:$0xff] (!%p196_p2)   ;;  %v691_v12 = vld [vmem:[%s816_s1 + $0x40] sm:$0xff] (!%p196_p2)   ;;  %v696_v13 = vld [vmem:[%s816_s1 + $0x38] sm:$0xff] (!%p196_p2)  }
   0x8   : > { %647 = vmatprep.subr.bf16.mxu0 (!%p196_p2), %v706_v1  ;;  %641 = vmatprep.mubr.msk.bf16.mxu1 (!%p196_p2), %vm707_vm0, %v706_v1  ;;  %v693_v16 = vld [vmem:[%s816_s1 + $0x48] sm:$0xff] (!%p196_p2)   ;;  %v695_v17 = vld [vmem:[%s816_s1 + $0x50] sm:$0xff] (!%p196_p2)   ;;  %v697_v19 = vld [vmem:[%s816_s1 + $0x58] sm:$0xff] (!%p196_p2)  }
   0x9   : > { %634 = vmatpush3.bf16.msra.mxu1 (!%p196_p2), %v688_v3  ;;  %v614_v26 = vld [vmem:[%s817_s2] ss:$0 sm:$0xff] (!%p196_p2) }
   0xa   : > { %635 = vmatprep.subr.bf16.mxu1 (!%p196_p2), %v706_v1  ;;  %v615_v29 = vld [vmem:[%s818_s3] ss:$0 sm:$0xff] (!%p196_p2) }
   0xb   : > { %648 = vmatpush3.bf16.msra.mxu0 (!%p196_p2), %v685_v2 }
   0xc   : > { %649 = vmatprep.subr.bf16.mxu0 (!%p196_p2), %v706_v1 }
   0xd   : > { %s822_s19 = smov (!%p225_p3, %s573_s19), 1  ;;  %636 = vmatpush3.bf16.msra.mxu1 %v692_v5 }
   0xe   : > { %s578_s28 = sshll.u32 %s822_s19, 2  ;;  %637 = vmatprep.subr.bf16.mxu1 %v706_v1  ;;  %s579_s25 = sshll.u32 %s822_s19, 1 }
   0xf   : > { %s766_s6 = scalar_lea.vmem %s815_s0, %s578_s28  ;;  %650 = vmatpush3.bf16.msra.mxu0 %v686_v4  ;;  %s232_s28 = scalar_lea.vmem %s819_s4, %s579_s25 }
  0x10   : > { %v689_v6 = vld [vmem:[%s766_s6] ss:$0 sps:$4 sm:$0x77]   ;;  %651 = vmatprep.subr.bf16.mxu0 %v706_v1  ;;  %s236_s9 = scalar_lea.vmem %s820_s5, %s579_s25 }
  0x11   : > { %v261_v9 = vshrl.u32 %v689_v6, 16  ;;  %v263_v10 = vshll.u32 %v689_v6, 16  ;;  %v238_v11 = vld [vmem:[%s766_s6] sm:$0x3]  ;;  %638 = vmatpush3.bf16.msra.mxu1 %v694_v8 }
  0x12   : > { %639 = vmatprep.subr.bf16.mxu1 %v706_v1  ;;  %v690_v18 = vld [vmem:[%s766_s6] ss:$0 sps:$4 sm:$0x66]  }
  0x13   : > { %652 = vmatpush3.bf16.msra.mxu0 %v687_v7  ;;  %v265_v14 = vrot.slane %v263_v10, 1  ;;  %v415_v20 = vrot.slane %v690_v18, 1  ;;  %v501_v30 = vld [vmem:[%s232_s28] sm:$0x3] }
  0x14   : > { %657 = vmatprep.subr.bf16.mxu0 %v706_v1  ;;  %v502_v35 = vunpack.c.l.bf16 %v501_v30 }
  0x15   : > { %v266_v15 = vor.u32 %v265_v14, %v261_v9  ;;  %640 = vmatpush3.bf16.msra.mxu1 %v696_v13 }
  0x16   : > { %654 = vmatmul.mubr.msk.bf16.vlgmr.msra.gmra.mrb[0].mxu0 %vm291_vm1, %v238_v11 }
  0x17   : > { %658 = vmatpush3.bf16.msra.mxu0 %v691_v12  ;;  %665 = vmatprep.mubr.msk.bf16.mxu0 %vm707_vm0, %v706_v1 }
  0x18   : > { %659 = vmatprep.subr.bf16.mxu0 %v706_v1  ;;  %642 = vmatmul.mubr.msk.bf16.vlgmr.msra.gmra.mrb[0].mxu1 %vm291_vm1, %v266_v15 }
  0x1b   : > { %660 = vmatpush3.bf16.msra.mxu0 %v693_v16 }
  0x1c   : > { %661 = vmatprep.subr.bf16.mxu0 %v706_v1 }
  0x1f   : > { %662 = vmatpush3.bf16.msra.mxu0 %v695_v17 }
  0x20   : > { %663 = vmatprep.subr.bf16.mxu0 %v706_v1 }
  0x23   : > { %664 = vmatpush3.bf16.msra.mxu0 %v697_v19 }
  0x26   : > { %666 = vmatmul.mubr.msk.bf16.vlgmr.msra.gmra.mrb[0].mxu0 %vm291_vm1, %v415_v20 }
  0xeb   : > { %v329_v21 = vpop.f32.mrb[0].mxu1 }
  0xec   : > { %v643_v22 = vpop.f32.mrb[1].mxu1 }
  0xed   : > { %v332_v23 = vpop.f32.mrb[2].mxu1 }
  0xee   : > { %v644_v24 = vpop.f32.mrb[3].mxu1 }
  0xf9   : > { %v477_v25 = vpop.f32.mrb[0].mxu0 }
  0xfa   : > { %v669_v27 = vadd.f32 %v477_v25, %v329_v21  ;;  %v667_v28 = vpop.f32.mrb[1].mxu0 }
  0xfb   : > { %v480_v31 = vpop.f32.mrb[2].mxu0 }
  0xfc   : > { %v491_v32 = vmul.f32 %v669_v27, %v614_v26  ;;  %v668_v33 = vpop.f32.mrb[3].mxu0 }
  0xfe   : > { %v499_v34 = vadd.f32 %v615_v29, %v491_v32 }
 0x100   : > { %v500_v36 = vmax.f32 %v499_v34, 0.0 }
 0x102   : > { %v503_v37 = vadd.f32 %v502_v35, %v500_v36 }
 0x104   : > { %v504_v38 = vmax.f32 %v503_v37, 0.0 }
 0x106   : > { %v505_v39 = vpack.c.bf16 %v504_v38, %v504_v38 }
 0x108   : > { %507 = vst.msk [vmem:[%s236_s9] sm:$0x3] %vm506_vm2, %v505_v39 }
 0x109 PF: > { %s15_s18 = sadd.s32 1, %s704_s18  }
 0x10a   : > { %p12_p4 = scmp.ge.s32.totalorder %s15_s18, 4  }
 0x10c   :  { %14 = sbr.rel (!%p12_p4) target bundleno = 1 (0x1), region = 75 }

// kernel: _lambda_.36
= control target key start
LH: loop header
LB: loop body
LE: loop exit
PB: predicated region body
PF: predicated region fallthrough
CT: control target
= control target key end

     0   :  { %s409_s15 = smov 0   ;;  %s444_s0 = inlined_call_operand.vmem [shape: bf16[2,2,64], index: 0, kind: input, shape index: {}]   ;;  %s445_s1 = inlined_call_operand.vmem [shape: bf16[1,64,32], index: 1, kind: input, shape index: {}]   ;;  %s446_s2 = inlined_call_operand.vmem [shape: f32[1,32], index: 2, kind: input, shape index: {}]   ;;  %s447_s3 = inlined_call_operand.vmem [shape: f32[1,32], index: 3, kind: input, shape index: {}]   ;;  %s448_s4 = inlined_call_operand.vmem [shape: bf16[2,2,32], index: 4, kind: output, shape index: {}]  }
   0x1 LB: > { %s329_s16 = sadd.s32 4294967295, %s380_s15   ;;  %p333_p0 = scmp.ge.s32.totalorder %s380_s15, 1  ;;  %s380_s15 = sphi %s409_s15, %s14_s15  }
   0x2   : > { %p160_p1 = scmp.lt.s32.totalorder %s380_s15, 3 }
   0x4   : > { %p161_p2 = pnand %p333_p0, %p160_p1 }
   0x5   : > { %v370_v0 = vld [vmem:[%s445_s1] sm:$0xff] (!%p161_p2)   ;;  %v382_v1 = vmov (!%p161_p2), 0.0   ;;  %v371_v2 = vld [vmem:[%s445_s1 + $0x8] sm:$0xff] (!%p161_p2)   ;;  %vm383_vm0 = vmmov (!%p161_p2), 0   ;;  %p182_p3 = scmp.lt.s32.totalorder (!%p161_p2), %s329_s16, 1  ;;  %v372_v3 = vld [vmem:[%s445_s1 + $0x10] sm:$0xff] (!%p161_p2)  }
   0x6   : > { %164 = sbr.rel (%p161_p2) target bundleno = 241 (0xf1), region = 36  ;;  %348 = vmatprep.subr.bf16.mxu0 (!%p161_p2), %v382_v1  ;;  %356 = vmatprep.mubr.msk.bf16.mxu0 (!%p161_p2), %vm383_vm0, %v382_v1  ;;  %v373_v4 = vld [vmem:[%s445_s1 + $0x18] sm:$0xff] (!%p161_p2)   ;;  %vm222_vm1 = vcmask (!%p161_p2), 523264   ;;  %v339_v6 = vld [vmem:[%s446_s2] ss:$0 sm:$0xff] (!%p161_p2)  ;;  %vm283_vm2 = vcmask (!%p161_p2), 253952  }
   0x7   : > { %349 = vmatpush3.bf16.msra.mxu0 (!%p161_p2), %v370_v0  ;;  %v340_v8 = vld [vmem:[%s447_s3] ss:$0 sm:$0xff] (!%p161_p2) }
   0x8   : > { %350 = vmatprep.subr.bf16.mxu0 (!%p161_p2), %v382_v1 }
   0xb   : > { %351 = vmatpush3.bf16.msra.mxu0 (!%p161_p2), %v371_v2 }
   0xc   : > { %352 = vmatprep.subr.bf16.mxu0 (!%p161_p2), %v382_v1 }
   0xd   : > { %s450_s16 = smov (!%p182_p3, %s329_s16), 1 }
   0xe   : > { %s184_s27 = scalar_lea.vmem %s444_s0, %s450_s16  ;;  %s187_s8 = scalar_lea.vmem %s448_s4, %s450_s16 }
   0xf   : > { %353 = vmatpush3.bf16.msra.mxu0 %v372_v3  ;;  %v189_v5 = vld [vmem:[%s184_s27] sm:$0x1] }
  0x10   : > { %354 = vmatprep.subr.bf16.mxu0 %v382_v1 }
  0x13   : > { %355 = vmatpush3.bf16.msra.mxu0 %v373_v4 }
  0x16   : > { %357 = vmatmul.mubr.msk.bf16.vlgmr.msra.gmra.mrb[0].mxu0 %vm222_vm1, %v189_v5 }
  0xe9   : > { %v260_v7 = vpop.f32.mrb[0].mxu0 }
  0xea   : > { %v273_v9 = vmul.f32 %v339_v6, %v260_v7  ;;  %v358_v10 = vpop.f32.mrb[1].mxu0 }
  0xeb   : > { %v263_v11 = vpop.f32.mrb[2].mxu0 }
  0xec   : > { %v281_v12 = vadd.f32 %v340_v8, %v273_v9  ;;  %v359_v13 = vpop.f32.mrb[3].mxu0 }
  0xee   : > { %v282_v14 = vpack.c.bf16 %v281_v12, %v281_v12 }
  0xf0   : > { %284 = vst.msk [vmem:[%s187_s8] sm:$0x1] %vm283_vm2, %v282_v14 }
  0xf1 PF: > { %s14_s15 = sadd.s32 1, %s380_s15  }
  0xf2   : > { %p11_p4 = scmp.ge.s32.totalorder %s14_s15, 4  }
  0xf4   :  { %13 = sbr.rel (!%p11_p4) target bundleno = 1 (0x1), region = 66 }

// kernel: _lambda_.35
= control target key start
LH: loop header
LB: loop body
LE: loop exit
PB: predicated region body
PF: predicated region fallthrough
CT: control target
= control target key end

     0   :  { %s748_s21 = smov 0   ;;  %s825_s0 = inlined_call_operand.vmem [shape: bf16[2,2,64], index: 0, kind: input, shape index: {}]   ;;  %s826_s1 = inlined_call_operand.vmem [shape: bf16[2,2,64], index: 1, kind: input, shape index: {}]   ;;  %s827_s2 = inlined_call_operand.vmem [shape: bf16[2,2,64], index: 2, kind: input, shape index: {}]   ;;  %s828_s3 = inlined_call_operand.vmem [shape: bf16[3,64,32], index: 3, kind: input, shape index: {}]   ;;  %s829_s4 = inlined_call_operand.vmem [shape: f32[1,32], index: 4, kind: input, shape index: {}]   ;;  %s830_s5 = inlined_call_operand.vmem [shape: f32[1,32], index: 5, kind: input, shape index: {}]   ;;  %s831_s6 = inlined_call_operand.vmem [shape: bf16[2,2,32], index: 6, kind: output, shape index: {}]  }
   0x1 LB: > { %s585_s22 = sadd.s32 4294967295, %s709_s21   ;;  %p589_p0 = scmp.ge.s32.totalorder %s709_s21, 1  ;;  %s709_s21 = sphi %s748_s21, %s16_s21  }
   0x2   : > { %p226_p1 = scmp.lt.s32.totalorder %s709_s21, 3 }
   0x4   : > { %p227_p2 = pnand %p589_p0, %p226_p1 }
   0x5   : > { %v691_v0 = vld [vmem:[%s828_s3] sm:$0xff] (!%p227_p2)   ;;  %v711_v1 = vmov (!%p227_p2), 0.0   ;;  %v692_v2 = vld [vmem:[%s828_s3 + $0x8] sm:$0xff] (!%p227_p2)   ;;  %vm712_vm0 = vmmov (!%p227_p2), 0   ;;  %p258_p3 = scmp.lt.s32.totalorder (!%p227_p2), %s585_s22, 1  ;;  %v693_v4 = vld [vmem:[%s828_s3 + $0x10] sm:$0xff] (!%p227_p2)  }
   0x6   : > { %230 = sbr.rel (%p227_p2) target bundleno = 261 (0x105), region = 44  ;;  %652 = vmatprep.subr.bf16.mxu0 (!%p227_p2), %v711_v1  ;;  %640 = vmatprep.subr.bf16.mxu1 (!%p227_p2), %v711_v1  ;;  %v695_v3 = vld [vmem:[%s828_s3 + $0x20] sm:$0xff] (!%p227_p2)   ;;  %v697_v5 = vld [vmem:[%s828_s3 + $0x28] sm:$0xff] (!%p227_p2)   ;;  %v694_v6 = vld [vmem:[%s828_s3 + $0x18] sm:$0xff] (!%p227_p2)   ;;  %vm314_vm1 = vcmask (!%p227_p2), 523264   ;;  %vm521_vm2 = vcmask (!%p227_p2), 253952  }
   0x7   : > { %653 = vmatpush3.bf16.msra.mxu0 (!%p227_p2), %v691_v0  ;;  %660 = vmatprep.mubr.msk.bf16.mxu0 (!%p227_p2), %vm712_vm0, %v711_v1  ;;  %v699_v7 = vld [vmem:[%s828_s3 + $0x30] sm:$0xff] (!%p227_p2)   ;;  %v696_v9 = vld [vmem:[%s828_s3 + $0x40] sm:$0xff] (!%p227_p2)   ;;  %v701_v10 = vld [vmem:[%s828_s3 + $0x38] sm:$0xff] (!%p227_p2)  }
   0x8   : > { %654 = vmatprep.subr.bf16.mxu0 (!%p227_p2), %v711_v1  ;;  %648 = vmatprep.mubr.msk.bf16.mxu1 (!%p227_p2), %vm712_vm0, %v711_v1  ;;  %v698_v11 = vld [vmem:[%s828_s3 + $0x48] sm:$0xff] (!%p227_p2)   ;;  %v700_v13 = vld [vmem:[%s828_s3 + $0x50] sm:$0xff] (!%p227_p2)   ;;  %v702_v14 = vld [vmem:[%s828_s3 + $0x58] sm:$0xff] (!%p227_p2)  }
   0x9   : > { %641 = vmatpush3.bf16.msra.mxu1 (!%p227_p2), %v695_v3  ;;  %v621_v21 = vld [vmem:[%s829_s4] ss:$0 sm:$0xff] (!%p227_p2) }
   0xa   : > { %642 = vmatprep.subr.bf16.mxu1 (!%p227_p2), %v711_v1  ;;  %v622_v24 = vld [vmem:[%s830_s5] ss:$0 sm:$0xff] (!%p227_p2) }
   0xb   : > { %655 = vmatpush3.bf16.msra.mxu0 (!%p227_p2), %v692_v2 }
   0xc   : > { %656 = vmatprep.subr.bf16.mxu0 (!%p227_p2), %v711_v1 }
   0xd   : > { %s833_s22 = smov (!%p258_p3, %s585_s22), 1  ;;  %643 = vmatpush3.bf16.msra.mxu1 %v697_v5 }
   0xe   : > { %s260_s15 = scalar_lea.vmem %s825_s0, %s833_s22  ;;  %644 = vmatprep.subr.bf16.mxu1 %v711_v1  ;;  %s263_s24 = scalar_lea.vmem %s826_s1, %s833_s22 }
   0xf   : > { %657 = vmatpush3.bf16.msra.mxu0 %v693_v4  ;;  %v271_v8 = vld [vmem:[%s260_s15] sm:$0x1]  ;;  %s266_s9 = scalar_lea.vmem %s827_s2, %s833_s22  ;;  %s269_s16 = scalar_lea.vmem %s831_s6, %s833_s22 }
  0x10   : > { %658 = vmatprep.subr.bf16.mxu0 %v711_v1  ;;  %v280_v12 = vld [vmem:[%s263_s24] sm:$0x1] }
  0x11   : > { %645 = vmatpush3.bf16.msra.mxu1 %v699_v7  ;;  %v425_v15 = vld [vmem:[%s266_s9] sm:$0x1] }
  0x12   : > { %646 = vmatprep.subr.bf16.mxu1 %v711_v1 }
  0x13   : > { %659 = vmatpush3.bf16.msra.mxu0 %v694_v6 }
  0x14   : > { %664 = vmatprep.subr.bf16.mxu0 %v711_v1 }
  0x15   : > { %647 = vmatpush3.bf16.msra.mxu1 %v701_v10 }
  0x16   : > { %661 = vmatmul.mubr.msk.bf16.vlgmr.msra.gmra.mrb[0].mxu0 %vm314_vm1, %v271_v8 }
  0x17   : > { %665 = vmatpush3.bf16.msra.mxu0 %v696_v9  ;;  %672 = vmatprep.mubr.msk.bf16.mxu0 %vm712_vm0, %v711_v1 }
  0x18   : > { %666 = vmatprep.subr.bf16.mxu0 %v711_v1  ;;  %649 = vmatmul.mubr.msk.bf16.vlgmr.msra.gmra.mrb[0].mxu1 %vm314_vm1, %v280_v12 }
  0x1b   : > { %667 = vmatpush3.bf16.msra.mxu0 %v698_v11 }
  0x1c   : > { %668 = vmatprep.subr.bf16.mxu0 %v711_v1 }
  0x1f   : > { %669 = vmatpush3.bf16.msra.mxu0 %v700_v13 }
  0x20   : > { %670 = vmatprep.subr.bf16.mxu0 %v711_v1 }
  0x23   : > { %671 = vmatpush3.bf16.msra.mxu0 %v702_v14 }
  0x26   : > { %673 = vmatmul.mubr.msk.bf16.vlgmr.msra.gmra.mrb[0].mxu0 %vm314_vm1, %v425_v15 }
  0xeb   : > { %v352_v16 = vpop.f32.mrb[0].mxu1 }
  0xec   : > { %v650_v17 = vpop.f32.mrb[1].mxu1 }
  0xed   : > { %v355_v18 = vpop.f32.mrb[2].mxu1 }
  0xee   : > { %v651_v19 = vpop.f32.mrb[3].mxu1 }
  0xf9   : > { %v496_v20 = vpop.f32.mrb[0].mxu0 }
  0xfa   : > { %v676_v22 = vadd.f32 %v496_v20, %v352_v16  ;;  %v674_v23 = vpop.f32.mrb[1].mxu0 }
  0xfb   : > { %v499_v25 = vpop.f32.mrb[2].mxu0 }
  0xfc   : > { %v510_v26 = vmul.f32 %v676_v22, %v621_v21  ;;  %v675_v27 = vpop.f32.mrb[3].mxu0 }
  0xfe   : > { %v518_v28 = vadd.f32 %v622_v24, %v510_v26 }
 0x100   : > { %v519_v29 = vmax.f32 %v518_v28, 0.0 }
 0x102   : > { %v520_v30 = vpack.c.bf16 %v519_v29, %v519_v29 }
 0x104   : > { %522 = vst.msk [vmem:[%s269_s16] sm:$0x1] %vm521_vm2, %v520_v30 }
 0x105 PF: > { %s16_s21 = sadd.s32 1, %s709_s21  }
 0x106   : > { %p13_p4 = scmp.ge.s32.totalorder %s16_s21, 4  }
 0x108   :  { %15 = sbr.rel (!%p13_p4) target bundleno = 1 (0x1), region = 82 }

// kernel: _lambda_.38
= control target key start
LH: loop header
LB: loop body
LE: loop exit
PB: predicated region body
PF: predicated region fallthrough
CT: control target
= control target key end

     0   :  { %s585_s15 = smov 0   ;;  %s636_s0 = inlined_call_operand.vmem [shape: bf16[2,4,32], index: 0, kind: input, shape index: {}]   ;;  %s637_s1 = inlined_call_operand.vmem [shape: bf16[3,32,32], index: 1, kind: input, shape index: {}]   ;;  %s638_s2 = inlined_call_operand.vmem [shape: f32[1,32], index: 2, kind: input, shape index: {}]   ;;  %s639_s3 = inlined_call_operand.vmem [shape: f32[1,32], index: 3, kind: input, shape index: {}]   ;;  %s640_s4 = inlined_call_operand.vmem [shape: bf16[2,2,32], index: 4, kind: output, shape index: {}]  }
   0x1 LB: > { %s467_s16 = sadd.s32 4294967295, %s556_s15   ;;  %p471_p0 = scmp.ge.s32.totalorder %s556_s15, 1  ;;  %s556_s15 = sphi %s585_s15, %s14_s15  }
   0x2   : > { %p161_p1 = scmp.lt.s32.totalorder %s556_s15, 3 }
   0x4   : > { %p162_p2 = pnand %p471_p0, %p161_p1 }
   0x5   : > { %v544_v0 = vld [vmem:[%s637_s1] sm:$0xff] (!%p162_p2)   ;;  %v558_v1 = vmov (!%p162_p2), 0.0   ;;  %v545_v2 = vld [vmem:[%s637_s1 + $0x8] sm:$0xff] (!%p162_p2)   ;;  %vm559_vm0 = vmmov (!%p162_p2), 0   ;;  %p184_p3 = scmp.lt.s32.totalorder (!%p162_p2), %s467_s16, 1  ;;  %v547_v3 = vld [vmem:[%s637_s1 + $0x10] sm:$0xff] (!%p162_p2)  }
   0x6   : > { %165 = sbr.rel (%p162_p2) target bundleno = 252 (0xfc), region = 36  ;;  %513 = vmatprep.subr.bf16.mxu0 (!%p162_p2), %v558_v1  ;;  %505 = vmatprep.subr.bf16.mxu1 (!%p162_p2), %v558_v1  ;;  %vm230_vm1 = vcmask (!%p162_p2), 261120   ;;  %v546_v4 = vld [vmem:[%s637_s1 + $0x20] sm:$0xff] (!%p162_p2)   ;;  %v548_v5 = vld [vmem:[%s637_s1 + $0x18] sm:$0xff] (!%p162_p2)   ;;  %v549_v10 = vld [vmem:[%s637_s1 + $0x28] sm:$0xff] (!%p162_p2)   ;;  %vm418_vm2 = vcmask (!%p162_p2), 253952  }
   0x7   : > { %514 = vmatpush3.bf16.msra.mxu0 (!%p162_p2), %v544_v0  ;;  %517 = vmatprep.mubr.msk.bf16.mxu0 (!%p162_p2), %vm559_vm0, %v558_v1  ;;  %v492_v20 = vld [vmem:[%s638_s2] ss:$0 sm:$0xff] (!%p162_p2) }
   0x8   : > { %515 = vmatprep.subr.bf16.mxu0 (!%p162_p2), %v558_v1  ;;  %509 = vmatprep.mubr.msk.bf16.mxu1 (!%p162_p2), %vm559_vm0, %v558_v1  ;;  %v493_v23 = vld [vmem:[%s639_s3] ss:$0 sm:$0xff] (!%p162_p2) }
   0x9   : > { %506 = vmatpush3.bf16.msra.mxu1 (!%p162_p2), %v547_v3 }
   0xa   : > { %507 = vmatprep.subr.bf16.mxu1 (!%p162_p2), %v558_v1 }
   0xb   : > { %516 = vmatpush3.bf16.msra.mxu0 (!%p162_p2), %v545_v2 }
   0xc   : > { %521 = vmatprep.subr.bf16.mxu0 (!%p162_p2), %v558_v1 }
   0xd   : > { %s642_s16 = smov (!%p184_p3, %s467_s16), 1  ;;  %508 = vmatpush3.bf16.msra.mxu1 %v548_v5 }
   0xe   : > { %s472_s23 = sshll.u32 %s642_s16, 1  ;;  %s190_s13 = scalar_lea.vmem %s640_s4, %s642_s16 }
   0xf   : > { %s187_s30 = scalar_lea.vmem %s636_s0, %s472_s23 }
  0x10   : > { %v192_v6 = vld [vmem:[%s187_s30] sm:$0x1]  ;;  %v488_v13 = vld.sshfl [vmem:[%s187_s30] sm:$0x2 pattern:$0x76325410] }
  0x11   : > { %v477_v7 = vld.sshfl [vmem:[%s187_s30] sm:$0x3 pattern:$0x76325410]  ;;  %518 = vmatmul.mubr.msk.bf16.vlgmr.msra.gmra.mrb[0].mxu0 %vm230_vm1, %v192_v6  ;;  %v343_v14 = vrot.slane %v488_v13, 1 }
  0x12   : > { %v212_v8 = vshrl.u32 %v477_v7, 16  ;;  %v214_v9 = vshll.u32 %v477_v7, 16  ;;  %522 = vmatpush3.bf16.msra.mxu0 %v546_v4  ;;  %525 = vmatprep.mubr.msk.bf16.mxu0 %vm559_vm0, %v558_v1 }
  0x13   : > { %523 = vmatprep.subr.bf16.mxu0 %v558_v1 }
  0x14   : > { %v216_v11 = vrot.slane %v214_v9, 1 }
  0x16   : > { %v217_v12 = vor.u32 %v216_v11, %v212_v8  ;;  %524 = vmatpush3.bf16.msra.mxu0 %v549_v10 }
  0x18   : > { %510 = vmatmul.mubr.msk.bf16.vlgmr.msra.gmra.mrb[0].mxu1 %vm230_vm1, %v217_v12 }
  0x1d   : > { %526 = vmatmul.mubr.msk.bf16.vlgmr.msra.gmra.mrb[0].mxu0 %vm230_vm1, %v343_v14 }
  0xeb   : > { %v268_v15 = vpop.f32.mrb[0].mxu1 }
  0xec   : > { %v511_v16 = vpop.f32.mrb[1].mxu1 }
  0xed   : > { %v271_v17 = vpop.f32.mrb[2].mxu1 }
  0xee   : > { %v512_v18 = vpop.f32.mrb[3].mxu1 }
  0xf0   : > { %v393_v19 = vpop.f32.mrb[0].mxu0 }
  0xf1   : > { %v529_v21 = vadd.f32 %v393_v19, %v268_v15  ;;  %v527_v22 = vpop.f32.mrb[1].mxu0 }
  0xf2   : > { %v396_v24 = vpop.f32.mrb[2].mxu0 }
  0xf3   : > { %v407_v25 = vmul.f32 %v529_v21, %v492_v20  ;;  %v528_v26 = vpop.f32.mrb[3].mxu0 }
  0xf5   : > { %v415_v27 = vadd.f32 %v493_v23, %v407_v25 }
  0xf7   : > { %v416_v28 = vmax.f32 %v415_v27, 0.0 }
  0xf9   : > { %v417_v29 = vpack.c.bf16 %v416_v28, %v416_v28 }
  0xfb   : > { %419 = vst.msk [vmem:[%s190_s13] sm:$0x1] %vm418_vm2, %v417_v29 }
  0xfc PF: > { %s14_s15 = sadd.s32 1, %s556_s15  }
  0xfd   : > { %p11_p4 = scmp.ge.s32.totalorder %s14_s15, 4  }
  0xff   :  { %13 = sbr.rel (!%p11_p4) target bundleno = 1 (0x1), region = 68 }

// kernel: _lambda_.37
= control target key start
LH: loop header
LB: loop body
LE: loop exit
PB: predicated region body
PF: predicated region fallthrough
CT: control target
= control target key end

     0   :  { %s644_s18 = smov 0   ;;  %s699_s0 = inlined_call_operand.vmem [shape: bf16[2,4,32], index: 0, kind: input, shape index: {}]   ;;  %s700_s1 = inlined_call_operand.vmem [shape: bf16[3,32,32], index: 1, kind: input, shape index: {}]   ;;  %s701_s2 = inlined_call_operand.vmem [shape: f32[1,32], index: 2, kind: input, shape index: {}]   ;;  %s702_s3 = inlined_call_operand.vmem [shape: f32[1,32], index: 3, kind: input, shape index: {}]   ;;  %s703_s4 = inlined_call_operand.vmem [shape: bf16[2,2,32], index: 4, kind: input, shape index: {}]   ;;  %s704_s5 = inlined_call_operand.vmem [shape: bf16[2,2,32], index: 5, kind: output, shape index: {}]  }
   0x1 LB: > { %s521_s19 = sadd.s32 4294967295, %s610_s18   ;;  %p525_p0 = scmp.ge.s32.totalorder %s610_s18, 1  ;;  %s610_s18 = sphi %s644_s18, %s15_s18  }
   0x2   : > { %p194_p1 = scmp.lt.s32.totalorder %s610_s18, 3 }
   0x4   : > { %p195_p2 = pnand %p525_p0, %p194_p1 }
   0x5   : > { %v598_v0 = vld [vmem:[%s700_s1] sm:$0xff] (!%p195_p2)   ;;  %v612_v1 = vmov (!%p195_p2), 0.0   ;;  %v599_v2 = vld [vmem:[%s700_s1 + $0x8] sm:$0xff] (!%p195_p2)   ;;  %vm613_vm0 = vmmov (!%p195_p2), 0   ;;  %p222_p3 = scmp.lt.s32.totalorder (!%p195_p2), %s521_s19, 1  ;;  %v601_v3 = vld [vmem:[%s700_s1 + $0x10] sm:$0xff] (!%p195_p2)  }
   0x6   : > { %198 = sbr.rel (%p195_p2) target bundleno = 256 (0x100), region = 40  ;;  %567 = vmatprep.subr.bf16.mxu0 (!%p195_p2), %v612_v1  ;;  %559 = vmatprep.subr.bf16.mxu1 (!%p195_p2), %v612_v1  ;;  %vm271_vm1 = vcmask (!%p195_p2), 261120   ;;  %v600_v4 = vld [vmem:[%s700_s1 + $0x20] sm:$0xff] (!%p195_p2)   ;;  %v602_v5 = vld [vmem:[%s700_s1 + $0x18] sm:$0xff] (!%p195_p2)   ;;  %v603_v10 = vld [vmem:[%s700_s1 + $0x28] sm:$0xff] (!%p195_p2)   ;;  %vm463_vm2 = vcmask (!%p195_p2), 253952  }
   0x7   : > { %568 = vmatpush3.bf16.msra.mxu0 (!%p195_p2), %v598_v0  ;;  %571 = vmatprep.mubr.msk.bf16.mxu0 (!%p195_p2), %vm613_vm0, %v612_v1  ;;  %v546_v20 = vld [vmem:[%s701_s2] ss:$0 sm:$0xff] (!%p195_p2) }
   0x8   : > { %569 = vmatprep.subr.bf16.mxu0 (!%p195_p2), %v612_v1  ;;  %563 = vmatprep.mubr.msk.bf16.mxu1 (!%p195_p2), %vm613_vm0, %v612_v1  ;;  %v547_v23 = vld [vmem:[%s702_s3] ss:$0 sm:$0xff] (!%p195_p2) }
   0x9   : > { %560 = vmatpush3.bf16.msra.mxu1 (!%p195_p2), %v601_v3 }
   0xa   : > { %561 = vmatprep.subr.bf16.mxu1 (!%p195_p2), %v612_v1 }
   0xb   : > { %570 = vmatpush3.bf16.msra.mxu0 (!%p195_p2), %v599_v2 }
   0xc   : > { %575 = vmatprep.subr.bf16.mxu0 (!%p195_p2), %v612_v1 }
   0xd   : > { %s706_s19 = smov (!%p222_p3, %s521_s19), 1  ;;  %562 = vmatpush3.bf16.msra.mxu1 %v602_v5 }
   0xe   : > { %s526_s26 = sshll.u32 %s706_s19, 1  ;;  %s228_s13 = scalar_lea.vmem %s703_s4, %s706_s19 }
   0xf   : > { %s225_s8 = scalar_lea.vmem %s699_s0, %s526_s26  ;;  %v458_v24 = vld [vmem:[%s228_s13] sm:$0x1]  ;;  %s231_s22 = scalar_lea.vmem %s704_s5, %s706_s19 }
  0x10   : > { %v233_v6 = vld [vmem:[%s225_s8] sm:$0x1]  ;;  %v542_v13 = vld.sshfl [vmem:[%s225_s8] sm:$0x2 pattern:$0x76325410]  ;;  %v459_v29 = vunpack.c.l.bf16 %v458_v24 }
  0x11   : > { %v531_v7 = vld.sshfl [vmem:[%s225_s8] sm:$0x3 pattern:$0x76325410]  ;;  %572 = vmatmul.mubr.msk.bf16.vlgmr.msra.gmra.mrb[0].mxu0 %vm271_vm1, %v233_v6  ;;  %v384_v14 = vrot.slane %v542_v13, 1 }
  0x12   : > { %v253_v8 = vshrl.u32 %v531_v7, 16  ;;  %v255_v9 = vshll.u32 %v531_v7, 16  ;;  %576 = vmatpush3.bf16.msra.mxu0 %v600_v4  ;;  %579 = vmatprep.mubr.msk.bf16.mxu0 %vm613_vm0, %v612_v1 }
  0x13   : > { %577 = vmatprep.subr.bf16.mxu0 %v612_v1 }
  0x14   : > { %v257_v11 = vrot.slane %v255_v9, 1 }
  0x16   : > { %v258_v12 = vor.u32 %v257_v11, %v253_v8  ;;  %578 = vmatpush3.bf16.msra.mxu0 %v603_v10 }
  0x18   : > { %564 = vmatmul.mubr.msk.bf16.vlgmr.msra.gmra.mrb[0].mxu1 %vm271_vm1, %v258_v12 }
  0x1d   : > { %580 = vmatmul.mubr.msk.bf16.vlgmr.msra.gmra.mrb[0].mxu0 %vm271_vm1, %v384_v14 }
  0xeb   : > { %v309_v15 = vpop.f32.mrb[0].mxu1 }
  0xec   : > { %v565_v16 = vpop.f32.mrb[1].mxu1 }
  0xed   : > { %v312_v17 = vpop.f32.mrb[2].mxu1 }
  0xee   : > { %v566_v18 = vpop.f32.mrb[3].mxu1 }
  0xf0   : > { %v434_v19 = vpop.f32.mrb[0].mxu0 }
  0xf1   : > { %v583_v21 = vadd.f32 %v434_v19, %v309_v15  ;;  %v581_v22 = vpop.f32.mrb[1].mxu0 }
  0xf2   : > { %v437_v25 = vpop.f32.mrb[2].mxu0 }
  0xf3   : > { %v448_v26 = vmul.f32 %v583_v21, %v546_v20  ;;  %v582_v27 = vpop.f32.mrb[3].mxu0 }
  0xf5   : > { %v456_v28 = vadd.f32 %v547_v23, %v448_v26 }
  0xf7   : > { %v457_v30 = vmax.f32 %v456_v28, 0.0 }
  0xf9   : > { %v460_v31 = vadd.f32 %v459_v29, %v457_v30 }
  0xfb   : > { %v461_v32 = vmax.f32 %v460_v31, 0.0 }
  0xfd   : > { %v462_v33 = vpack.c.bf16 %v461_v32, %v461_v32 }
  0xff   : > { %464 = vst.msk [vmem:[%s231_s22] sm:$0x1] %vm463_vm2, %v462_v33 }
 0x100 PF: > { %s15_s18 = sadd.s32 1, %s610_s18  }
 0x101   : > { %p12_p4 = scmp.ge.s32.totalorder %s15_s18, 4  }
 0x103   :  { %14 = sbr.rel (!%p12_p4) target bundleno = 1 (0x1), region = 75 }

// kernel: _lambda_.41
= control target key start
LH: loop header
LB: loop body
LE: loop exit
PB: predicated region body
PF: predicated region fallthrough
CT: control target
= control target key end

     0   :  { %s373_s15 = smov 0   ;;  %s402_s0 = inlined_call_operand.vmem [shape: bf16[2,1,32], index: 0, kind: input, shape index: {}]   ;;  %s403_s1 = inlined_call_operand.vmem [shape: bf16[1,32,64], index: 1, kind: input, shape index: {}]   ;;  %s404_s2 = inlined_call_operand.vmem [shape: f32[1,64], index: 2, kind: input, shape index: {}]   ;;  %s405_s3 = inlined_call_operand.vmem [shape: f32[1,64], index: 3, kind: input, shape index: {}]   ;;  %s406_s4 = inlined_call_operand.vmem [shape: bf16[2,1,64], index: 4, kind: output, shape index: {}]  }
   0x1 LB: > { %s305_s16 = sadd.s32 4294967295, %s344_s15   ;;  %p309_p0 = scmp.ge.s32.totalorder %s344_s15, 1  ;;  %s344_s15 = sphi %s373_s15, %s14_s15  }
   0x2   : > { %p160_p1 = scmp.lt.s32.totalorder %s344_s15, 3 }
   0x4   : > { %p161_p2 = pnand %p309_p0, %p160_p1 }
   0x5   : > { %v336_v0 = vld [vmem:[%s403_s1] sm:$0xff] (!%p161_p2)   ;;  %v346_v1 = vmov (!%p161_p2), 0.0   ;;  %v337_v2 = vld [vmem:[%s403_s1 + $0x8] sm:$0xff] (!%p161_p2)   ;;  %vm347_vm0 = vmmov (!%p161_p2), 0   ;;  %p182_p3 = scmp.lt.s32.totalorder (!%p161_p2), %s305_s16, 1  ;;  %vm206_vm1 = vcmask (!%p161_p2), 261120  }
   0x6   : > { %164 = sbr.rel (%p161_p2) target bundleno = 236 (0xec), region = 36  ;;  %318 = vmatprep.subr.bf16.mxu0 (!%p161_p2), %v346_v1  ;;  %322 = vmatprep.mubr.msk.bf16.mxu0 (!%p161_p2), %vm347_vm0, %v346_v1  ;;  %v250_v4 = vld [vmem:[%s404_s2] sm:$0x1] (!%p161_p2)  ;;  %vm255_vm2 = vcmask (!%p161_p2), 516096   ;;  %vm256_vm3 = vsmask.f32 (!%p161_p2), 256 }
   0x7   : > { %319 = vmatpush3.bf16.msra.mxu0 (!%p161_p2), %v336_v0  ;;  %v252_v6 = vld [vmem:[%s405_s3] sm:$0x1] (!%p161_p2)  ;;  %vm257_vm4 = vmand (!%p161_p2), %vm255_vm2, %vm256_vm3 }
   0x8   : > { %320 = vmatprep.subr.bf16.mxu0 (!%p161_p2), %v346_v1 }
   0xb   : > { %321 = vmatpush3.bf16.msra.mxu0 (!%p161_p2), %v337_v2 }
   0xd   : > { %s408_s16 = smov (!%p182_p3, %s305_s16), 1 }
   0xe   : > { %s184_s23 = scalar_lea.vmem %s402_s0, %s408_s16  ;;  %s187_s30 = scalar_lea.vmem %s406_s4, %s408_s16 }
   0xf   : > { %v189_v3 = vld [vmem:[%s184_s23] sm:$0x1] }
  0x10   : > { %323 = vmatmul.mubr.msk.bf16.vlgmr.msra.gmra.mrb[0].mxu0 %vm206_vm1, %v189_v3  ;;  %v258_v12 = vld [vmem:[%s187_s30] sm:$0x1] }
  0xe3   : > { %v244_v5 = vpop.f32.mrb[0].mxu0 }
  0xe4   : > { %v251_v7 = vmul.f32 %v250_v4, %v244_v5  ;;  %v324_v8 = vpop.f32.mrb[1].mxu0 }
  0xe5   : > { %v247_v9 = vpop.f32.mrb[2].mxu0 }
  0xe6   : > { %v253_v10 = vadd.f32 %v252_v6, %v251_v7  ;;  %v325_v11 = vpop.f32.mrb[3].mxu0 }
  0xe8   : > { %v254_v13 = vpack.c.bf16 %v253_v10, %v253_v10 }
  0xea   : > { %v259_v14 = vsel %vm257_vm4, %v254_v13, %v258_v12 }
  0xeb   : > { %260 = vst [vmem:[%s187_s30] sm:$0x1] %v259_v14 }
  0xec PF: > { %s14_s15 = sadd.s32 1, %s344_s15  }
  0xed   : > { %p11_p4 = scmp.ge.s32.totalorder %s14_s15, 4  }
  0xef   :  { %13 = sbr.rel (!%p11_p4) target bundleno = 1 (0x1), region = 66 }

// kernel: _lambda_.40
= control target key start
LH: loop header
LB: loop body
LE: loop exit
PB: predicated region body
PF: predicated region fallthrough
CT: control target
= control target key end

     0   :  { %s652_s21 = smov 0   ;;  %s711_s0 = inlined_call_operand.vmem [shape: bf16[2,1,32], index: 0, kind: input, shape index: {}]   ;;  %s712_s1 = inlined_call_operand.vmem [shape: bf16[2,1,32], index: 1, kind: input, shape index: {}]   ;;  %s713_s2 = inlined_call_operand.vmem [shape: bf16[2,1,32], index: 2, kind: input, shape index: {}]   ;;  %s714_s3 = inlined_call_operand.vmem [shape: bf16[3,32,64], index: 3, kind: input, shape index: {}]   ;;  %s715_s4 = inlined_call_operand.vmem [shape: f32[1,64], index: 4, kind: input, shape index: {}]   ;;  %s716_s5 = inlined_call_operand.vmem [shape: f32[1,64], index: 5, kind: input, shape index: {}]   ;;  %s717_s6 = inlined_call_operand.vmem [shape: bf16[2,1,64], index: 6, kind: output, shape index: {}]  }
   0x1 LB: > { %s529_s22 = sadd.s32 4294967295, %s613_s21   ;;  %p533_p0 = scmp.ge.s32.totalorder %s613_s21, 1  ;;  %s613_s21 = sphi %s652_s21, %s16_s21  }
   0x2   : > { %p226_p1 = scmp.lt.s32.totalorder %s613_s21, 3 }
   0x4   : > { %p227_p2 = pnand %p533_p0, %p226_p1 }
   0x5   : > { %v601_v0 = vld [vmem:[%s714_s3] sm:$0xff] (!%p227_p2)   ;;  %v615_v1 = vmov (!%p227_p2), 0.0   ;;  %v602_v2 = vld [vmem:[%s714_s3 + $0x8] sm:$0xff] (!%p227_p2)   ;;  %vm616_vm0 = vmmov (!%p227_p2), 0   ;;  %p258_p3 = scmp.lt.s32.totalorder (!%p227_p2), %s529_s22, 1  ;;  %v604_v3 = vld [vmem:[%s714_s3 + $0x10] sm:$0xff] (!%p227_p2)  }
   0x6   : > { %230 = sbr.rel (%p227_p2) target bundleno = 252 (0xfc), region = 44  ;;  %570 = vmatprep.subr.bf16.mxu0 (!%p227_p2), %v615_v1  ;;  %562 = vmatprep.subr.bf16.mxu1 (!%p227_p2), %v615_v1  ;;  %vm294_vm1 = vcmask (!%p227_p2), 261120   ;;  %v603_v4 = vld [vmem:[%s714_s3 + $0x20] sm:$0xff] (!%p227_p2)   ;;  %v605_v5 = vld [vmem:[%s714_s3 + $0x18] sm:$0xff] (!%p227_p2)   ;;  %v606_v7 = vld [vmem:[%s714_s3 + $0x28] sm:$0xff] (!%p227_p2)   ;;  %vm461_vm2 = vcmask (!%p227_p2), 516096  }
   0x7   : > { %571 = vmatpush3.bf16.msra.mxu0 (!%p227_p2), %v601_v0  ;;  %574 = vmatprep.mubr.msk.bf16.mxu0 (!%p227_p2), %vm616_vm0, %v615_v1  ;;  %v455_v15 = vld [vmem:[%s715_s4] sm:$0x1] (!%p227_p2)  ;;  %vm462_vm3 = vsmask.f32 (!%p227_p2), 256 }
   0x8   : > { %572 = vmatprep.subr.bf16.mxu0 (!%p227_p2), %v615_v1  ;;  %566 = vmatprep.mubr.msk.bf16.mxu1 (!%p227_p2), %vm616_vm0, %v615_v1  ;;  %v457_v18 = vld [vmem:[%s716_s5] sm:$0x1] (!%p227_p2)  ;;  %vm463_vm4 = vmand (!%p227_p2), %vm461_vm2, %vm462_vm3 }
   0x9   : > { %563 = vmatpush3.bf16.msra.mxu1 (!%p227_p2), %v604_v3 }
   0xa   : > { %564 = vmatprep.subr.bf16.mxu1 (!%p227_p2), %v615_v1 }
   0xb   : > { %573 = vmatpush3.bf16.msra.mxu0 (!%p227_p2), %v602_v2 }
   0xc   : > { %578 = vmatprep.subr.bf16.mxu0 (!%p227_p2), %v615_v1 }
   0xd   : > { %s719_s22 = smov (!%p258_p3, %s529_s22), 1  ;;  %565 = vmatpush3.bf16.msra.mxu1 %v605_v5 }
   0xe   : > { %s260_s7 = scalar_lea.vmem %s711_s0, %s719_s22  ;;  %s263_s14 = scalar_lea.vmem %s712_s1, %s719_s22 }
   0xf   : > { %v271_v6 = vld [vmem:[%s260_s7] sm:$0x1]  ;;  %s266_s19 = scalar_lea.vmem %s713_s2, %s719_s22  ;;  %s269_s28 = scalar_lea.vmem %s717_s6, %s719_s22 }
  0x10   : > { %575 = vmatmul.mubr.msk.bf16.vlgmr.msra.gmra.mrb[0].mxu0 %vm294_vm1, %v271_v6  ;;  %v276_v8 = vld [vmem:[%s263_s14] sm:$0x1] }
  0x11   : > { %579 = vmatpush3.bf16.msra.mxu0 %v603_v4  ;;  %582 = vmatprep.mubr.msk.bf16.mxu0 %vm616_vm0, %v615_v1  ;;  %v393_v9 = vld [vmem:[%s266_s19] sm:$0x1] }
  0x12   : > { %580 = vmatprep.subr.bf16.mxu0 %v615_v1  ;;  %567 = vmatmul.mubr.msk.bf16.vlgmr.msra.gmra.mrb[0].mxu1 %vm294_vm1, %v276_v8  ;;  %v464_v24 = vld [vmem:[%s269_s28] sm:$0x1] }
  0x15   : > { %581 = vmatpush3.bf16.msra.mxu0 %v606_v7 }
  0x1c   : > { %583 = vmatmul.mubr.msk.bf16.vlgmr.msra.gmra.mrb[0].mxu0 %vm294_vm1, %v393_v9 }
  0xe5   : > { %v332_v10 = vpop.f32.mrb[0].mxu1 }
  0xe6   : > { %v568_v11 = vpop.f32.mrb[1].mxu1 }
  0xe7   : > { %v335_v12 = vpop.f32.mrb[2].mxu1 }
  0xe8   : > { %v569_v13 = vpop.f32.mrb[3].mxu1 }
  0xef   : > { %v448_v14 = vpop.f32.mrb[0].mxu0 }
  0xf0   : > { %v586_v16 = vadd.f32 %v448_v14, %v332_v10  ;;  %v584_v17 = vpop.f32.mrb[1].mxu0 }
  0xf1   : > { %v451_v19 = vpop.f32.mrb[2].mxu0 }
  0xf2   : > { %v456_v20 = vmul.f32 %v586_v16, %v455_v15  ;;  %v585_v21 = vpop.f32.mrb[3].mxu0 }
  0xf4   : > { %v458_v22 = vadd.f32 %v457_v18, %v456_v20 }
  0xf6   : > { %v459_v23 = vmax.f32 %v458_v22, 0.0 }
  0xf8   : > { %v460_v25 = vpack.c.bf16 %v459_v23, %v459_v23 }
  0xfa   : > { %v465_v26 = vsel %vm463_vm4, %v460_v25, %v464_v24 }
  0xfb   : > { %466 = vst [vmem:[%s269_s28] sm:$0x1] %v465_v26 }
  0xfc PF: > { %s16_s21 = sadd.s32 1, %s613_s21  }
  0xfd   : > { %p13_p4 = scmp.ge.s32.totalorder %s16_s21, 4  }
  0xff   :  { %15 = sbr.rel (!%p13_p4) target bundleno = 1 (0x1), region = 82 }

// kernel: _lambda_.42
= control target key start
LH: loop header
LB: loop body
LE: loop exit
PB: predicated region body
PF: predicated region fallthrough
CT: control target
= control target key end

     0   :  { %s716_s18 = smov 0   ;;  %s789_s0 = inlined_call_operand.vmem [shape: bf16[2,3,64], index: 0, kind: input, shape index: {}]   ;;  %s790_s1 = inlined_call_operand.vmem [shape: bf16[3,64,64], index: 1, kind: input, shape index: {}]   ;;  %s791_s2 = inlined_call_operand.vmem [shape: f32[1,64], index: 2, kind: input, shape index: {}]   ;;  %s792_s3 = inlined_call_operand.vmem [shape: f32[1,64], index: 3, kind: input, shape index: {}]   ;;  %s793_s4 = inlined_call_operand.vmem [shape: bf16[2,1,64], index: 4, kind: input, shape index: {}]   ;;  %s794_s5 = inlined_call_operand.vmem [shape: bf16[2,1,64], index: 5, kind: output, shape index: {}]  }
   0x1 LB: > { %s556_s19 = sadd.s32 4294967295, %s681_s18   ;;  %p560_p0 = scmp.ge.s32.totalorder %s681_s18, 1  ;;  %s681_s18 = sphi %s716_s18, %s15_s18  }
   0x2   : > { %p194_p1 = scmp.lt.s32.totalorder %s681_s18, 3 }
   0x4   : > { %p195_p2 = pnand %p560_p0, %p194_p1 }
   0x5   : > { %v663_v0 = vld [vmem:[%s790_s1] sm:$0xff] (!%p195_p2)   ;;  %v683_v1 = vmov (!%p195_p2), 0.0   ;;  %v255_v2 = vlaneseq (!%p195_p2)  ;;  %v664_v3 = vld [vmem:[%s790_s1 + $0x8] sm:$0xff] (!%p195_p2)   ;;  %vm684_vm0 = vmmov (!%p195_p2), 0   ;;  %p222_p3 = scmp.lt.s32.totalorder (!%p195_p2), %s556_s19, 1  ;;  %v665_v5 = vld [vmem:[%s790_s1 + $0x10] sm:$0xff] (!%p195_p2)  }
   0x6   : > { %198 = sbr.rel (%p195_p2) target bundleno = 266 (0x10a), region = 40  ;;  %623 = vmatprep.subr.bf16.mxu0 (!%p195_p2), %v683_v1  ;;  %611 = vmatprep.subr.bf16.mxu1 (!%p195_p2), %v683_v1  ;;  %v667_v4 = vld [vmem:[%s790_s1 + $0x20] sm:$0xff] (!%p195_p2)   ;;  %v685_v7 = vmov (!%p195_p2), 1983009808   ;;  %v669_v9 = vld [vmem:[%s790_s1 + $0x28] sm:$0xff] (!%p195_p2)   ;;  %v666_v11 = vld [vmem:[%s790_s1 + $0x18] sm:$0xff] (!%p195_p2)  }
   0x7   : > { %624 = vmatpush3.bf16.msra.mxu0 (!%p195_p2), %v663_v0  ;;  %631 = vmatprep.mubr.msk.bf16.mxu0 (!%p195_p2), %vm684_vm0, %v683_v1  ;;  %v256_v6 = vshrl.u32 (!%p195_p2), %v255_v2, 7  ;;  %v253_v8 = vunpack.c.l.s4 (!%p195_p2), %v685_v7  ;;  %v671_v13 = vld [vmem:[%s790_s1 + $0x30] sm:$0xff] (!%p195_p2)   ;;  %vm286_vm1 = vcmask (!%p195_p2), 523264   ;;  %v668_v16 = vld [vmem:[%s790_s1 + $0x40] sm:$0xff] (!%p195_p2)   ;;  %v673_v17 = vld [vmem:[%s790_s1 + $0x38] sm:$0xff] (!%p195_p2)   ;;  %vm494_vm2 = vcmask (!%p195_p2), 516096  }
   0x8   : > { %625 = vmatprep.subr.bf16.mxu0 (!%p195_p2), %v683_v1  ;;  %619 = vmatprep.mubr.msk.bf16.mxu1 (!%p195_p2), %vm684_vm0, %v683_v1  ;;  %v670_v19 = vld [vmem:[%s790_s1 + $0x48] sm:$0xff] (!%p195_p2)   ;;  %v672_v20 = vld [vmem:[%s790_s1 + $0x50] sm:$0xff] (!%p195_p2)   ;;  %v674_v22 = vld [vmem:[%s790_s1 + $0x58] sm:$0xff] (!%p195_p2)   ;;  %vm495_vm3 = vsmask.f32 (!%p195_p2), 256 }
   0x9   : > { %612 = vmatpush3.bf16.msra.mxu1 (!%p195_p2), %v667_v4  ;;  %v254_v10 = vunpack.c.0.s8 (!%p195_p2), %v253_v8  ;;  %v484_v29 = vld [vmem:[%s791_s2] sm:$0x1] (!%p195_p2)  ;;  %vm496_vm4 = vmand (!%p195_p2), %vm494_vm2, %vm495_vm3 }
   0xa   : > { %613 = vmatprep.subr.bf16.mxu1 (!%p195_p2), %v683_v1  ;;  %v486_v32 = vld [vmem:[%s792_s3] sm:$0x1] (!%p195_p2) }
   0xb   : > { %626 = vmatpush3.bf16.msra.mxu0 (!%p195_p2), %v664_v3  ;;  %v257_v12 = vsub.s32 (!%p195_p2), %v254_v10, %v256_v6 }
   0xc   : > { %627 = vmatprep.subr.bf16.mxu0 (!%p195_p2), %v683_v1 }
   0xd   : > { %s796_s19 = smov (!%p222_p3, %s556_s19), 1  ;;  %614 = vmatpush3.bf16.msra.mxu1 %v669_v9 }
   0xe   : > { %s561_s28 = sshll.u32 %s796_s19, 1  ;;  %615 = vmatprep.subr.bf16.mxu1 %v683_v1  ;;  %s228_s27 = scalar_lea.vmem %s793_s4, %s796_s19 }
   0xf   : > { %s225_s10 = scalar_lea.vmem %s789_s0, %s561_s28  ;;  %628 = vmatpush3.bf16.msra.mxu0 %v665_v5  ;;  %v489_v33 = vld [vmem:[%s228_s27] sm:$0x1]  ;;  %s231_s9 = scalar_lea.vmem %s794_s5, %s796_s19 }
  0x10   : > { %629 = vmatprep.subr.bf16.mxu0 %v683_v1  ;;  %v233_v14 = vld [vmem:[%s225_s10] sm:$0x1]  ;;  %v588_v21 = vld.sshfl [vmem:[%s225_s10] sm:$0x2 pattern:$0x76325410]  ;;  %v490_v38 = vunpack.c.l.bf16 %v489_v33 }
  0x11   : > { %v258_v15 = vrot.slane %v233_v14, %v257_v12  ;;  %616 = vmatpush3.bf16.msra.mxu1 %v671_v13  ;;  %v415_v23 = vrot.slane %v588_v21, 1  ;;  %v497_v42 = vld [vmem:[%s231_s9] sm:$0x1] }
  0x12   : > { %617 = vmatprep.subr.bf16.mxu1 %v683_v1 }
  0x13   : > { %630 = vmatpush3.bf16.msra.mxu0 %v666_v11  ;;  %v260_v18 = vshrl.u32 %v258_v15, 16 }
  0x14   : > { %635 = vmatprep.subr.bf16.mxu0 %v683_v1 }
  0x15   : > { %618 = vmatpush3.bf16.msra.mxu1 %v673_v17 }
  0x16   : > { %632 = vmatmul.mubr.msk.bf16.vlgmr.msra.gmra.mrb[0].mxu0 %vm286_vm1, %v233_v14 }
  0x17   : > { %636 = vmatpush3.bf16.msra.mxu0 %v668_v16  ;;  %643 = vmatprep.mubr.msk.bf16.mxu0 %vm684_vm0, %v683_v1 }
  0x18   : > { %637 = vmatprep.subr.bf16.mxu0 %v683_v1  ;;  %620 = vmatmul.mubr.msk.bf16.vlgmr.msra.gmra.mrb[0].mxu1 %vm286_vm1, %v260_v18 }
  0x1b   : > { %638 = vmatpush3.bf16.msra.mxu0 %v670_v19 }
  0x1c   : > { %639 = vmatprep.subr.bf16.mxu0 %v683_v1 }
  0x1f   : > { %640 = vmatpush3.bf16.msra.mxu0 %v672_v20 }
  0x20   : > { %641 = vmatprep.subr.bf16.mxu0 %v683_v1 }
  0x23   : > { %642 = vmatpush3.bf16.msra.mxu0 %v674_v22 }
  0x26   : > { %644 = vmatmul.mubr.msk.bf16.vlgmr.msra.gmra.mrb[0].mxu0 %vm286_vm1, %v415_v23 }
  0xeb   : > { %v324_v24 = vpop.f32.mrb[0].mxu1 }
  0xec   : > { %v621_v25 = vpop.f32.mrb[1].mxu1 }
  0xed   : > { %v327_v26 = vpop.f32.mrb[2].mxu1 }
  0xee   : > { %v622_v27 = vpop.f32.mrb[3].mxu1 }
  0xf9   : > { %v477_v28 = vpop.f32.mrb[0].mxu0 }
  0xfa   : > { %v647_v30 = vadd.f32 %v477_v28, %v324_v24  ;;  %v645_v31 = vpop.f32.mrb[1].mxu0 }
  0xfb   : > { %v480_v34 = vpop.f32.mrb[2].mxu0 }
  0xfc   : > { %v485_v35 = vmul.f32 %v647_v30, %v484_v29  ;;  %v646_v36 = vpop.f32.mrb[3].mxu0 }
  0xfe   : > { %v487_v37 = vadd.f32 %v486_v32, %v485_v35 }
 0x100   : > { %v488_v39 = vmax.f32 %v487_v37, 0.0 }
 0x102   : > { %v491_v40 = vadd.f32 %v490_v38, %v488_v39 }
 0x104   : > { %v492_v41 = vmax.f32 %v491_v40, 0.0 }
 0x106   : > { %v493_v43 = vpack.c.bf16 %v492_v41, %v492_v41 }
 0x108   : > { %v498_v44 = vsel %vm496_vm4, %v493_v43, %v497_v42 }
 0x109   : > { %499 = vst [vmem:[%s231_s9] sm:$0x1] %v498_v44 }
 0x10a PF: > { %s15_s18 = sadd.s32 1, %s681_s18  }
 0x10b   : > { %p12_p4 = scmp.ge.s32.totalorder %s15_s18, 4  }
 0x10d   :  { %14 = sbr.rel (!%p12_p4) target bundleno = 1 (0x1), region = 75 }

// kernel: _lambda_.43
= control target key start
LH: loop header
LB: loop body
LE: loop exit
PB: predicated region body
PF: predicated region fallthrough
CT: control target
= control target key end

     0   :  { %s657_s15 = smov 0   ;;  %s726_s0 = inlined_call_operand.vmem [shape: bf16[2,3,64], index: 0, kind: input, shape index: {}]   ;;  %s727_s1 = inlined_call_operand.vmem [shape: bf16[3,64,64], index: 1, kind: input, shape index: {}]   ;;  %s728_s2 = inlined_call_operand.vmem [shape: f32[1,64], index: 2, kind: input, shape index: {}]   ;;  %s729_s3 = inlined_call_operand.vmem [shape: f32[1,64], index: 3, kind: input, shape index: {}]   ;;  %s730_s4 = inlined_call_operand.vmem [shape: bf16[2,1,64], index: 4, kind: output, shape index: {}]  }
   0x1 LB: > { %s502_s16 = sadd.s32 4294967295, %s627_s15   ;;  %p506_p0 = scmp.ge.s32.totalorder %s627_s15, 1  ;;  %s627_s15 = sphi %s657_s15, %s14_s15  }
   0x2   : > { %p161_p1 = scmp.lt.s32.totalorder %s627_s15, 3 }
   0x4   : > { %p162_p2 = pnand %p506_p0, %p161_p1 }
   0x5   : > { %v609_v0 = vld [vmem:[%s727_s1] sm:$0xff] (!%p162_p2)   ;;  %v629_v1 = vmov (!%p162_p2), 0.0   ;;  %v214_v2 = vlaneseq (!%p162_p2)  ;;  %v610_v3 = vld [vmem:[%s727_s1 + $0x8] sm:$0xff] (!%p162_p2)   ;;  %vm630_vm0 = vmmov (!%p162_p2), 0   ;;  %p184_p3 = scmp.lt.s32.totalorder (!%p162_p2), %s502_s16, 1  ;;  %v611_v5 = vld [vmem:[%s727_s1 + $0x10] sm:$0xff] (!%p162_p2)  }
   0x6   : > { %165 = sbr.rel (%p162_p2) target bundleno = 262 (0x106), region = 36  ;;  %569 = vmatprep.subr.bf16.mxu0 (!%p162_p2), %v629_v1  ;;  %557 = vmatprep.subr.bf16.mxu1 (!%p162_p2), %v629_v1  ;;  %v613_v4 = vld [vmem:[%s727_s1 + $0x20] sm:$0xff] (!%p162_p2)   ;;  %v631_v7 = vmov (!%p162_p2), 1983009808   ;;  %v615_v9 = vld [vmem:[%s727_s1 + $0x28] sm:$0xff] (!%p162_p2)   ;;  %v612_v11 = vld [vmem:[%s727_s1 + $0x18] sm:$0xff] (!%p162_p2)  }
   0x7   : > { %570 = vmatpush3.bf16.msra.mxu0 (!%p162_p2), %v609_v0  ;;  %577 = vmatprep.mubr.msk.bf16.mxu0 (!%p162_p2), %vm630_vm0, %v629_v1  ;;  %v215_v6 = vshrl.u32 (!%p162_p2), %v214_v2, 7  ;;  %v212_v8 = vunpack.c.l.s4 (!%p162_p2), %v631_v7  ;;  %v617_v13 = vld [vmem:[%s727_s1 + $0x30] sm:$0xff] (!%p162_p2)   ;;  %vm245_vm1 = vcmask (!%p162_p2), 523264   ;;  %v614_v16 = vld [vmem:[%s727_s1 + $0x40] sm:$0xff] (!%p162_p2)   ;;  %v619_v17 = vld [vmem:[%s727_s1 + $0x38] sm:$0xff] (!%p162_p2)   ;;  %vm449_vm2 = vcmask (!%p162_p2), 516096  }
   0x8   : > { %571 = vmatprep.subr.bf16.mxu0 (!%p162_p2), %v629_v1  ;;  %565 = vmatprep.mubr.msk.bf16.mxu1 (!%p162_p2), %vm630_vm0, %v629_v1  ;;  %v616_v19 = vld [vmem:[%s727_s1 + $0x48] sm:$0xff] (!%p162_p2)   ;;  %v618_v20 = vld [vmem:[%s727_s1 + $0x50] sm:$0xff] (!%p162_p2)   ;;  %v620_v22 = vld [vmem:[%s727_s1 + $0x58] sm:$0xff] (!%p162_p2)   ;;  %vm450_vm3 = vsmask.f32 (!%p162_p2), 256 }
   0x9   : > { %558 = vmatpush3.bf16.msra.mxu1 (!%p162_p2), %v613_v4  ;;  %v213_v10 = vunpack.c.0.s8 (!%p162_p2), %v212_v8  ;;  %v443_v29 = vld [vmem:[%s728_s2] sm:$0x1] (!%p162_p2)  ;;  %vm451_vm4 = vmand (!%p162_p2), %vm449_vm2, %vm450_vm3 }
   0xa   : > { %559 = vmatprep.subr.bf16.mxu1 (!%p162_p2), %v629_v1  ;;  %v445_v32 = vld [vmem:[%s729_s3] sm:$0x1] (!%p162_p2) }
   0xb   : > { %572 = vmatpush3.bf16.msra.mxu0 (!%p162_p2), %v610_v3  ;;  %v216_v12 = vsub.s32 (!%p162_p2), %v213_v10, %v215_v6 }
   0xc   : > { %573 = vmatprep.subr.bf16.mxu0 (!%p162_p2), %v629_v1 }
   0xd   : > { %s732_s16 = smov (!%p184_p3, %s502_s16), 1  ;;  %560 = vmatpush3.bf16.msra.mxu1 %v615_v9 }
   0xe   : > { %s507_s25 = sshll.u32 %s732_s16, 1  ;;  %561 = vmatprep.subr.bf16.mxu1 %v629_v1  ;;  %s190_s27 = scalar_lea.vmem %s730_s4, %s732_s16 }
   0xf   : > { %s187_s6 = scalar_lea.vmem %s726_s0, %s507_s25  ;;  %574 = vmatpush3.bf16.msra.mxu0 %v611_v5  ;;  %v452_v38 = vld [vmem:[%s190_s27] sm:$0x1] }
  0x10   : > { %575 = vmatprep.subr.bf16.mxu0 %v629_v1  ;;  %v192_v14 = vld [vmem:[%s187_s6] sm:$0x1]  ;;  %v534_v21 = vld.sshfl [vmem:[%s187_s6] sm:$0x2 pattern:$0x76325410] }
  0x11   : > { %v217_v15 = vrot.slane %v192_v14, %v216_v12  ;;  %562 = vmatpush3.bf16.msra.mxu1 %v617_v13  ;;  %v374_v23 = vrot.slane %v534_v21, 1 }
  0x12   : > { %563 = vmatprep.subr.bf16.mxu1 %v629_v1 }
  0x13   : > { %576 = vmatpush3.bf16.msra.mxu0 %v612_v11  ;;  %v219_v18 = vshrl.u32 %v217_v15, 16 }
  0x14   : > { %581 = vmatprep.subr.bf16.mxu0 %v629_v1 }
  0x15   : > { %564 = vmatpush3.bf16.msra.mxu1 %v619_v17 }
  0x16   : > { %578 = vmatmul.mubr.msk.bf16.vlgmr.msra.gmra.mrb[0].mxu0 %vm245_vm1, %v192_v14 }
  0x17   : > { %582 = vmatpush3.bf16.msra.mxu0 %v614_v16  ;;  %589 = vmatprep.mubr.msk.bf16.mxu0 %vm630_vm0, %v629_v1 }
  0x18   : > { %583 = vmatprep.subr.bf16.mxu0 %v629_v1  ;;  %566 = vmatmul.mubr.msk.bf16.vlgmr.msra.gmra.mrb[0].mxu1 %vm245_vm1, %v219_v18 }
  0x1b   : > { %584 = vmatpush3.bf16.msra.mxu0 %v616_v19 }
  0x1c   : > { %585 = vmatprep.subr.bf16.mxu0 %v629_v1 }
  0x1f   : > { %586 = vmatpush3.bf16.msra.mxu0 %v618_v20 }
  0x20   : > { %587 = vmatprep.subr.bf16.mxu0 %v629_v1 }
  0x23   : > { %588 = vmatpush3.bf16.msra.mxu0 %v620_v22 }
  0x26   : > { %590 = vmatmul.mubr.msk.bf16.vlgmr.msra.gmra.mrb[0].mxu0 %vm245_vm1, %v374_v23 }
  0xeb   : > { %v283_v24 = vpop.f32.mrb[0].mxu1 }
  0xec   : > { %v567_v25 = vpop.f32.mrb[1].mxu1 }
  0xed   : > { %v286_v26 = vpop.f32.mrb[2].mxu1 }
  0xee   : > { %v568_v27 = vpop.f32.mrb[3].mxu1 }
  0xf9   : > { %v436_v28 = vpop.f32.mrb[0].mxu0 }
  0xfa   : > { %v593_v30 = vadd.f32 %v436_v28, %v283_v24  ;;  %v591_v31 = vpop.f32.mrb[1].mxu0 }
  0xfb   : > { %v439_v33 = vpop.f32.mrb[2].mxu0 }
  0xfc   : > { %v444_v34 = vmul.f32 %v593_v30, %v443_v29  ;;  %v592_v35 = vpop.f32.mrb[3].mxu0 }
  0xfe   : > { %v446_v36 = vadd.f32 %v445_v32, %v444_v34 }
 0x100   : > { %v447_v37 = vmax.f32 %v446_v36, 0.0 }
 0x102   : > { %v448_v39 = vpack.c.bf16 %v447_v37, %v447_v37 }
 0x104   : > { %v453_v40 = vsel %vm451_vm4, %v448_v39, %v452_v38 }
 0x105   : > { %454 = vst [vmem:[%s190_s27] sm:$0x1] %v453_v40 }
 0x106 PF: > { %s14_s15 = sadd.s32 1, %s627_s15  }
 0x107   : > { %p11_p4 = scmp.ge.s32.totalorder %s14_s15, 4  }
 0x109   :  { %13 = sbr.rel (!%p11_p4) target bundleno = 1 (0x1), region = 68 }

// kernel: _lambda_.45
= control target key start
LH: loop header
LB: loop body
LE: loop exit
PB: predicated region body
PF: predicated region fallthrough
CT: control target
= control target key end

     0   :  { %v170_v1 = vmov 0.0   ;;  %vm171_vm0 = vmmov 0   ;;  %s223_s0 = inlined_call_operand.vmem [shape: bf16[2,64], index: 0, kind: input, shape index: {}]   ;;  %s224_s1 = inlined_call_operand.vmem [shape: bf16[64,32], index: 1, kind: input, shape index: {}]   ;;  %s225_s2 = inlined_call_operand.vmem [shape: f32[1,32], index: 2, kind: input, shape index: {}]   ;;  %s226_s3 = inlined_call_operand.hbm [shape: f32[2,32], index: 3, kind: output, shape index: {}]  }
   0x1   :  { %v142_v0 = vld [vmem:[%s224_s1] sm:$0xff]   ;;  %127 = vmatprep.subr.bf16.mxu0 %v170_v1  ;;  %v143_v2 = vld [vmem:[%s224_s1 + $0x8] sm:$0xff]   ;;  %135 = vmatprep.mubr.msk.bf16.mxu0 %vm171_vm0, %v170_v1 }
   0x2   :  { %128 = vmatpush3.bf16.msra.mxu0 %v142_v0 }
   0x3   :  { %129 = vmatprep.subr.bf16.mxu0 %v170_v1 }
   0x4   :  { %8 = vsyncpa [#allocation3], 0  ;;  %v144_v3 = vld [vmem:[%s224_s1 + $0x10] sm:$0xff]   ;;  %v145_v4 = vld [vmem:[%s224_s1 + $0x18] sm:$0xff]   ;;  %vm56_vm1 = vcmask 523264   ;;  %s172_s24 = smov [#allocation2]  }
   0x5   :  { %v16_v5 = vld [vmem:[%s223_s0] sm:$0x1]  ;;  %s108_s25 = sshll.u32 %s172_s24, 4  ;;  %vm100_vm2 = vcmask 254976   ;;  %s109_s25 = int_to_ptr.vmem [resolvable:$true] %s108_s25 }
   0x6   :  { %130 = vmatpush3.bf16.msra.mxu0 %v143_v2  ;;  %v116_v6 = vld [vmem:[%s225_s2] ss:$0 sm:$0xff]  ;;  %s146_s1 = scalar_lea.vmem %s109_s25, 32  ;;  %p151_p1 = scmp.lt.s32.totalorder %s109_s25, %s109_s25 }
   0x7   :  { %131 = vmatprep.subr.bf16.mxu0 %v170_v1  ;;  %p147_p0 = scmp.ne.s32.totalorder %s109_s25, %s146_s1  ;;  %p152_p2 = scmp.lt.s32.totalorder %s146_s1, %s146_s1 }
   0x9   :  { %p153_p3 = por %p152_p2, %p151_p1 }
   0xa   :  { %132 = vmatpush3.bf16.msra.mxu0 %v144_v3 }
   0xb   :  { %133 = vmatprep.subr.bf16.mxu0 %v170_v1  ;;  %p154_p4 = pnand %p153_p3, %p147_p0 }
   0xe   :  { %134 = vmatpush3.bf16.msra.mxu0 %v145_v4 }
  0x11   :  { %136 = vmatmul.mubr.msk.bf16.vlgmr.msra.gmra.mrb[0].mxu0 %vm56_vm1, %v16_v5 }
  0xe4   :  { %v94_v7 = vpop.f32.mrb[0].mxu0 }
  0xe5   :  { %v95_v8 = vadd.f32 %v116_v6, %v94_v7  ;;  %v137_v9 = vpop.f32.mrb[1].mxu0 }
  0xe6   :  { %v97_v10 = vpop.f32.mrb[2].mxu0 }
  0xe7   :  { %v138_v11 = vpop.f32.mrb[3].mxu0  ;;  %101 = vst.msk [vmem:[#allocation2] sm:$0x3] %vm100_vm2, %v95_v8 }
  0xe8   :  { %157 = shalt.err (!%p154_p4)
}
  0xe9   :  { %s158_s2 = scalar_lea.hbm %s226_s3, 32 }
  0xea   :  { %p159_p5 = scmp.ne.s32.totalorder %s226_s3, %s158_s2  ;;  %p162_p6 = scmp.lt.u32.totalorder %s158_s2, %s226_s3 }
  0xec   :  { %p164_p7 = pnand %p162_p6, %p159_p5 }
  0xee   :  { %167 = shalt.err (!%p164_p7)
}
  0xef   :  { %111 = dma.vmem_to_hbm [thread:$0]  %s109_s25, 32, %s226_s3, [#allocation3]  }
  0xf0   :  { %168 = dma.done.wait [#allocation3], 32  }
  0xf1   :  { %169 = vsyncadd [#allocation3], 4294967264 }
  0xf2   :  { %115 = vsyncpa [#allocation3], 1 }

</bundles_post_ra>
